<compile_context>
chip_gen: v7x
topology: tpu7x:2x2x1
jax: 0.10.0
libtpu: 0.0.40
codegen_flags: <defaults>
</compile_context>

<pallas_src>
import jax
import jax.numpy as jnp
import numpy as np
from jax.experimental import pallas as pl
from jax.experimental.pallas import tpu as pltpu


# ------------------------------ Fused network kernel ------------------------------
def make_net_kernel(num_layers, T, Bc, Hp, unroll_time=16):
    """Ref layout (per grid step = one independent batch chunk):
         refs[0]                 : x        (T*Bc, D)   time-major, row = t*Bc + b, bf16
         refs[1+3l : 4+3l]       : w_ih_l (D_l,4Hp) bf16, w_hh_l (Hp,4Hp) bf16, b_l (1,4Hp) f32
         refs[1+3L], refs[2+3L]  : fc_w (Hp, O) bf16, fc_b (1, O) f32
         refs[3+3L]              : out      (Bc, O) f32
         refs[4+3L], refs[5+3L]  : gx ping-pong scratch, each (T*Bc, 4Hp) f32
    """

    def kernel(*refs):
        x_ref = refs[0]
        fc_w_ref = refs[1 + 3 * num_layers]
        fc_b_ref = refs[2 + 3 * num_layers]
        out_ref = refs[3 + 3 * num_layers]
        gx_refs = (refs[4 + 3 * num_layers], refs[5 + 3 * num_layers])

        # Layer-0 input projection for the whole chunk, hoisted out of the
        # recurrence: one wide bf16 MXU call with f32 accumulation.
        w_ih0 = refs[1][...]                               # (D, 4Hp) bf16
        b0 = refs[3][...]                                  # (1, 4Hp) f32
        gx_refs[0][...] = (
            jnp.dot(x_ref[...], w_ih0, preferred_element_type=jnp.float32) + b0)

        h = jnp.zeros((Bc, Hp), jnp.float32)
        c = jnp.zeros((Bc, Hp), jnp.float32)

        for l in range(num_layers):
            w_hh = refs[2 + 3 * l][...]                    # (Hp, 4Hp) bf16, read once
            gx_cur = gx_refs[l % 2]
            last_layer = l == num_layers - 1
            if not last_layer:
                w_ih_nx = refs[1 + 3 * (l + 1)][...]       # (Hp, 4Hp) bf16
                b_nx = refs[3 + 3 * (l + 1)][...]          # (1, 4Hp)  f32
                gx_nx = gx_refs[(l + 1) % 2]

            def cell(row, h, c):
                # Gate pre-activations: precomputed input projection + recurrent dot.
                gates = gx_cur[pl.ds(row, Bc), :] + jnp.dot(
                    h.astype(w_hh.dtype), w_hh, preferred_element_type=jnp.float32)
                # Lane-aligned gate slices (each gate block is Hp wide, Hp % 128 == 0).
                i_g = jax.nn.sigmoid(gates[:, 0 * Hp:1 * Hp])
                f_g = jax.nn.sigmoid(gates[:, 1 * Hp:2 * Hp])
                g_g = jnp.tanh(gates[:, 2 * Hp:3 * Hp])
                o_g = jax.nn.sigmoid(gates[:, 3 * Hp:4 * Hp])
                c_n = f_g * c + i_g * g_g
                h_n = o_g * jnp.tanh(c_n)
                if not last_layer:
                    # Fused next-layer input projection: h_n is already in vregs and
                    # this dot is off the h->h dependency chain (fills MXU slack).
                    gx_nx[pl.ds(row, Bc), :] = (
                        jnp.dot(h_n.astype(w_ih_nx.dtype), w_ih_nx,
                                preferred_element_type=jnp.float32) + b_nx)
                return h_n, c_n

            h = jnp.zeros((Bc, Hp), jnp.float32)
            c = jnp.zeros((Bc, Hp), jnp.float32)
            if T <= unroll_time:
                # Small T: full static unroll, all row offsets static & sublane aligned.
                for t in range(T):
                    h, c = cell(t * Bc, h, c)
            else:
                # Large T: partially unrolled fori_loop bounds live ranges.
                def body(t, hc):
                    return cell(pl.multiple_of(t * Bc, Bc), *hc)

                h, c = jax.lax.fori_loop(0, T, body, (h, c), unroll=4)

        # FC head on the last timestep of the last layer; the only HBM write.
        out_ref[...] = (
            jnp.dot(h.astype(fc_w_ref.dtype), fc_w_ref[...],
                    preferred_element_type=jnp.float32)
            + fc_b_ref[...]).astype(out_ref.dtype)

    return kernel


# ------------------------------ Packing helpers ------------------------------
def _round_up(n, m):
    return (n + m - 1) // m * m


def _pad_gate_rows(w, h, hp):
    """(4h, K) -> (4hp, K): zero-pad each of the 4 PyTorch gate row-blocks to hp rows."""
    return jnp.concatenate(
        [jnp.pad(w[g * h:(g + 1) * h], ((0, hp - h), (0, 0))) for g in range(4)], axis=0)


def _pad_gate_vec(b, h, hp):
    return jnp.concatenate(
        [jnp.pad(b[g * h:(g + 1) * h], (0, hp - h)) for g in range(4)], axis=0)


# ------------------------------ Net forward (wrapper) ------------------------------
def net_forward(x_btd, params, *, param_dtype=jnp.bfloat16, block_b=8):
    """x_btd: (B, T, input_dim) batch_first, like the PyTorch module. Returns (B, O)."""
    assert block_b % 8 == 0, "batch chunk must be sublane (8) aligned"
    B, T, D = x_btd.shape
    lstm = params["lstm"]
    L = len(lstm)
    H = lstm[0][1].shape[1]                     # w_hh: (4H, H)
    O = params["fc_w"].shape[0]
    Hp = _round_up(H, 128)                      # lane-align each gate block
    G = 4 * Hp

    num_chunks = -(-B // block_b)               # independent batch chunks (grid axis)
    Bc = block_b
    Btot = num_chunks * Bc

    # ---- pack / pad parameters (gate lane padding, bf16 MXU storage, f32 bias) ----
    packed = []
    for l, (w_ih, w_hh, b_ih, b_hh) in enumerate(lstm):
        wi = _pad_gate_rows(w_ih.astype(jnp.float32), H, Hp)             # (4Hp, D_l)
        if l > 0:                                                        # hidden input is Hp wide
            wi = jnp.pad(wi, ((0, 0), (0, Hp - H)))
        wh = jnp.pad(_pad_gate_rows(w_hh.astype(jnp.float32), H, Hp),
                     ((0, 0), (0, Hp - H)))                              # (4Hp, Hp)
        b = _pad_gate_vec((b_ih + b_hh).astype(jnp.float32), H, Hp)      # (4Hp,)
        packed += [wi.T.astype(param_dtype),                             # (D_l, 4Hp) bf16
                   wh.T.astype(param_dtype),                             # (Hp, 4Hp)  bf16
                   b[None, :]]                                           # (1, 4Hp)   f32
    fc_w = jnp.pad(params["fc_w"].astype(jnp.float32), ((0, 0), (0, Hp - H)))
    packed += [fc_w.T.astype(param_dtype),                               # (Hp, O) bf16
               params["fc_b"].astype(jnp.float32)[None, :]]              # (1, O)  f32

    # ---- input: time-major, batch padded to sublane multiple, chunked ----
    x_t = jnp.transpose(x_btd, (1, 0, 2)).astype(jnp.float32)            # (T, B, D)
    x_t = jnp.pad(x_t, ((0, 0), (0, Btot - B), (0, 0)))
    x_t = x_t.reshape(T, num_chunks, Bc, D).transpose(1, 0, 2, 3)
    x_in = x_t.reshape(num_chunks, T * Bc, D).astype(param_dtype)        # row = t*Bc + b

    def full_spec(shape):
        nd = len(shape)
        return pl.BlockSpec(shape, lambda i, _nd=nd: (0,) * _nd)

    in_specs = [pl.BlockSpec((None, T * Bc, D), lambda i: (i, 0, 0))]
    in_specs += [full_spec(p.shape) for p in packed]
    out_specs = pl.BlockSpec((None, Bc, O), lambda i: (i, 0, 0))

    # Explicit VMEM budget: blocked x/out (double-buffered) + weights + gx scratch.
    def nb(a):
        return int(np.prod(a.shape)) * a.dtype.itemsize

    per_chunk = nb(x_in) // num_chunks + Bc * O * 4
    weight_bytes = sum(nb(p) for p in packed)
    scratch_bytes = 2 * T * Bc * G * 4
    vmem_bytes = int(min(max(2 * (per_chunk + weight_bytes) + scratch_bytes + (4 << 20),
                             16 << 20), 128 << 20))

    out = pl.pallas_call(
        make_net_kernel(L, T, Bc, Hp),
        out_shape=jax.ShapeDtypeStruct((num_chunks, Bc, O), jnp.float32),
        grid=(num_chunks,),
        in_specs=in_specs,
        out_specs=out_specs,
        scratch_shapes=[pltpu.VMEM((T * Bc, G), jnp.float32),
                        pltpu.VMEM((T * Bc, G), jnp.float32)],
        compiler_params=pltpu.CompilerParams(
            dimension_semantics=("parallel",),
            vmem_limit_bytes=vmem_bytes),
    )(x_in, *packed)

    return out.reshape(Btot, O)[:B]


# ------------------------------ Parameter init (PyTorch layout, deterministic) ------------------------------
def init_params(key, input_dim, hidden_dim, output_dim, layers):
    bound = 1.0 / np.sqrt(hidden_dim)
    lstm_params = []
    in_dim = input_dim
    for _ in range(layers):
        key, k1, k2, k3, k4 = jax.random.split(key, 5)
        w_ih = jax.random.uniform(k1, (4 * hidden_dim, in_dim),
                                  minval=-bound, maxval=bound, dtype=jnp.float32)
        w_hh = jax.random.uniform(k2, (4 * hidden_dim, hidden_dim),
                                  minval=-bound, maxval=bound, dtype=jnp.float32)
        b_ih = jax.random.uniform(k3, (4 * hidden_dim,),
                                  minval=-bound, maxval=bound, dtype=jnp.float32)
        b_hh = jax.random.uniform(k4, (4 * hidden_dim,),
                                  minval=-bound, maxval=bound, dtype=jnp.float32)
        lstm_params.append((w_ih, w_hh, b_ih, b_hh))
        in_dim = hidden_dim
    key, k5, k6 = jax.random.split(key, 3)
    fc_w = jax.random.uniform(k5, (output_dim, hidden_dim),
                              minval=-bound, maxval=bound, dtype=jnp.float32)
    fc_b = jax.random.uniform(k6, (output_dim,),
                              minval=-bound, maxval=bound, dtype=jnp.float32)
    return {"lstm": lstm_params, "fc_w": fc_w, "fc_b": fc_b}


# ------------------------------ Pure-JAX reference ------------------------------
def reference_forward(x_btd, params, quantize=False):
    """quantize=False: exact f32 semantics of the PyTorch module (eval mode).
    quantize=True : same math with bf16-rounded MXU operands (matches kernel storage)."""
    if quantize:
        q = lambda a: a.astype(jnp.bfloat16).astype(jnp.float32)
    else:
        q = lambda a: a.astype(jnp.float32)
    xs = jnp.transpose(x_btd, (1, 0, 2)).astype(jnp.float32)    # (T, B, D)
    B = xs.shape[1]
    seq = q(xs)
    h = None
    for (w_ih, w_hh, b_ih, b_hh) in params["lstm"]:
        H = w_hh.shape[1]
        wi, wh = q(w_ih.T), q(w_hh.T)
        b = (b_ih + b_hh)[None, :].astype(jnp.float32)
        gx = jnp.matmul(seq, wi) + b                             # (T, B, 4H)

        def step(carry, gx_t):
            h, c = carry
            gates = gx_t + q(h) @ wh
            i = jax.nn.sigmoid(gates[:, 0 * H:1 * H])
            f = jax.nn.sigmoid(gates[:, 1 * H:2 * H])
            g = jnp.tanh(gates[:, 2 * H:3 * H])
            o = jax.nn.sigmoid(gates[:, 3 * H:4 * H])
            c = f * c + i * g
            h = o * jnp.tanh(c)
            return (h, c), h

        (h, _), hs = jax.lax.scan(
            step, (jnp.zeros((B, H), jnp.float32), jnp.zeros((B, H), jnp.float32)), gx)
        seq = q(hs)
    return q(h) @ q(params["fc_w"].T) + params["fc_b"][None, :].astype(jnp.float32)


if __name__ == "__main__":
    input_dim, hidden_dim, seq_len, output_dim, layers = 4, 16, 8, 1, 2
    batch = 2

    key = jax.random.PRNGKey(0)
    key, kx, kp = jax.random.split(key, 3)
    x = jax.random.normal(kx, (batch, seq_len, input_dim), dtype=jnp.float32)
    params = init_params(kp, input_dim, hidden_dim, output_dim, layers)

    fwd = jax.jit(net_forward)
    out = jax.block_until_ready(fwd(x, params))
    assert out.shape == (batch, output_dim), out.shape

    # Tight check against a reference that applies identical bf16 operand rounding.
    ref_q = jax.block_until_ready(reference_forward(x, params, quantize=True))
    np.testing.assert_allclose(np.asarray(out), np.asarray(ref_q), atol=1e-4, rtol=1e-4)

    # Loose check against the exact f32 PyTorch-semantics reference
    # (bf16 weight/input storage precision).
    ref_f = jax.block_until_ready(reference_forward(x, params, quantize=False))
    np.testing.assert_allclose(np.asarray(out), np.asarray(ref_f), atol=1e-1, rtol=0)

    print("KERNEL_OK")
</pallas_src>

<mosaic_0001>
module attributes {stable_mosaic.version = 11 : i64} {
  func.func @kernel(%arg0: i32, %arg1: memref<1x64x4xbf16, #tpu.memory_space<vmem>>, %arg2: memref<4x512xbf16, #tpu.memory_space<vmem>>, %arg3: memref<128x512xbf16, #tpu.memory_space<vmem>>, %arg4: memref<1x512xf32, #tpu.memory_space<vmem>>, %arg5: memref<128x512xbf16, #tpu.memory_space<vmem>>, %arg6: memref<128x512xbf16, #tpu.memory_space<vmem>>, %arg7: memref<1x512xf32, #tpu.memory_space<vmem>>, %arg8: memref<128x1xbf16, #tpu.memory_space<vmem>>, %arg9: memref<1x1xf32, #tpu.memory_space<vmem>>, %arg10: memref<1x8x1xf32, #tpu.memory_space<vmem>>, %arg11: memref<64x512xf32, #tpu.memory_space<vmem>>, %arg12: memref<64x512xf32, #tpu.memory_space<vmem>>) attributes {dimension_semantics = [#tpu.dimension_semantics<parallel>], iteration_bounds = array<i64: 1>, scalar_prefetch = 0 : i64, scratch_operands = 2 : i64, tpu.core_type = #tpu.core_type<tc>, window_params = [{transform_indices = @transform_0, window_bounds = array<i64: 1, 64, 4>}, {pipeline_mode = #tpu.pipeline_mode<synchronous>, transform_indices = @transform_1, window_bounds = array<i64: 4, 512>}, {pipeline_mode = #tpu.pipeline_mode<synchronous>, transform_indices = @transform_2, window_bounds = array<i64: 128, 512>}, {pipeline_mode = #tpu.pipeline_mode<synchronous>, transform_indices = @transform_3, window_bounds = array<i64: 1, 512>}, {pipeline_mode = #tpu.pipeline_mode<synchronous>, transform_indices = @transform_4, window_bounds = array<i64: 128, 512>}, {pipeline_mode = #tpu.pipeline_mode<synchronous>, transform_indices = @transform_5, window_bounds = array<i64: 128, 512>}, {pipeline_mode = #tpu.pipeline_mode<synchronous>, transform_indices = @transform_6, window_bounds = array<i64: 1, 512>}, {pipeline_mode = #tpu.pipeline_mode<synchronous>, transform_indices = @transform_7, window_bounds = array<i64: 128, 1>}, {pipeline_mode = #tpu.pipeline_mode<synchronous>, transform_indices = @transform_8, window_bounds = array<i64: 1, 1>}, {transform_indices = @transform_9, window_bounds = array<i64: 1, 8, 1>}]} {
    %c0 = arith.constant 0 : index
    %c0_0 = arith.constant 0 : index
    %0 = vector.load %arg2[%c0, %c0_0] : memref<4x512xbf16, #tpu.memory_space<vmem>>, vector<4x512xbf16>
    %c0_1 = arith.constant 0 : index
    %c0_2 = arith.constant 0 : index
    %1 = vector.load %arg4[%c0_1, %c0_2] : memref<1x512xf32, #tpu.memory_space<vmem>>, vector<1x512xf32>
    %c0_3 = arith.constant 0 : index
    %c0_4 = arith.constant 0 : index
    %c0_5 = arith.constant 0 : index
    %2 = vector.load %arg1[%c0_3, %c0_4, %c0_5] : memref<1x64x4xbf16, #tpu.memory_space<vmem>>, vector<1x64x4xbf16>
    %3 = vector.shape_cast %2 : vector<1x64x4xbf16> to vector<64x4xbf16>
    %cst = arith.constant dense<0.000000e+00> : vector<64x512xf32>
    %4 = tpu.matmul %3, %0, %cst {dimension_numbers = #tpu.dot_dimension_numbers<[1], [0], [0], [1], [0, 0, 1, 1], [], []>} : vector<64x4xbf16>, vector<4x512xbf16>, vector<64x512xf32> -> vector<64x512xf32>
    %5 = vector.broadcast %1 : vector<1x512xf32> to vector<64x512xf32>
    %6 = arith.addf %4, %5 : vector<64x512xf32>
    %c0_6 = arith.constant 0 : index
    %c0_7 = arith.constant 0 : index
    %7 = vector.load %arg11[%c0_6, %c0_7] : memref<64x512xf32, #tpu.memory_space<vmem>>, vector<64x512xf32>
    tpu.vector_store %arg11[%c0_6, %c0_7], %6 {strides = array<i32>} : memref<64x512xf32, #tpu.memory_space<vmem>>, vector<64x512xf32>,
    %c0_8 = arith.constant 0 : index
    %c0_9 = arith.constant 0 : index
    %8 = vector.load %arg3[%c0_8, %c0_9] : memref<128x512xbf16, #tpu.memory_space<vmem>>, vector<128x512xbf16>
    %c0_10 = arith.constant 0 : index
    %c0_11 = arith.constant 0 : index
    %9 = vector.load %arg5[%c0_10, %c0_11] : memref<128x512xbf16, #tpu.memory_space<vmem>>, vector<128x512xbf16>
    %c0_12 = arith.constant 0 : index
    %c0_13 = arith.constant 0 : index
    %10 = vector.load %arg7[%c0_12, %c0_13] : memref<1x512xf32, #tpu.memory_space<vmem>>, vector<1x512xf32>
    %cst_14 = arith.constant 0.000000e+00 : f32
    %11 = vector.broadcast %cst_14 : f32 to vector<8x128xf32>
    %cst_15 = arith.constant 0.000000e+00 : f32
    %12 = vector.broadcast %cst_15 : f32 to vector<8x128xf32>
    %c0_16 = arith.constant 0 : index
    %c0_17 = arith.constant 0 : index
    %13 = vector.load %arg11[%c0_16, %c0_17] : memref<64x512xf32, #tpu.memory_space<vmem>>, vector<8x512xf32>
    %14 = arith.truncf %11 : vector<8x128xf32> to vector<8x128xbf16>
    %cst_18 = arith.constant dense<0.000000e+00> : vector<8x512xf32>
    %15 = tpu.matmul %14, %8, %cst_18 {dimension_numbers = #tpu.dot_dimension_numbers<[1], [0], [0], [1], [0, 0, 1, 1], [], []>} : vector<8x128xbf16>, vector<128x512xbf16>, vector<8x512xf32> -> vector<8x512xf32>
    %16 = arith.addf %13, %15 : vector<8x512xf32>
    %17 = vector.extract_strided_slice %16 {offsets = [0, 0], sizes = [8, 128], strides = [1, 1]} : vector<8x512xf32> to vector<8x128xf32>
    %18 = arith.negf %17 : vector<8x128xf32>
    %19 = math.exp %18 : vector<8x128xf32>
    %cst_19 = arith.constant 1.000000e+00 : f32
    %20 = vector.broadcast %cst_19 : f32 to vector<8x128xf32>
    %21 = arith.addf %20, %19 : vector<8x128xf32>
    %22 = arith.divf %20, %21 : vector<8x128xf32>
    %23 = vector.extract_strided_slice %16 {offsets = [0, 128], sizes = [8, 128], strides = [1, 1]} : vector<8x512xf32> to vector<8x128xf32>
    %24 = arith.negf %23 : vector<8x128xf32>
    %25 = math.exp %24 : vector<8x128xf32>
    %cst_20 = arith.constant 1.000000e+00 : f32
    %26 = vector.broadcast %cst_20 : f32 to vector<8x128xf32>
    %27 = arith.addf %26, %25 : vector<8x128xf32>
    %28 = arith.divf %26, %27 : vector<8x128xf32>
    %29 = vector.extract_strided_slice %16 {offsets = [0, 256], sizes = [8, 128], strides = [1, 1]} : vector<8x512xf32> to vector<8x128xf32>
    %30 = math.tanh %29 : vector<8x128xf32>
    %31 = vector.extract_strided_slice %16 {offsets = [0, 384], sizes = [8, 128], strides = [1, 1]} : vector<8x512xf32> to vector<8x128xf32>
    %32 = arith.negf %31 : vector<8x128xf32>
    %33 = math.exp %32 : vector<8x128xf32>
    %cst_21 = arith.constant 1.000000e+00 : f32
    %34 = vector.broadcast %cst_21 : f32 to vector<8x128xf32>
    %35 = arith.addf %34, %33 : vector<8x128xf32>
    %36 = arith.divf %34, %35 : vector<8x128xf32>
    %37 = arith.mulf %28, %12 : vector<8x128xf32>
    %38 = arith.mulf %22, %30 : vector<8x128xf32>
    %39 = arith.addf %37, %38 : vector<8x128xf32>
    %40 = math.tanh %39 : vector<8x128xf32>
    %41 = arith.mulf %36, %40 : vector<8x128xf32>
    %42 = arith.truncf %41 : vector<8x128xf32> to vector<8x128xbf16>
    %cst_22 = arith.constant dense<0.000000e+00> : vector<8x512xf32>
    %43 = tpu.matmul %42, %9, %cst_22 {dimension_numbers = #tpu.dot_dimension_numbers<[1], [0], [0], [1], [0, 0, 1, 1], [], []>} : vector<8x128xbf16>, vector<128x512xbf16>, vector<8x512xf32> -> vector<8x512xf32>
    %44 = vector.broadcast %10 : vector<1x512xf32> to vector<8x512xf32>
    %45 = arith.addf %43, %44 : vector<8x512xf32>
    %c0_23 = arith.constant 0 : index
    %c0_24 = arith.constant 0 : index
    %46 = vector.load %arg12[%c0_23, %c0_24] : memref<64x512xf32, #tpu.memory_space<vmem>>, vector<8x512xf32>
    tpu.vector_store %arg12[%c0_23, %c0_24], %45 {strides = array<i32>} : memref<64x512xf32, #tpu.memory_space<vmem>>, vector<8x512xf32>,
    %c8 = arith.constant 8 : index
    %c0_25 = arith.constant 0 : index
    %47 = vector.load %arg11[%c8, %c0_25] : memref<64x512xf32, #tpu.memory_space<vmem>>, vector<8x512xf32>
    %48 = arith.truncf %41 : vector<8x128xf32> to vector<8x128xbf16>
    %cst_26 = arith.constant dense<0.000000e+00> : vector<8x512xf32>
    %49 = tpu.matmul %48, %8, %cst_26 {dimension_numbers = #tpu.dot_dimension_numbers<[1], [0], [0], [1], [0, 0, 1, 1], [], []>} : vector<8x128xbf16>, vector<128x512xbf16>, vector<8x512xf32> -> vector<8x512xf32>
    %50 = arith.addf %47, %49 : vector<8x512xf32>
    %51 = vector.extract_strided_slice %50 {offsets = [0, 0], sizes = [8, 128], strides = [1, 1]} : vector<8x512xf32> to vector<8x128xf32>
    %52 = arith.negf %51 : vector<8x128xf32>
    %53 = math.exp %52 : vector<8x128xf32>
    %cst_27 = arith.constant 1.000000e+00 : f32
    %54 = vector.broadcast %cst_27 : f32 to vector<8x128xf32>
    %55 = arith.addf %54, %53 : vector<8x128xf32>
    %56 = arith.divf %54, %55 : vector<8x128xf32>
    %57 = vector.extract_strided_slice %50 {offsets = [0, 128], sizes = [8, 128], strides = [1, 1]} : vector<8x512xf32> to vector<8x128xf32>
    %58 = arith.negf %57 : vector<8x128xf32>
    %59 = math.exp %58 : vector<8x128xf32>
    %cst_28 = arith.constant 1.000000e+00 : f32
    %60 = vector.broadcast %cst_28 : f32 to vector<8x128xf32>
    %61 = arith.addf %60, %59 : vector<8x128xf32>
    %62 = arith.divf %60, %61 : vector<8x128xf32>
    %63 = vector.extract_strided_slice %50 {offsets = [0, 256], sizes = [8, 128], strides = [1, 1]} : vector<8x512xf32> to vector<8x128xf32>
    %64 = math.tanh %63 : vector<8x128xf32>
    %65 = vector.extract_strided_slice %50 {offsets = [0, 384], sizes = [8, 128], strides = [1, 1]} : vector<8x512xf32> to vector<8x128xf32>
    %66 = arith.negf %65 : vector<8x128xf32>
    %67 = math.exp %66 : vector<8x128xf32>
    %cst_29 = arith.constant 1.000000e+00 : f32
    %68 = vector.broadcast %cst_29 : f32 to vector<8x128xf32>
    %69 = arith.addf %68, %67 : vector<8x128xf32>
    %70 = arith.divf %68, %69 : vector<8x128xf32>
    %71 = arith.mulf %62, %39 : vector<8x128xf32>
    %72 = arith.mulf %56, %64 : vector<8x128xf32>
    %73 = arith.addf %71, %72 : vector<8x128xf32>
    %74 = math.tanh %73 : vector<8x128xf32>
    %75 = arith.mulf %70, %74 : vector<8x128xf32>
    %76 = arith.truncf %75 : vector<8x128xf32> to vector<8x128xbf16>
    %cst_30 = arith.constant dense<0.000000e+00> : vector<8x512xf32>
    %77 = tpu.matmul %76, %9, %cst_30 {dimension_numbers = #tpu.dot_dimension_numbers<[1], [0], [0], [1], [0, 0, 1, 1], [], []>} : vector<8x128xbf16>, vector<128x512xbf16>, vector<8x512xf32> -> vector<8x512xf32>
    %78 = vector.broadcast %10 : vector<1x512xf32> to vector<8x512xf32>
    %79 = arith.addf %77, %78 : vector<8x512xf32>
    %c8_31 = arith.constant 8 : index
    %c0_32 = arith.constant 0 : index
    %80 = vector.load %arg12[%c8_31, %c0_32] : memref<64x512xf32, #tpu.memory_space<vmem>>, vector<8x512xf32>
    tpu.vector_store %arg12[%c8_31, %c0_32], %79 {strides = array<i32>} : memref<64x512xf32, #tpu.memory_space<vmem>>, vector<8x512xf32>,
    %c16 = arith.constant 16 : index
    %c0_33 = arith.constant 0 : index
    %81 = vector.load %arg11[%c16, %c0_33] : memref<64x512xf32, #tpu.memory_space<vmem>>, vector<8x512xf32>
    %82 = arith.truncf %75 : vector<8x128xf32> to vector<8x128xbf16>
    %cst_34 = arith.constant dense<0.000000e+00> : vector<8x512xf32>
    %83 = tpu.matmul %82, %8, %cst_34 {dimension_numbers = #tpu.dot_dimension_numbers<[1], [0], [0], [1], [0, 0, 1, 1], [], []>} : vector<8x128xbf16>, vector<128x512xbf16>, vector<8x512xf32> -> vector<8x512xf32>
    %84 = arith.addf %81, %83 : vector<8x512xf32>
    %85 = vector.extract_strided_slice %84 {offsets = [0, 0], sizes = [8, 128], strides = [1, 1]} : vector<8x512xf32> to vector<8x128xf32>
    %86 = arith.negf %85 : vector<8x128xf32>
    %87 = math.exp %86 : vector<8x128xf32>
    %cst_35 = arith.constant 1.000000e+00 : f32
    %88 = vector.broadcast %cst_35 : f32 to vector<8x128xf32>
    %89 = arith.addf %88, %87 : vector<8x128xf32>
    %90 = arith.divf %88, %89 : vector<8x128xf32>
    %91 = vector.extract_strided_slice %84 {offsets = [0, 128], sizes = [8, 128], strides = [1, 1]} : vector<8x512xf32> to vector<8x128xf32>
    %92 = arith.negf %91 : vector<8x128xf32>
    %93 = math.exp %92 : vector<8x128xf32>
    %cst_36 = arith.constant 1.000000e+00 : f32
    %94 = vector.broadcast %cst_36 : f32 to vector<8x128xf32>
    %95 = arith.addf %94, %93 : vector<8x128xf32>
    %96 = arith.divf %94, %95 : vector<8x128xf32>
    %97 = vector.extract_strided_slice %84 {offsets = [0, 256], sizes = [8, 128], strides = [1, 1]} : vector<8x512xf32> to vector<8x128xf32>
    %98 = math.tanh %97 : vector<8x128xf32>
    %99 = vector.extract_strided_slice %84 {offsets = [0, 384], sizes = [8, 128], strides = [1, 1]} : vector<8x512xf32> to vector<8x128xf32>
    %100 = arith.negf %99 : vector<8x128xf32>
    %101 = math.exp %100 : vector<8x128xf32>
    %cst_37 = arith.constant 1.000000e+00 : f32
    %102 = vector.broadcast %cst_37 : f32 to vector<8x128xf32>
    %103 = arith.addf %102, %101 : vector<8x128xf32>
    %104 = arith.divf %102, %103 : vector<8x128xf32>
    %105 = arith.mulf %96, %73 : vector<8x128xf32>
    %106 = arith.mulf %90, %98 : vector<8x128xf32>
    %107 = arith.addf %105, %106 : vector<8x128xf32>
    %108 = math.tanh %107 : vector<8x128xf32>
    %109 = arith.mulf %104, %108 : vector<8x128xf32>
    %110 = arith.truncf %109 : vector<8x128xf32> to vector<8x128xbf16>
    %cst_38 = arith.constant dense<0.000000e+00> : vector<8x512xf32>
    %111 = tpu.matmul %110, %9, %cst_38 {dimension_numbers = #tpu.dot_dimension_numbers<[1], [0], [0], [1], [0, 0, 1, 1], [], []>} : vector<8x128xbf16>, vector<128x512xbf16>, vector<8x512xf32> -> vector<8x512xf32>
    %112 = vector.broadcast %10 : vector<1x512xf32> to vector<8x512xf32>
    %113 = arith.addf %111, %112 : vector<8x512xf32>
    %c16_39 = arith.constant 16 : index
    %c0_40 = arith.constant 0 : index
    %114 = vector.load %arg12[%c16_39, %c0_40] : memref<64x512xf32, #tpu.memory_space<vmem>>, vector<8x512xf32>
    tpu.vector_store %arg12[%c16_39, %c0_40], %113 {strides = array<i32>} : memref<64x512xf32, #tpu.memory_space<vmem>>, vector<8x512xf32>,
    %c24 = arith.constant 24 : index
    %c0_41 = arith.constant 0 : index
    %115 = vector.load %arg11[%c24, %c0_41] : memref<64x512xf32, #tpu.memory_space<vmem>>, vector<8x512xf32>
    %116 = arith.truncf %109 : vector<8x128xf32> to vector<8x128xbf16>
    %cst_42 = arith.constant dense<0.000000e+00> : vector<8x512xf32>
    %117 = tpu.matmul %116, %8, %cst_42 {dimension_numbers = #tpu.dot_dimension_numbers<[1], [0], [0], [1], [0, 0, 1, 1], [], []>} : vector<8x128xbf16>, vector<128x512xbf16>, vector<8x512xf32> -> vector<8x512xf32>
    %118 = arith.addf %115, %117 : vector<8x512xf32>
    %119 = vector.extract_strided_slice %118 {offsets = [0, 0], sizes = [8, 128], strides = [1, 1]} : vector<8x512xf32> to vector<8x128xf32>
    %120 = arith.negf %119 : vector<8x128xf32>
    %121 = math.exp %120 : vector<8x128xf32>
    %cst_43 = arith.constant 1.000000e+00 : f32
    %122 = vector.broadcast %cst_43 : f32 to vector<8x128xf32>
    %123 = arith.addf %122, %121 : vector<8x128xf32>
    %124 = arith.divf %122, %123 : vector<8x128xf32>
    %125 = vector.extract_strided_slice %118 {offsets = [0, 128], sizes = [8, 128], strides = [1, 1]} : vector<8x512xf32> to vector<8x128xf32>
    %126 = arith.negf %125 : vector<8x128xf32>
    %127 = math.exp %126 : vector<8x128xf32>
    %cst_44 = arith.constant 1.000000e+00 : f32
    %128 = vector.broadcast %cst_44 : f32 to vector<8x128xf32>
    %129 = arith.addf %128, %127 : vector<8x128xf32>
    %130 = arith.divf %128, %129 : vector<8x128xf32>
    %131 = vector.extract_strided_slice %118 {offsets = [0, 256], sizes = [8, 128], strides = [1, 1]} : vector<8x512xf32> to vector<8x128xf32>
    %132 = math.tanh %131 : vector<8x128xf32>
    %133 = vector.extract_strided_slice %118 {offsets = [0, 384], sizes = [8, 128], strides = [1, 1]} : vector<8x512xf32> to vector<8x128xf32>
    %134 = arith.negf %133 : vector<8x128xf32>
    %135 = math.exp %134 : vector<8x128xf32>
    %cst_45 = arith.constant 1.000000e+00 : f32
    %136 = vector.broadcast %cst_45 : f32 to vector<8x128xf32>
    %137 = arith.addf %136, %135 : vector<8x128xf32>
    %138 = arith.divf %136, %137 : vector<8x128xf32>
    %139 = arith.mulf %130, %107 : vector<8x128xf32>
    %140 = arith.mulf %124, %132 : vector<8x128xf32>
    %141 = arith.addf %139, %140 : vector<8x128xf32>
    %142 = math.tanh %141 : vector<8x128xf32>
    %143 = arith.mulf %138, %142 : vector<8x128xf32>
    %144 = arith.truncf %143 : vector<8x128xf32> to vector<8x128xbf16>
    %cst_46 = arith.constant dense<0.000000e+00> : vector<8x512xf32>
    %145 = tpu.matmul %144, %9, %cst_46 {dimension_numbers = #tpu.dot_dimension_numbers<[1], [0], [0], [1], [0, 0, 1, 1], [], []>} : vector<8x128xbf16>, vector<128x512xbf16>, vector<8x512xf32> -> vector<8x512xf32>
    %146 = vector.broadcast %10 : vector<1x512xf32> to vector<8x512xf32>
    %147 = arith.addf %145, %146 : vector<8x512xf32>
    %c24_47 = arith.constant 24 : index
    %c0_48 = arith.constant 0 : index
    %148 = vector.load %arg12[%c24_47, %c0_48] : memref<64x512xf32, #tpu.memory_space<vmem>>, vector<8x512xf32>
    tpu.vector_store %arg12[%c24_47, %c0_48], %147 {strides = array<i32>} : memref<64x512xf32, #tpu.memory_space<vmem>>, vector<8x512xf32>,
    %c32 = arith.constant 32 : index
    %c0_49 = arith.constant 0 : index
    %149 = vector.load %arg11[%c32, %c0_49] : memref<64x512xf32, #tpu.memory_space<vmem>>, vector<8x512xf32>
    %150 = arith.truncf %143 : vector<8x128xf32> to vector<8x128xbf16>
    %cst_50 = arith.constant dense<0.000000e+00> : vector<8x512xf32>
    %151 = tpu.matmul %150, %8, %cst_50 {dimension_numbers = #tpu.dot_dimension_numbers<[1], [0], [0], [1], [0, 0, 1, 1], [], []>} : vector<8x128xbf16>, vector<128x512xbf16>, vector<8x512xf32> -> vector<8x512xf32>
    %152 = arith.addf %149, %151 : vector<8x512xf32>
    %153 = vector.extract_strided_slice %152 {offsets = [0, 0], sizes = [8, 128], strides = [1, 1]} : vector<8x512xf32> to vector<8x128xf32>
    %154 = arith.negf %153 : vector<8x128xf32>
    %155 = math.exp %154 : vector<8x128xf32>
    %cst_51 = arith.constant 1.000000e+00 : f32
    %156 = vector.broadcast %cst_51 : f32 to vector<8x128xf32>
    %157 = arith.addf %156, %155 : vector<8x128xf32>
    %158 = arith.divf %156, %157 : vector<8x128xf32>
    %159 = vector.extract_strided_slice %152 {offsets = [0, 128], sizes = [8, 128], strides = [1, 1]} : vector<8x512xf32> to vector<8x128xf32>
    %160 = arith.negf %159 : vector<8x128xf32>
    %161 = math.exp %160 : vector<8x128xf32>
    %cst_52 = arith.constant 1.000000e+00 : f32
    %162 = vector.broadcast %cst_52 : f32 to vector<8x128xf32>
    %163 = arith.addf %162, %161 : vector<8x128xf32>
    %164 = arith.divf %162, %163 : vector<8x128xf32>
    %165 = vector.extract_strided_slice %152 {offsets = [0, 256], sizes = [8, 128], strides = [1, 1]} : vector<8x512xf32> to vector<8x128xf32>
    %166 = math.tanh %165 : vector<8x128xf32>
    %167 = vector.extract_strided_slice %152 {offsets = [0, 384], sizes = [8, 128], strides = [1, 1]} : vector<8x512xf32> to vector<8x128xf32>
    %168 = arith.negf %167 : vector<8x128xf32>
    %169 = math.exp %168 : vector<8x128xf32>
    %cst_53 = arith.constant 1.000000e+00 : f32
    %170 = vector.broadcast %cst_53 : f32 to vector<8x128xf32>
    %171 = arith.addf %170, %169 : vector<8x128xf32>
    %172 = arith.divf %170, %171 : vector<8x128xf32>
    %173 = arith.mulf %164, %141 : vector<8x128xf32>
    %174 = arith.mulf %158, %166 : vector<8x128xf32>
    %175 = arith.addf %173, %174 : vector<8x128xf32>
    %176 = math.tanh %175 : vector<8x128xf32>
    %177 = arith.mulf %172, %176 : vector<8x128xf32>
    %178 = arith.truncf %177 : vector<8x128xf32> to vector<8x128xbf16>
    %cst_54 = arith.constant dense<0.000000e+00> : vector<8x512xf32>
    %179 = tpu.matmul %178, %9, %cst_54 {dimension_numbers = #tpu.dot_dimension_numbers<[1], [0], [0], [1], [0, 0, 1, 1], [], []>} : vector<8x128xbf16>, vector<128x512xbf16>, vector<8x512xf32> -> vector<8x512xf32>
    %180 = vector.broadcast %10 : vector<1x512xf32> to vector<8x512xf32>
    %181 = arith.addf %179, %180 : vector<8x512xf32>
    %c32_55 = arith.constant 32 : index
    %c0_56 = arith.constant 0 : index
    %182 = vector.load %arg12[%c32_55, %c0_56] : memref<64x512xf32, #tpu.memory_space<vmem>>, vector<8x512xf32>
    tpu.vector_store %arg12[%c32_55, %c0_56], %181 {strides = array<i32>} : memref<64x512xf32, #tpu.memory_space<vmem>>, vector<8x512xf32>,
    %c40 = arith.constant 40 : index
    %c0_57 = arith.constant 0 : index
    %183 = vector.load %arg11[%c40, %c0_57] : memref<64x512xf32, #tpu.memory_space<vmem>>, vector<8x512xf32>
    %184 = arith.truncf %177 : vector<8x128xf32> to vector<8x128xbf16>
    %cst_58 = arith.constant dense<0.000000e+00> : vector<8x512xf32>
    %185 = tpu.matmul %184, %8, %cst_58 {dimension_numbers = #tpu.dot_dimension_numbers<[1], [0], [0], [1], [0, 0, 1, 1], [], []>} : vector<8x128xbf16>, vector<128x512xbf16>, vector<8x512xf32> -> vector<8x512xf32>
    %186 = arith.addf %183, %185 : vector<8x512xf32>
    %187 = vector.extract_strided_slice %186 {offsets = [0, 0], sizes = [8, 128], strides = [1, 1]} : vector<8x512xf32> to vector<8x128xf32>
    %188 = arith.negf %187 : vector<8x128xf32>
    %189 = math.exp %188 : vector<8x128xf32>
    %cst_59 = arith.constant 1.000000e+00 : f32
    %190 = vector.broadcast %cst_59 : f32 to vector<8x128xf32>
    %191 = arith.addf %190, %189 : vector<8x128xf32>
    %192 = arith.divf %190, %191 : vector<8x128xf32>
    %193 = vector.extract_strided_slice %186 {offsets = [0, 128], sizes = [8, 128], strides = [1, 1]} : vector<8x512xf32> to vector<8x128xf32>
    %194 = arith.negf %193 : vector<8x128xf32>
    %195 = math.exp %194 : vector<8x128xf32>
    %cst_60 = arith.constant 1.000000e+00 : f32
    %196 = vector.broadcast %cst_60 : f32 to vector<8x128xf32>
    %197 = arith.addf %196, %195 : vector<8x128xf32>
    %198 = arith.divf %196, %197 : vector<8x128xf32>
    %199 = vector.extract_strided_slice %186 {offsets = [0, 256], sizes = [8, 128], strides = [1, 1]} : vector<8x512xf32> to vector<8x128xf32>
    %200 = math.tanh %199 : vector<8x128xf32>
    %201 = vector.extract_strided_slice %186 {offsets = [0, 384], sizes = [8, 128], strides = [1, 1]} : vector<8x512xf32> to vector<8x128xf32>
    %202 = arith.negf %201 : vector<8x128xf32>
    %203 = math.exp %202 : vector<8x128xf32>
    %cst_61 = arith.constant 1.000000e+00 : f32
    %204 = vector.broadcast %cst_61 : f32 to vector<8x128xf32>
    %205 = arith.addf %204, %203 : vector<8x128xf32>
    %206 = arith.divf %204, %205 : vector<8x128xf32>
    %207 = arith.mulf %198, %175 : vector<8x128xf32>
    %208 = arith.mulf %192, %200 : vector<8x128xf32>
    %209 = arith.addf %207, %208 : vector<8x128xf32>
    %210 = math.tanh %209 : vector<8x128xf32>
    %211 = arith.mulf %206, %210 : vector<8x128xf32>
    %212 = arith.truncf %211 : vector<8x128xf32> to vector<8x128xbf16>
    %cst_62 = arith.constant dense<0.000000e+00> : vector<8x512xf32>
    %213 = tpu.matmul %212, %9, %cst_62 {dimension_numbers = #tpu.dot_dimension_numbers<[1], [0], [0], [1], [0, 0, 1, 1], [], []>} : vector<8x128xbf16>, vector<128x512xbf16>, vector<8x512xf32> -> vector<8x512xf32>
    %214 = vector.broadcast %10 : vector<1x512xf32> to vector<8x512xf32>
    %215 = arith.addf %213, %214 : vector<8x512xf32>
    %c40_63 = arith.constant 40 : index
    %c0_64 = arith.constant 0 : index
    %216 = vector.load %arg12[%c40_63, %c0_64] : memref<64x512xf32, #tpu.memory_space<vmem>>, vector<8x512xf32>
    tpu.vector_store %arg12[%c40_63, %c0_64], %215 {strides = array<i32>} : memref<64x512xf32, #tpu.memory_space<vmem>>, vector<8x512xf32>,
    %c48 = arith.constant 48 : index
    %c0_65 = arith.constant 0 : index
    %217 = vector.load %arg11[%c48, %c0_65] : memref<64x512xf32, #tpu.memory_space<vmem>>, vector<8x512xf32>
    %218 = arith.truncf %211 : vector<8x128xf32> to vector<8x128xbf16>
    %cst_66 = arith.constant dense<0.000000e+00> : vector<8x512xf32>
    %219 = tpu.matmul %218, %8, %cst_66 {dimension_numbers = #tpu.dot_dimension_numbers<[1], [0], [0], [1], [0, 0, 1, 1], [], []>} : vector<8x128xbf16>, vector<128x512xbf16>, vector<8x512xf32> -> vector<8x512xf32>
    %220 = arith.addf %217, %219 : vector<8x512xf32>
    %221 = vector.extract_strided_slice %220 {offsets = [0, 0], sizes = [8, 128], strides = [1, 1]} : vector<8x512xf32> to vector<8x128xf32>
    %222 = arith.negf %221 : vector<8x128xf32>
    %223 = math.exp %222 : vector<8x128xf32>
    %cst_67 = arith.constant 1.000000e+00 : f32
    %224 = vector.broadcast %cst_67 : f32 to vector<8x128xf32>
    %225 = arith.addf %224, %223 : vector<8x128xf32>
    %226 = arith.divf %224, %225 : vector<8x128xf32>
    %227 = vector.extract_strided_slice %220 {offsets = [0, 128], sizes = [8, 128], strides = [1, 1]} : vector<8x512xf32> to vector<8x128xf32>
    %228 = arith.negf %227 : vector<8x128xf32>
    %229 = math.exp %228 : vector<8x128xf32>
    %cst_68 = arith.constant 1.000000e+00 : f32
    %230 = vector.broadcast %cst_68 : f32 to vector<8x128xf32>
    %231 = arith.addf %230, %229 : vector<8x128xf32>
    %232 = arith.divf %230, %231 : vector<8x128xf32>
    %233 = vector.extract_strided_slice %220 {offsets = [0, 256], sizes = [8, 128], strides = [1, 1]} : vector<8x512xf32> to vector<8x128xf32>
    %234 = math.tanh %233 : vector<8x128xf32>
    %235 = vector.extract_strided_slice %220 {offsets = [0, 384], sizes = [8, 128], strides = [1, 1]} : vector<8x512xf32> to vector<8x128xf32>
    %236 = arith.negf %235 : vector<8x128xf32>
    %237 = math.exp %236 : vector<8x128xf32>
    %cst_69 = arith.constant 1.000000e+00 : f32
    %238 = vector.broadcast %cst_69 : f32 to vector<8x128xf32>
    %239 = arith.addf %238, %237 : vector<8x128xf32>
    %240 = arith.divf %238, %239 : vector<8x128xf32>
    %241 = arith.mulf %232, %209 : vector<8x128xf32>
    %242 = arith.mulf %226, %234 : vector<8x128xf32>
    %243 = arith.addf %241, %242 : vector<8x128xf32>
    %244 = math.tanh %243 : vector<8x128xf32>
    %245 = arith.mulf %240, %244 : vector<8x128xf32>
    %246 = arith.truncf %245 : vector<8x128xf32> to vector<8x128xbf16>
    %cst_70 = arith.constant dense<0.000000e+00> : vector<8x512xf32>
    %247 = tpu.matmul %246, %9, %cst_70 {dimension_numbers = #tpu.dot_dimension_numbers<[1], [0], [0], [1], [0, 0, 1, 1], [], []>} : vector<8x128xbf16>, vector<128x512xbf16>, vector<8x512xf32> -> vector<8x512xf32>
    %248 = vector.broadcast %10 : vector<1x512xf32> to vector<8x512xf32>
    %249 = arith.addf %247, %248 : vector<8x512xf32>
    %c48_71 = arith.constant 48 : index
    %c0_72 = arith.constant 0 : index
    %250 = vector.load %arg12[%c48_71, %c0_72] : memref<64x512xf32, #tpu.memory_space<vmem>>, vector<8x512xf32>
    tpu.vector_store %arg12[%c48_71, %c0_72], %249 {strides = array<i32>} : memref<64x512xf32, #tpu.memory_space<vmem>>, vector<8x512xf32>,
    %c56 = arith.constant 56 : index
    %c0_73 = arith.constant 0 : index
    %251 = vector.load %arg11[%c56, %c0_73] : memref<64x512xf32, #tpu.memory_space<vmem>>, vector<8x512xf32>
    %252 = arith.truncf %245 : vector<8x128xf32> to vector<8x128xbf16>
    %cst_74 = arith.constant dense<0.000000e+00> : vector<8x512xf32>
    %253 = tpu.matmul %252, %8, %cst_74 {dimension_numbers = #tpu.dot_dimension_numbers<[1], [0], [0], [1], [0, 0, 1, 1], [], []>} : vector<8x128xbf16>, vector<128x512xbf16>, vector<8x512xf32> -> vector<8x512xf32>
    %254 = arith.addf %251, %253 : vector<8x512xf32>
    %255 = vector.extract_strided_slice %254 {offsets = [0, 0], sizes = [8, 128], strides = [1, 1]} : vector<8x512xf32> to vector<8x128xf32>
    %256 = arith.negf %255 : vector<8x128xf32>
    %257 = math.exp %256 : vector<8x128xf32>
    %cst_75 = arith.constant 1.000000e+00 : f32
    %258 = vector.broadcast %cst_75 : f32 to vector<8x128xf32>
    %259 = arith.addf %258, %257 : vector<8x128xf32>
    %260 = arith.divf %258, %259 : vector<8x128xf32>
    %261 = vector.extract_strided_slice %254 {offsets = [0, 128], sizes = [8, 128], strides = [1, 1]} : vector<8x512xf32> to vector<8x128xf32>
    %262 = arith.negf %261 : vector<8x128xf32>
    %263 = math.exp %262 : vector<8x128xf32>
    %cst_76 = arith.constant 1.000000e+00 : f32
    %264 = vector.broadcast %cst_76 : f32 to vector<8x128xf32>
    %265 = arith.addf %264, %263 : vector<8x128xf32>
    %266 = arith.divf %264, %265 : vector<8x128xf32>
    %267 = vector.extract_strided_slice %254 {offsets = [0, 256], sizes = [8, 128], strides = [1, 1]} : vector<8x512xf32> to vector<8x128xf32>
    %268 = math.tanh %267 : vector<8x128xf32>
    %269 = vector.extract_strided_slice %254 {offsets = [0, 384], sizes = [8, 128], strides = [1, 1]} : vector<8x512xf32> to vector<8x128xf32>
    %270 = arith.negf %269 : vector<8x128xf32>
    %271 = math.exp %270 : vector<8x128xf32>
    %cst_77 = arith.constant 1.000000e+00 : f32
    %272 = vector.broadcast %cst_77 : f32 to vector<8x128xf32>
    %273 = arith.addf %272, %271 : vector<8x128xf32>
    %274 = arith.divf %272, %273 : vector<8x128xf32>
    %275 = arith.mulf %266, %243 : vector<8x128xf32>
    %276 = arith.mulf %260, %268 : vector<8x128xf32>
    %277 = arith.addf %275, %276 : vector<8x128xf32>
    %278 = math.tanh %277 : vector<8x128xf32>
    %279 = arith.mulf %274, %278 : vector<8x128xf32>
    %280 = arith.truncf %279 : vector<8x128xf32> to vector<8x128xbf16>
    %cst_78 = arith.constant dense<0.000000e+00> : vector<8x512xf32>
    %281 = tpu.matmul %280, %9, %cst_78 {dimension_numbers = #tpu.dot_dimension_numbers<[1], [0], [0], [1], [0, 0, 1, 1], [], []>} : vector<8x128xbf16>, vector<128x512xbf16>, vector<8x512xf32> -> vector<8x512xf32>
    %282 = vector.broadcast %10 : vector<1x512xf32> to vector<8x512xf32>
    %283 = arith.addf %281, %282 : vector<8x512xf32>
    %c56_79 = arith.constant 56 : index
    %c0_80 = arith.constant 0 : index
    %284 = vector.load %arg12[%c56_79, %c0_80] : memref<64x512xf32, #tpu.memory_space<vmem>>, vector<8x512xf32>
    tpu.vector_store %arg12[%c56_79, %c0_80], %283 {strides = array<i32>} : memref<64x512xf32, #tpu.memory_space<vmem>>, vector<8x512xf32>,
    %c0_81 = arith.constant 0 : index
    %c0_82 = arith.constant 0 : index
    %285 = vector.load %arg6[%c0_81, %c0_82] : memref<128x512xbf16, #tpu.memory_space<vmem>>, vector<128x512xbf16>
    %cst_83 = arith.constant 0.000000e+00 : f32
    %286 = vector.broadcast %cst_83 : f32 to vector<8x128xf32>
    %cst_84 = arith.constant 0.000000e+00 : f32
    %287 = vector.broadcast %cst_84 : f32 to vector<8x128xf32>
    %c0_85 = arith.constant 0 : index
    %c0_86 = arith.constant 0 : index
    %288 = vector.load %arg12[%c0_85, %c0_86] : memref<64x512xf32, #tpu.memory_space<vmem>>, vector<8x512xf32>
    %289 = arith.truncf %286 : vector<8x128xf32> to vector<8x128xbf16>
    %cst_87 = arith.constant dense<0.000000e+00> : vector<8x512xf32>
    %290 = tpu.matmul %289, %285, %cst_87 {dimension_numbers = #tpu.dot_dimension_numbers<[1], [0], [0], [1], [0, 0, 1, 1], [], []>} : vector<8x128xbf16>, vector<128x512xbf16>, vector<8x512xf32> -> vector<8x512xf32>
    %291 = arith.addf %288, %290 : vector<8x512xf32>
    %292 = vector.extract_strided_slice %291 {offsets = [0, 0], sizes = [8, 128], strides = [1, 1]} : vector<8x512xf32> to vector<8x128xf32>
    %293 = arith.negf %292 : vector<8x128xf32>
    %294 = math.exp %293 : vector<8x128xf32>
    %cst_88 = arith.constant 1.000000e+00 : f32
    %295 = vector.broadcast %cst_88 : f32 to vector<8x128xf32>
    %296 = arith.addf %295, %294 : vector<8x128xf32>
    %297 = arith.divf %295, %296 : vector<8x128xf32>
    %298 = vector.extract_strided_slice %291 {offsets = [0, 128], sizes = [8, 128], strides = [1, 1]} : vector<8x512xf32> to vector<8x128xf32>
    %299 = arith.negf %298 : vector<8x128xf32>
    %300 = math.exp %299 : vector<8x128xf32>
    %cst_89 = arith.constant 1.000000e+00 : f32
    %301 = vector.broadcast %cst_89 : f32 to vector<8x128xf32>
    %302 = arith.addf %301, %300 : vector<8x128xf32>
    %303 = arith.divf %301, %302 : vector<8x128xf32>
    %304 = vector.extract_strided_slice %291 {offsets = [0, 256], sizes = [8, 128], strides = [1, 1]} : vector<8x512xf32> to vector<8x128xf32>
    %305 = math.tanh %304 : vector<8x128xf32>
    %306 = vector.extract_strided_slice %291 {offsets = [0, 384], sizes = [8, 128], strides = [1, 1]} : vector<8x512xf32> to vector<8x128xf32>
    %307 = arith.negf %306 : vector<8x128xf32>
    %308 = math.exp %307 : vector<8x128xf32>
    %cst_90 = arith.constant 1.000000e+00 : f32
    %309 = vector.broadcast %cst_90 : f32 to vector<8x128xf32>
    %310 = arith.addf %309, %308 : vector<8x128xf32>
    %311 = arith.divf %309, %310 : vector<8x128xf32>
    %312 = arith.mulf %303, %287 : vector<8x128xf32>
    %313 = arith.mulf %297, %305 : vector<8x128xf32>
    %314 = arith.addf %312, %313 : vector<8x128xf32>
    %315 = math.tanh %314 : vector<8x128xf32>
    %316 = arith.mulf %311, %315 : vector<8x128xf32>
    %c8_91 = arith.constant 8 : index
    %c0_92 = arith.constant 0 : index
    %317 = vector.load %arg12[%c8_91, %c0_92] : memref<64x512xf32, #tpu.memory_space<vmem>>, vector<8x512xf32>
    %318 = arith.truncf %316 : vector<8x128xf32> to vector<8x128xbf16>
    %cst_93 = arith.constant dense<0.000000e+00> : vector<8x512xf32>
    %319 = tpu.matmul %318, %285, %cst_93 {dimension_numbers = #tpu.dot_dimension_numbers<[1], [0], [0], [1], [0, 0, 1, 1], [], []>} : vector<8x128xbf16>, vector<128x512xbf16>, vector<8x512xf32> -> vector<8x512xf32>
    %320 = arith.addf %317, %319 : vector<8x512xf32>
    %321 = vector.extract_strided_slice %320 {offsets = [0, 0], sizes = [8, 128], strides = [1, 1]} : vector<8x512xf32> to vector<8x128xf32>
    %322 = arith.negf %321 : vector<8x128xf32>
    %323 = math.exp %322 : vector<8x128xf32>
    %cst_94 = arith.constant 1.000000e+00 : f32
    %324 = vector.broadcast %cst_94 : f32 to vector<8x128xf32>
    %325 = arith.addf %324, %323 : vector<8x128xf32>
    %326 = arith.divf %324, %325 : vector<8x128xf32>
    %327 = vector.extract_strided_slice %320 {offsets = [0, 128], sizes = [8, 128], strides = [1, 1]} : vector<8x512xf32> to vector<8x128xf32>
    %328 = arith.negf %327 : vector<8x128xf32>
    %329 = math.exp %328 : vector<8x128xf32>
    %cst_95 = arith.constant 1.000000e+00 : f32
    %330 = vector.broadcast %cst_95 : f32 to vector<8x128xf32>
    %331 = arith.addf %330, %329 : vector<8x128xf32>
    %332 = arith.divf %330, %331 : vector<8x128xf32>
    %333 = vector.extract_strided_slice %320 {offsets = [0, 256], sizes = [8, 128], strides = [1, 1]} : vector<8x512xf32> to vector<8x128xf32>
    %334 = math.tanh %333 : vector<8x128xf32>
    %335 = vector.extract_strided_slice %320 {offsets = [0, 384], sizes = [8, 128], strides = [1, 1]} : vector<8x512xf32> to vector<8x128xf32>
    %336 = arith.negf %335 : vector<8x128xf32>
    %337 = math.exp %336 : vector<8x128xf32>
    %cst_96 = arith.constant 1.000000e+00 : f32
    %338 = vector.broadcast %cst_96 : f32 to vector<8x128xf32>
    %339 = arith.addf %338, %337 : vector<8x128xf32>
    %340 = arith.divf %338, %339 : vector<8x128xf32>
    %341 = arith.mulf %332, %314 : vector<8x128xf32>
    %342 = arith.mulf %326, %334 : vector<8x128xf32>
    %343 = arith.addf %341, %342 : vector<8x128xf32>
    %344 = math.tanh %343 : vector<8x128xf32>
    %345 = arith.mulf %340, %344 : vector<8x128xf32>
    %c16_97 = arith.constant 16 : index
    %c0_98 = arith.constant 0 : index
    %346 = vector.load %arg12[%c16_97, %c0_98] : memref<64x512xf32, #tpu.memory_space<vmem>>, vector<8x512xf32>
    %347 = arith.truncf %345 : vector<8x128xf32> to vector<8x128xbf16>
    %cst_99 = arith.constant dense<0.000000e+00> : vector<8x512xf32>
    %348 = tpu.matmul %347, %285, %cst_99 {dimension_numbers = #tpu.dot_dimension_numbers<[1], [0], [0], [1], [0, 0, 1, 1], [], []>} : vector<8x128xbf16>, vector<128x512xbf16>, vector<8x512xf32> -> vector<8x512xf32>
    %349 = arith.addf %346, %348 : vector<8x512xf32>
    %350 = vector.extract_strided_slice %349 {offsets = [0, 0], sizes = [8, 128], strides = [1, 1]} : vector<8x512xf32> to vector<8x128xf32>
    %351 = arith.negf %350 : vector<8x128xf32>
    %352 = math.exp %351 : vector<8x128xf32>
    %cst_100 = arith.constant 1.000000e+00 : f32
    %353 = vector.broadcast %cst_100 : f32 to vector<8x128xf32>
    %354 = arith.addf %353, %352 : vector<8x128xf32>
    %355 = arith.divf %353, %354 : vector<8x128xf32>
    %356 = vector.extract_strided_slice %349 {offsets = [0, 128], sizes = [8, 128], strides = [1, 1]} : vector<8x512xf32> to vector<8x128xf32>
    %357 = arith.negf %356 : vector<8x128xf32>
    %358 = math.exp %357 : vector<8x128xf32>
    %cst_101 = arith.constant 1.000000e+00 : f32
    %359 = vector.broadcast %cst_101 : f32 to vector<8x128xf32>
    %360 = arith.addf %359, %358 : vector<8x128xf32>
    %361 = arith.divf %359, %360 : vector<8x128xf32>
    %362 = vector.extract_strided_slice %349 {offsets = [0, 256], sizes = [8, 128], strides = [1, 1]} : vector<8x512xf32> to vector<8x128xf32>
    %363 = math.tanh %362 : vector<8x128xf32>
    %364 = vector.extract_strided_slice %349 {offsets = [0, 384], sizes = [8, 128], strides = [1, 1]} : vector<8x512xf32> to vector<8x128xf32>
    %365 = arith.negf %364 : vector<8x128xf32>
    %366 = math.exp %365 : vector<8x128xf32>
    %cst_102 = arith.constant 1.000000e+00 : f32
    %367 = vector.broadcast %cst_102 : f32 to vector<8x128xf32>
    %368 = arith.addf %367, %366 : vector<8x128xf32>
    %369 = arith.divf %367, %368 : vector<8x128xf32>
    %370 = arith.mulf %361, %343 : vector<8x128xf32>
    %371 = arith.mulf %355, %363 : vector<8x128xf32>
    %372 = arith.addf %370, %371 : vector<8x128xf32>
    %373 = math.tanh %372 : vector<8x128xf32>
    %374 = arith.mulf %369, %373 : vector<8x128xf32>
    %c24_103 = arith.constant 24 : index
    %c0_104 = arith.constant 0 : index
    %375 = vector.load %arg12[%c24_103, %c0_104] : memref<64x512xf32, #tpu.memory_space<vmem>>, vector<8x512xf32>
    %376 = arith.truncf %374 : vector<8x128xf32> to vector<8x128xbf16>
    %cst_105 = arith.constant dense<0.000000e+00> : vector<8x512xf32>
    %377 = tpu.matmul %376, %285, %cst_105 {dimension_numbers = #tpu.dot_dimension_numbers<[1], [0], [0], [1], [0, 0, 1, 1], [], []>} : vector<8x128xbf16>, vector<128x512xbf16>, vector<8x512xf32> -> vector<8x512xf32>
    %378 = arith.addf %375, %377 : vector<8x512xf32>
    %379 = vector.extract_strided_slice %378 {offsets = [0, 0], sizes = [8, 128], strides = [1, 1]} : vector<8x512xf32> to vector<8x128xf32>
    %380 = arith.negf %379 : vector<8x128xf32>
    %381 = math.exp %380 : vector<8x128xf32>
    %cst_106 = arith.constant 1.000000e+00 : f32
    %382 = vector.broadcast %cst_106 : f32 to vector<8x128xf32>
    %383 = arith.addf %382, %381 : vector<8x128xf32>
    %384 = arith.divf %382, %383 : vector<8x128xf32>
    %385 = vector.extract_strided_slice %378 {offsets = [0, 128], sizes = [8, 128], strides = [1, 1]} : vector<8x512xf32> to vector<8x128xf32>
    %386 = arith.negf %385 : vector<8x128xf32>
    %387 = math.exp %386 : vector<8x128xf32>
    %cst_107 = arith.constant 1.000000e+00 : f32
    %388 = vector.broadcast %cst_107 : f32 to vector<8x128xf32>
    %389 = arith.addf %388, %387 : vector<8x128xf32>
    %390 = arith.divf %388, %389 : vector<8x128xf32>
    %391 = vector.extract_strided_slice %378 {offsets = [0, 256], sizes = [8, 128], strides = [1, 1]} : vector<8x512xf32> to vector<8x128xf32>
    %392 = math.tanh %391 : vector<8x128xf32>
    %393 = vector.extract_strided_slice %378 {offsets = [0, 384], sizes = [8, 128], strides = [1, 1]} : vector<8x512xf32> to vector<8x128xf32>
    %394 = arith.negf %393 : vector<8x128xf32>
    %395 = math.exp %394 : vector<8x128xf32>
    %cst_108 = arith.constant 1.000000e+00 : f32
    %396 = vector.broadcast %cst_108 : f32 to vector<8x128xf32>
    %397 = arith.addf %396, %395 : vector<8x128xf32>
    %398 = arith.divf %396, %397 : vector<8x128xf32>
    %399 = arith.mulf %390, %372 : vector<8x128xf32>
    %400 = arith.mulf %384, %392 : vector<8x128xf32>
    %401 = arith.addf %399, %400 : vector<8x128xf32>
    %402 = math.tanh %401 : vector<8x128xf32>
    %403 = arith.mulf %398, %402 : vector<8x128xf32>
    %c32_109 = arith.constant 32 : index
    %c0_110 = arith.constant 0 : index
    %404 = vector.load %arg12[%c32_109, %c0_110] : memref<64x512xf32, #tpu.memory_space<vmem>>, vector<8x512xf32>
    %405 = arith.truncf %403 : vector<8x128xf32> to vector<8x128xbf16>
    %cst_111 = arith.constant dense<0.000000e+00> : vector<8x512xf32>
    %406 = tpu.matmul %405, %285, %cst_111 {dimension_numbers = #tpu.dot_dimension_numbers<[1], [0], [0], [1], [0, 0, 1, 1], [], []>} : vector<8x128xbf16>, vector<128x512xbf16>, vector<8x512xf32> -> vector<8x512xf32>
    %407 = arith.addf %404, %406 : vector<8x512xf32>
    %408 = vector.extract_strided_slice %407 {offsets = [0, 0], sizes = [8, 128], strides = [1, 1]} : vector<8x512xf32> to vector<8x128xf32>
    %409 = arith.negf %408 : vector<8x128xf32>
    %410 = math.exp %409 : vector<8x128xf32>
    %cst_112 = arith.constant 1.000000e+00 : f32
    %411 = vector.broadcast %cst_112 : f32 to vector<8x128xf32>
    %412 = arith.addf %411, %410 : vector<8x128xf32>
    %413 = arith.divf %411, %412 : vector<8x128xf32>
    %414 = vector.extract_strided_slice %407 {offsets = [0, 128], sizes = [8, 128], strides = [1, 1]} : vector<8x512xf32> to vector<8x128xf32>
    %415 = arith.negf %414 : vector<8x128xf32>
    %416 = math.exp %415 : vector<8x128xf32>
    %cst_113 = arith.constant 1.000000e+00 : f32
    %417 = vector.broadcast %cst_113 : f32 to vector<8x128xf32>
    %418 = arith.addf %417, %416 : vector<8x128xf32>
    %419 = arith.divf %417, %418 : vector<8x128xf32>
    %420 = vector.extract_strided_slice %407 {offsets = [0, 256], sizes = [8, 128], strides = [1, 1]} : vector<8x512xf32> to vector<8x128xf32>
    %421 = math.tanh %420 : vector<8x128xf32>
    %422 = vector.extract_strided_slice %407 {offsets = [0, 384], sizes = [8, 128], strides = [1, 1]} : vector<8x512xf32> to vector<8x128xf32>
    %423 = arith.negf %422 : vector<8x128xf32>
    %424 = math.exp %423 : vector<8x128xf32>
    %cst_114 = arith.constant 1.000000e+00 : f32
    %425 = vector.broadcast %cst_114 : f32 to vector<8x128xf32>
    %426 = arith.addf %425, %424 : vector<8x128xf32>
    %427 = arith.divf %425, %426 : vector<8x128xf32>
    %428 = arith.mulf %419, %401 : vector<8x128xf32>
    %429 = arith.mulf %413, %421 : vector<8x128xf32>
    %430 = arith.addf %428, %429 : vector<8x128xf32>
    %431 = math.tanh %430 : vector<8x128xf32>
    %432 = arith.mulf %427, %431 : vector<8x128xf32>
    %c40_115 = arith.constant 40 : index
    %c0_116 = arith.constant 0 : index
    %433 = vector.load %arg12[%c40_115, %c0_116] : memref<64x512xf32, #tpu.memory_space<vmem>>, vector<8x512xf32>
    %434 = arith.truncf %432 : vector<8x128xf32> to vector<8x128xbf16>
    %cst_117 = arith.constant dense<0.000000e+00> : vector<8x512xf32>
    %435 = tpu.matmul %434, %285, %cst_117 {dimension_numbers = #tpu.dot_dimension_numbers<[1], [0], [0], [1], [0, 0, 1, 1], [], []>} : vector<8x128xbf16>, vector<128x512xbf16>, vector<8x512xf32> -> vector<8x512xf32>
    %436 = arith.addf %433, %435 : vector<8x512xf32>
    %437 = vector.extract_strided_slice %436 {offsets = [0, 0], sizes = [8, 128], strides = [1, 1]} : vector<8x512xf32> to vector<8x128xf32>
    %438 = arith.negf %437 : vector<8x128xf32>
    %439 = math.exp %438 : vector<8x128xf32>
    %cst_118 = arith.constant 1.000000e+00 : f32
    %440 = vector.broadcast %cst_118 : f32 to vector<8x128xf32>
    %441 = arith.addf %440, %439 : vector<8x128xf32>
    %442 = arith.divf %440, %441 : vector<8x128xf32>
    %443 = vector.extract_strided_slice %436 {offsets = [0, 128], sizes = [8, 128], strides = [1, 1]} : vector<8x512xf32> to vector<8x128xf32>
    %444 = arith.negf %443 : vector<8x128xf32>
    %445 = math.exp %444 : vector<8x128xf32>
    %cst_119 = arith.constant 1.000000e+00 : f32
    %446 = vector.broadcast %cst_119 : f32 to vector<8x128xf32>
    %447 = arith.addf %446, %445 : vector<8x128xf32>
    %448 = arith.divf %446, %447 : vector<8x128xf32>
    %449 = vector.extract_strided_slice %436 {offsets = [0, 256], sizes = [8, 128], strides = [1, 1]} : vector<8x512xf32> to vector<8x128xf32>
    %450 = math.tanh %449 : vector<8x128xf32>
    %451 = vector.extract_strided_slice %436 {offsets = [0, 384], sizes = [8, 128], strides = [1, 1]} : vector<8x512xf32> to vector<8x128xf32>
    %452 = arith.negf %451 : vector<8x128xf32>
    %453 = math.exp %452 : vector<8x128xf32>
    %cst_120 = arith.constant 1.000000e+00 : f32
    %454 = vector.broadcast %cst_120 : f32 to vector<8x128xf32>
    %455 = arith.addf %454, %453 : vector<8x128xf32>
    %456 = arith.divf %454, %455 : vector<8x128xf32>
    %457 = arith.mulf %448, %430 : vector<8x128xf32>
    %458 = arith.mulf %442, %450 : vector<8x128xf32>
    %459 = arith.addf %457, %458 : vector<8x128xf32>
    %460 = math.tanh %459 : vector<8x128xf32>
    %461 = arith.mulf %456, %460 : vector<8x128xf32>
    %c48_121 = arith.constant 48 : index
    %c0_122 = arith.constant 0 : index
    %462 = vector.load %arg12[%c48_121, %c0_122] : memref<64x512xf32, #tpu.memory_space<vmem>>, vector<8x512xf32>
    %463 = arith.truncf %461 : vector<8x128xf32> to vector<8x128xbf16>
    %cst_123 = arith.constant dense<0.000000e+00> : vector<8x512xf32>
    %464 = tpu.matmul %463, %285, %cst_123 {dimension_numbers = #tpu.dot_dimension_numbers<[1], [0], [0], [1], [0, 0, 1, 1], [], []>} : vector<8x128xbf16>, vector<128x512xbf16>, vector<8x512xf32> -> vector<8x512xf32>
    %465 = arith.addf %462, %464 : vector<8x512xf32>
    %466 = vector.extract_strided_slice %465 {offsets = [0, 0], sizes = [8, 128], strides = [1, 1]} : vector<8x512xf32> to vector<8x128xf32>
    %467 = arith.negf %466 : vector<8x128xf32>
    %468 = math.exp %467 : vector<8x128xf32>
    %cst_124 = arith.constant 1.000000e+00 : f32
    %469 = vector.broadcast %cst_124 : f32 to vector<8x128xf32>
    %470 = arith.addf %469, %468 : vector<8x128xf32>
    %471 = arith.divf %469, %470 : vector<8x128xf32>
    %472 = vector.extract_strided_slice %465 {offsets = [0, 128], sizes = [8, 128], strides = [1, 1]} : vector<8x512xf32> to vector<8x128xf32>
    %473 = arith.negf %472 : vector<8x128xf32>
    %474 = math.exp %473 : vector<8x128xf32>
    %cst_125 = arith.constant 1.000000e+00 : f32
    %475 = vector.broadcast %cst_125 : f32 to vector<8x128xf32>
    %476 = arith.addf %475, %474 : vector<8x128xf32>
    %477 = arith.divf %475, %476 : vector<8x128xf32>
    %478 = vector.extract_strided_slice %465 {offsets = [0, 256], sizes = [8, 128], strides = [1, 1]} : vector<8x512xf32> to vector<8x128xf32>
    %479 = math.tanh %478 : vector<8x128xf32>
    %480 = vector.extract_strided_slice %465 {offsets = [0, 384], sizes = [8, 128], strides = [1, 1]} : vector<8x512xf32> to vector<8x128xf32>
    %481 = arith.negf %480 : vector<8x128xf32>
    %482 = math.exp %481 : vector<8x128xf32>
    %cst_126 = arith.constant 1.000000e+00 : f32
    %483 = vector.broadcast %cst_126 : f32 to vector<8x128xf32>
    %484 = arith.addf %483, %482 : vector<8x128xf32>
    %485 = arith.divf %483, %484 : vector<8x128xf32>
    %486 = arith.mulf %477, %459 : vector<8x128xf32>
    %487 = arith.mulf %471, %479 : vector<8x128xf32>
    %488 = arith.addf %486, %487 : vector<8x128xf32>
    %489 = math.tanh %488 : vector<8x128xf32>
    %490 = arith.mulf %485, %489 : vector<8x128xf32>
    %c56_127 = arith.constant 56 : index
    %c0_128 = arith.constant 0 : index
    %491 = vector.load %arg12[%c56_127, %c0_128] : memref<64x512xf32, #tpu.memory_space<vmem>>, vector<8x512xf32>
    %492 = arith.truncf %490 : vector<8x128xf32> to vector<8x128xbf16>
    %cst_129 = arith.constant dense<0.000000e+00> : vector<8x512xf32>
    %493 = tpu.matmul %492, %285, %cst_129 {dimension_numbers = #tpu.dot_dimension_numbers<[1], [0], [0], [1], [0, 0, 1, 1], [], []>} : vector<8x128xbf16>, vector<128x512xbf16>, vector<8x512xf32> -> vector<8x512xf32>
    %494 = arith.addf %491, %493 : vector<8x512xf32>
    %495 = vector.extract_strided_slice %494 {offsets = [0, 0], sizes = [8, 128], strides = [1, 1]} : vector<8x512xf32> to vector<8x128xf32>
    %496 = arith.negf %495 : vector<8x128xf32>
    %497 = math.exp %496 : vector<8x128xf32>
    %cst_130 = arith.constant 1.000000e+00 : f32
    %498 = vector.broadcast %cst_130 : f32 to vector<8x128xf32>
    %499 = arith.addf %498, %497 : vector<8x128xf32>
    %500 = arith.divf %498, %499 : vector<8x128xf32>
    %501 = vector.extract_strided_slice %494 {offsets = [0, 128], sizes = [8, 128], strides = [1, 1]} : vector<8x512xf32> to vector<8x128xf32>
    %502 = arith.negf %501 : vector<8x128xf32>
    %503 = math.exp %502 : vector<8x128xf32>
    %cst_131 = arith.constant 1.000000e+00 : f32
    %504 = vector.broadcast %cst_131 : f32 to vector<8x128xf32>
    %505 = arith.addf %504, %503 : vector<8x128xf32>
    %506 = arith.divf %504, %505 : vector<8x128xf32>
    %507 = vector.extract_strided_slice %494 {offsets = [0, 256], sizes = [8, 128], strides = [1, 1]} : vector<8x512xf32> to vector<8x128xf32>
    %508 = math.tanh %507 : vector<8x128xf32>
    %509 = vector.extract_strided_slice %494 {offsets = [0, 384], sizes = [8, 128], strides = [1, 1]} : vector<8x512xf32> to vector<8x128xf32>
    %510 = arith.negf %509 : vector<8x128xf32>
    %511 = math.exp %510 : vector<8x128xf32>
    %cst_132 = arith.constant 1.000000e+00 : f32
    %512 = vector.broadcast %cst_132 : f32 to vector<8x128xf32>
    %513 = arith.addf %512, %511 : vector<8x128xf32>
    %514 = arith.divf %512, %513 : vector<8x128xf32>
    %515 = arith.mulf %506, %488 : vector<8x128xf32>
    %516 = arith.mulf %500, %508 : vector<8x128xf32>
    %517 = arith.addf %515, %516 : vector<8x128xf32>
    %518 = math.tanh %517 : vector<8x128xf32>
    %519 = arith.mulf %514, %518 : vector<8x128xf32>
    %520 = arith.truncf %519 : vector<8x128xf32> to vector<8x128xbf16>
    %c0_133 = arith.constant 0 : index
    %c0_134 = arith.constant 0 : index
    %521 = vector.load %arg8[%c0_133, %c0_134] : memref<128x1xbf16, #tpu.memory_space<vmem>>, vector<128x1xbf16>
    %cst_135 = arith.constant dense<0.000000e+00> : vector<8x1xf32>
    %522 = tpu.matmul %520, %521, %cst_135 {dimension_numbers = #tpu.dot_dimension_numbers<[1], [0], [0], [1], [0, 0, 1, 1], [], []>} : vector<8x128xbf16>, vector<128x1xbf16>, vector<8x1xf32> -> vector<8x1xf32>
    %c0_136 = arith.constant 0 : index
    %c0_137 = arith.constant 0 : index
    %523 = vector.load %arg9[%c0_136, %c0_137] : memref<1x1xf32, #tpu.memory_space<vmem>>, vector<1x1xf32>
    %524 = vector.broadcast %523 : vector<1x1xf32> to vector<8x1xf32>
    %525 = arith.addf %522, %524 : vector<8x1xf32>
    %c0_138 = arith.constant 0 : index
    %c0_139 = arith.constant 0 : index
    %c0_140 = arith.constant 0 : index
    %526 = vector.load %arg10[%c0_138, %c0_139, %c0_140] : memref<1x8x1xf32, #tpu.memory_space<vmem>>, vector<1x8x1xf32>
    %527 = vector.shape_cast %526 : vector<1x8x1xf32> to vector<8x1xf32>
    %528 = vector.shape_cast %525 : vector<8x1xf32> to vector<1x8x1xf32>
    tpu.vector_store %arg10[%c0_138, %c0_139, %c0_140], %528 {strides = array<i32>} : memref<1x8x1xf32, #tpu.memory_space<vmem>>, vector<1x8x1xf32>,
    return
  }
  func.func @transform_0(%arg0: i32) -> (i32, i32, i32) {
    %c0_i32 = arith.constant 0 : i32
    %c0_i32_0 = arith.constant 0 : i32
    %c0_i32_1 = arith.constant 0 : i32
    return %arg0, %c0_i32, %c0_i32_0 : i32, i32, i32
  }
  func.func @transform_1(%arg0: i32) -> (i32, i32) {
    %c0_i32 = arith.constant 0 : i32
    %c0_i32_0 = arith.constant 0 : i32
    %c0_i32_1 = arith.constant 0 : i32
    return %c0_i32, %c0_i32_0 : i32, i32
  }
  func.func @transform_2(%arg0: i32) -> (i32, i32) {
    %c0_i32 = arith.constant 0 : i32
    %c0_i32_0 = arith.constant 0 : i32
    %c0_i32_1 = arith.constant 0 : i32
    return %c0_i32, %c0_i32_0 : i32, i32
  }
  func.func @transform_3(%arg0: i32) -> (i32, i32) {
    %c0_i32 = arith.constant 0 : i32
    %c0_i32_0 = arith.constant 0 : i32
    %c0_i32_1 = arith.constant 0 : i32
    return %c0_i32, %c0_i32_0 : i32, i32
  }
  func.func @transform_4(%arg0: i32) -> (i32, i32) {
    %c0_i32 = arith.constant 0 : i32
    %c0_i32_0 = arith.constant 0 : i32
    %c0_i32_1 = arith.constant 0 : i32
    return %c0_i32, %c0_i32_0 : i32, i32
  }
  func.func @transform_5(%arg0: i32) -> (i32, i32) {
    %c0_i32 = arith.constant 0 : i32
    %c0_i32_0 = arith.constant 0 : i32
    %c0_i32_1 = arith.constant 0 : i32
    return %c0_i32, %c0_i32_0 : i32, i32
  }
  func.func @transform_6(%arg0: i32) -> (i32, i32) {
    %c0_i32 = arith.constant 0 : i32
    %c0_i32_0 = arith.constant 0 : i32
    %c0_i32_1 = arith.constant 0 : i32
    return %c0_i32, %c0_i32_0 : i32, i32
  }
  func.func @transform_7(%arg0: i32) -> (i32, i32) {
    %c0_i32 = arith.constant 0 : i32
    %c0_i32_0 = arith.constant 0 : i32
    %c0_i32_1 = arith.constant 0 : i32
    return %c0_i32, %c0_i32_0 : i32, i32
  }
  func.func @transform_8(%arg0: i32) -> (i32, i32) {
    %c0_i32 = arith.constant 0 : i32
    %c0_i32_0 = arith.constant 0 : i32
    %c0_i32_1 = arith.constant 0 : i32
    return %c0_i32, %c0_i32_0 : i32, i32
  }
  func.func @transform_9(%arg0: i32) -> (i32, i32, i32) {
    %c0_i32 = arith.constant 0 : i32
    %c0_i32_0 = arith.constant 0 : i32
    %c0_i32_1 = arith.constant 0 : i32
    return %arg0, %c0_i32, %c0_i32_0 : i32, i32, i32
  }
}

</mosaic_0001>

<bundles_post_ra>
// kernel: net_forward.1
= control target key start
LH: loop header
LB: loop body
LE: loop exit
PB: predicated region body
PF: predicated region fallthrough
CT: control target
= control target key end

     0   :  { %v46_v0 = vlaneseq  ;;  %v4340_v2 = vmov 1983009808   ;;  %v6352_v4 = vmov 0   ;;  %vm117_vm0 = vcmask 1041408   ;;  %s6342_s1 = inlined_call_operand.vmem [shape: bf16[4,512], index: 1, kind: input, shape index: {}]   ;;  %s6343_s0 = inlined_call_operand.vmem [shape: bf16[1,64,4], index: 0, kind: input, shape index: {}]   ;;  %s6344_s2 = inlined_call_operand.vmem [shape: bf16[128,512], index: 2, kind: input, shape index: {}]   ;;  %s6345_s4 = inlined_call_operand.vmem [shape: bf16[128,512], index: 4, kind: input, shape index: {}]   ;;  %s6346_s3 = inlined_call_operand.vmem [shape: f32[1,512], index: 3, kind: input, shape index: {}]   ;;  %s6347_s5 = inlined_call_operand.vmem [shape: bf16[128,512], index: 5, kind: input, shape index: {}]   ;;  %s6348_s6 = inlined_call_operand.vmem [shape: f32[1,512], index: 6, kind: input, shape index: {}]   ;;  %s6349_s7 = inlined_call_operand.vmem [shape: bf16[128,1], index: 7, kind: input, shape index: {}]   ;;  %s6350_s8 = inlined_call_operand.<no memory space> [shape: f32[1,1], index: 8, kind: input, shape index: {}]   ;;  %s6351_s9 = inlined_call_operand.vmem [shape: f32[1,8,1], index: 9, kind: output, shape index: {}]  }
   0x1   :  { %v35_v1 = vld [vmem:[%s6342_s1] sm:$0xff]  ;;  %v89_v3 = vunpack.c.l.s4 %v4340_v2  ;;  %162 = vmatprep.mubr.bf16.mxu0 %v6352_v4  ;;  %235 = vmatprep.mubr.bf16.mxu1 %v6352_v4  ;;  %v4410_v16 = vld [vmem:[%s6344_s2 + $0xc] ss:$16 sps:$4 sm:$0xff]   ;;  %vm104_vm1 = vcmask 31744   ;;  %v4423_v19 = vld [vmem:[%s6344_s2 + $0x8] ss:$16 sps:$4 sm:$0xff]  }
   0x2   :  { %v4399_v5 = vshrl.u32 %v46_v0, 7  ;;  %v87_v7 = vcombine.high %v35_v1, %v35_v1  ;;  %v4405_v11 = vld [vmem:[%s6344_s2 + $0x4] ss:$16 sps:$4 sm:$0xff]   ;;  %6458 = vst [vmem:[#allocation7_spill] sm:$0xff] %v4410_v16  ;;  %v4418_v18 = vld [vmem:[%s6344_s2] ss:$16 sps:$4 sm:$0xff]  }
   0x3   :  { %v90_v6 = vunpack.c.0.s8 %v89_v3  ;;  %6457 = vst [vmem:[#allocation6_spill] sm:$0xff] %v4405_v11  ;;  %v3848_v17 = vld [vmem:[%s6343_s0] sm:$0xff]   ;;  %v4435_v21 = vld [vmem:[%s6344_s2 + $0x2c] ss:$16 sps:$4 sm:$0xff]   ;;  %v4449_v23 = vld [vmem:[%s6344_s2 + $0x28] ss:$16 sps:$4 sm:$0xff]  }
   0x4   :  { %6456 = vst [vmem:[#allocation5_spill] sm:$0xff] %v4399_v5  ;;  %v4430_v20 = vld [vmem:[%s6344_s2 + $0x24] ss:$16 sps:$4 sm:$0xff]   ;;  %v4442_v22 = vld [vmem:[%s6344_s2 + $0x20] ss:$16 sps:$4 sm:$0xff]   ;;  %v3861_v26 = vld [vmem:[%s6343_s0 + $0x8] sm:$0xff]  }
   0x5   :  { %v93_v8 = vsub.s32 %v90_v6, %v4399_v5  ;;  %v4456_v24 = vld [vmem:[%s6344_s2 + $0x44] ss:$16 sps:$4 sm:$0xff]   ;;  %v4461_v25 = vld [vmem:[%s6344_s2 + $0x4c] ss:$16 sps:$4 sm:$0xff]   ;;  %v4471_v27 = vld [vmem:[%s6344_s2 + $0x40] ss:$16 sps:$4 sm:$0xff]  }
   0x6   :  { %v4476_v28 = vld [vmem:[%s6344_s2 + $0x48] ss:$16 sps:$4 sm:$0xff]   ;;  %v4483_v29 = vld [vmem:[%s6344_s2 + $0x64] ss:$16 sps:$4 sm:$0xff]   ;;  %v4490_v30 = vld [vmem:[%s6344_s2 + $0x6c] ss:$16 sps:$4 sm:$0xff]  }
   0x7   :  { %v94_v9 = vrot.slane %v35_v1, %v93_v8  ;;  %v101_v10 = vrot.slane %v87_v7, %v93_v8  ;;  %v4497_v31 = vld [vmem:[%s6344_s2 + $0x60] ss:$16 sps:$4 sm:$0xff]   ;;  %v4502_v32 = vld [vmem:[%s6344_s2 + $0x68] ss:$16 sps:$4 sm:$0xff]   ;;  %v4509_v33 = vld [vmem:[%s6344_s2 + $0x84] ss:$16 sps:$4 sm:$0xff]  }
   0x8   :  { %v4516_v34 = vld [vmem:[%s6344_s2 + $0x8c] ss:$16 sps:$4 sm:$0xff]   ;;  %v3874_v35 = vld [vmem:[%s6343_s0 + $0x10] sm:$0xff]   ;;  %v4533_v37 = vld [vmem:[%s6344_s2 + $0x88] ss:$16 sps:$4 sm:$0xff]   ;;  %vm4343_vm2 = vmmov 0  }
   0x9   :  { %v102_v12 = vcombine.high %v94_v9, %v94_v9  ;;  %v103_v13 = vcombine.high %v101_v10, %v101_v10  ;;  %v119_v14 = vsel %vm117_vm0, %v94_v9, 0  ;;  %v125_v15 = vsel %vm117_vm0, %v101_v10, 0  ;;  %v4528_v36 = vld [vmem:[%s6344_s2 + $0x80] ss:$16 sps:$4 sm:$0xff]   ;;  %v4540_v38 = vld [vmem:[%s6344_s2 + $0xa4] ss:$16 sps:$4 sm:$0xff]  }
   0xa   :  { %v4545_v39 = vld [vmem:[%s6344_s2 + $0xac] ss:$16 sps:$4 sm:$0xff]   ;;  %v4554_v40 = vld [vmem:[%s6344_s2 + $0xa0] ss:$16 sps:$4 sm:$0xff]   ;;  %v4559_v41 = vld [vmem:[%s6344_s2 + $0xa8] ss:$16 sps:$4 sm:$0xff]  }
   0xb   :  { %3555 = vmatprep.subr.msk.bf16.mxu0 %vm117_vm0, %v102_v12  ;;  %3560 = vmatprep.subr.msk.bf16.mxu1 %vm117_vm0, %v103_v13  ;;  %v4566_v42 = vld [vmem:[%s6344_s2 + $0xc4] ss:$16 sps:$4 sm:$0xff]   ;;  %v4571_v43 = vld [vmem:[%s6344_s2 + $0xcc] ss:$16 sps:$4 sm:$0xff]   ;;  %v4583_v45 = vld [vmem:[%s6344_s2 + $0xc0] ss:$16 sps:$4 sm:$0xff]  }
   0xc   :  { %131 = vmatpush1.bf16.msra.mxu0 %v119_v14  ;;  %204 = vmatpush1.bf16.msra.mxu1 %v125_v15  ;;  %v3887_v44 = vld [vmem:[%s6343_s0 + $0x18] sm:$0xff]   ;;  %v4595_v47 = vld [vmem:[%s6344_s2 + $0xe4] ss:$16 sps:$4 sm:$0xff]   ;;  %v4609_v49 = vld [vmem:[%s6344_s2 + $0xe0] ss:$16 sps:$4 sm:$0xff]   ;;  %vm3545_vm3 = vcmask 7168  }
   0xd   :  { %537 = vmatprep.subr.bf16.mxu0 %v4405_v11  ;;  %578 = vmatprep.subr.bf16.mxu1 %v4410_v16  ;;  %v4588_v46 = vld [vmem:[%s6344_s2 + $0xc8] ss:$16 sps:$4 sm:$0xff]   ;;  %v4600_v48 = vld [vmem:[%s6344_s2 + $0xec] ss:$16 sps:$4 sm:$0xff]   ;;  %v4629_v51 = vld [vmem:[%s6345_s4 + $0x4] ss:$16 sps:$4 sm:$0xff]  }
   0xe   :  { %v4614_v50 = vld [vmem:[%s6344_s2 + $0xe8] ss:$16 sps:$4 sm:$0xff]   ;;  %v4634_v52 = vld [vmem:[%s6345_s4 + $0xc] ss:$16 sps:$4 sm:$0xff]   ;;  %v4640_v53 = vld [vmem:[%s6345_s4] ss:$16 sps:$4 sm:$0xff]  }
   0xf   :  { %3556 = vmatmul.mubr.msk.bf16.vlgmr.msra.gmra.mrb[0].mxu0 %vm104_vm1, %v3848_v17  ;;  %3561 = vmatmul.mubr.msk.bf16.vlgmr.msra.gmra.mrb[0].mxu1 %vm104_vm1, %v3848_v17  ;;  %v4645_v54 = vld [vmem:[%s6345_s4 + $0x8] ss:$16 sps:$4 sm:$0xff]   ;;  %v4653_v55 = vld [vmem:[%s6345_s4 + $0x24] ss:$16 sps:$4 sm:$0xff]   ;;  %v4658_v56 = vld [vmem:[%s6345_s4 + $0x2c] ss:$16 sps:$4 sm:$0xff]  }
  0x10   :  { %538 = vmatpush1.bf16.msra.mxu0 %v4418_v18  ;;  %579 = vmatpush1.bf16.msra.mxu1 %v4423_v19  ;;  %v4663_v57 = vld [vmem:[%s6345_s4 + $0x20] ss:$16 sps:$4 sm:$0xff]   ;;  %v4668_v58 = vld [vmem:[%s6345_s4 + $0x28] ss:$16 sps:$4 sm:$0xff]   ;;  %v4677_v59 = vld [vmem:[%s6345_s4 + $0x44] ss:$16 sps:$4 sm:$0xff]  }
  0x11   :  { %539 = vmatprep.subr.bf16.mxu0 %v4430_v20  ;;  %580 = vmatprep.subr.bf16.mxu1 %v4435_v21  ;;  %v4682_v60 = vld [vmem:[%s6345_s4 + $0x4c] ss:$16 sps:$4 sm:$0xff]   ;;  %v4687_v61 = vld [vmem:[%s6345_s4 + $0x40] ss:$16 sps:$4 sm:$0xff]   ;;  %v4692_v62 = vld [vmem:[%s6345_s4 + $0x48] ss:$16 sps:$4 sm:$0xff]  }
  0x12   :  { %172 = vmatprep.mubr.bf16.mxu0 %v6352_v4  ;;  %245 = vmatprep.mubr.bf16.mxu1 %v6352_v4  ;;  %6459 = vst [vmem:[#allocation8_spill] sm:$0xff] %v4682_v60  ;;  %6460 = vst [vmem:[#allocation9_spill] sm:$0xff] %v4687_v61  ;;  %v4701_v63 = vld [vmem:[%s6345_s4 + $0x64] ss:$16 sps:$4 sm:$0xff]   ;;  %v4706_v0 = vld [vmem:[%s6345_s4 + $0x6c] ss:$16 sps:$4 sm:$0xff]  }
  0x13   :  { %6461 = vst [vmem:[#allocation10_spill] sm:$0xff] %v4692_v62  ;;  %6462 = vst [vmem:[#allocation11_spill] sm:$0xff] %v4701_v63  ;;  %v4711_v1 = vld [vmem:[%s6345_s4 + $0x60] ss:$16 sps:$4 sm:$0xff]   ;;  %v4716_v2 = vld [vmem:[%s6345_s4 + $0x68] ss:$16 sps:$4 sm:$0xff]  }
  0x14   :  { %540 = vmatpush1.bf16.msra.mxu0 %v4442_v22  ;;  %581 = vmatpush1.bf16.msra.mxu1 %v4449_v23  ;;  %6463 = vst [vmem:[#allocation12_spill] sm:$0xff] %v4706_v0  ;;  %6464 = vst [vmem:[#allocation13_spill] sm:$0xff] %v4711_v1  ;;  %v4725_v3 = vld [vmem:[%s6345_s4 + $0x84] ss:$16 sps:$4 sm:$0xff]   ;;  %v4730_v6 = vld [vmem:[%s6345_s4 + $0x8c] ss:$16 sps:$4 sm:$0xff]  }
  0x15   :  { %541 = vmatprep.subr.bf16.mxu0 %v4456_v24  ;;  %582 = vmatprep.subr.bf16.mxu1 %v4461_v25  ;;  %6465 = vst [vmem:[#allocation14_spill] sm:$0xff] %v4716_v2  ;;  %6466 = vst [vmem:[#allocation15_spill] sm:$0xff] %v4725_v3  ;;  %v4735_v7 = vld [vmem:[%s6345_s4 + $0x80] ss:$16 sps:$4 sm:$0xff]   ;;  %v4740_v8 = vld [vmem:[%s6345_s4 + $0x88] ss:$16 sps:$4 sm:$0xff]  }
  0x16   :  { %6467 = vst [vmem:[#allocation16_spill] sm:$0xff] %v4730_v6  ;;  %6468 = vst [vmem:[#allocation17_spill] sm:$0xff] %v4735_v7  ;;  %v4747_v9 = vld [vmem:[%s6345_s4 + $0xa4] ss:$16 sps:$4 sm:$0xff]   ;;  %v4752_v10 = vld [vmem:[%s6345_s4 + $0xac] ss:$16 sps:$4 sm:$0xff]  }
  0x17   :  { %3557 = vmatmul.mubr.msk.bf16.gmra.mrb[4].mxu0 %vm104_vm1, %v3861_v26  ;;  %3562 = vmatmul.mubr.msk.bf16.gmra.mrb[4].mxu1 %vm104_vm1, %v3861_v26  ;;  %6469 = vst [vmem:[#allocation18_spill] sm:$0xff] %v4740_v8  ;;  %6470 = vst [vmem:[#allocation19_spill] sm:$0xff] %v4747_v9  ;;  %v4759_v12 = vld [vmem:[%s6345_s4 + $0xa0] ss:$16 sps:$4 sm:$0xff]   ;;  %v4764_v13 = vld [vmem:[%s6345_s4 + $0xa8] ss:$16 sps:$4 sm:$0xff]  }
  0x18   :  { %542 = vmatpush1.bf16.msra.mxu0 %v4471_v27  ;;  %583 = vmatpush1.bf16.msra.mxu1 %v4476_v28  ;;  %6471 = vst [vmem:[#allocation20_spill] sm:$0xff] %v4752_v10  ;;  %6472 = vst [vmem:[#allocation21_spill] sm:$0xff] %v4759_v12  ;;  %v4771_v14 = vld [vmem:[%s6345_s4 + $0xc4] ss:$16 sps:$4 sm:$0xff]   ;;  %v4776_v15 = vld [vmem:[%s6345_s4 + $0xcc] ss:$16 sps:$4 sm:$0xff]  }
  0x19   :  { %543 = vmatprep.subr.bf16.mxu0 %v4483_v29  ;;  %584 = vmatprep.subr.bf16.mxu1 %v4490_v30  ;;  %6473 = vst [vmem:[#allocation22_spill] sm:$0xff] %v4764_v13  ;;  %6474 = vst [vmem:[#allocation23_spill] sm:$0xff] %v4771_v14  ;;  %v4783_v17 = vld [vmem:[%s6345_s4 + $0xc0] ss:$16 sps:$4 sm:$0xff]   ;;  %v4788_v26 = vld [vmem:[%s6345_s4 + $0xc8] ss:$16 sps:$4 sm:$0xff]  }
  0x1a   :  { %182 = vmatprep.mubr.bf16.mxu0 %v6352_v4  ;;  %255 = vmatprep.mubr.bf16.mxu1 %v6352_v4  ;;  %6475 = vst [vmem:[#allocation24_spill] sm:$0xff] %v4776_v15  ;;  %6476 = vst [vmem:[#allocation25_spill] sm:$0xff] %v4783_v17 }
  0x1b   :  { %6477 = vst [vmem:[#allocation26_spill] sm:$0xff] %v4788_v26 }
  0x1c   :  { %544 = vmatpush1.bf16.msra.mxu0 %v4497_v31  ;;  %585 = vmatpush1.bf16.msra.mxu1 %v4502_v32 }
  0x1d   :  { %545 = vmatprep.subr.bf16.mxu0 %v4509_v33  ;;  %586 = vmatprep.subr.bf16.mxu1 %v4516_v34 }
  0x1f   :  { %3558 = vmatmul.mubr.msk.bf16.gmra.mrb[8].mxu0 %vm104_vm1, %v3874_v35  ;;  %3563 = vmatmul.mubr.msk.bf16.gmra.mrb[8].mxu1 %vm104_vm1, %v3874_v35  ;;  %v4795_v35 = vld [vmem:[%s6345_s4 + $0xe4] ss:$16 sps:$4 sm:$0xff]  }
  0x20   :  { %546 = vmatpush1.bf16.msra.mxu0 %v4528_v36  ;;  %587 = vmatpush1.bf16.msra.mxu1 %v4533_v37  ;;  %6478 = vst [vmem:[#allocation27_spill] sm:$0xff] %v4795_v35 }
  0x21   :  { %547 = vmatprep.subr.bf16.mxu0 %v4540_v38  ;;  %588 = vmatprep.subr.bf16.mxu1 %v4545_v39 }
  0x22   :  { %192 = vmatprep.mubr.bf16.mxu0 %v6352_v4  ;;  %265 = vmatprep.mubr.bf16.mxu1 %v6352_v4 }
  0x24   :  { %548 = vmatpush1.bf16.msra.mxu0 %v4554_v40  ;;  %589 = vmatpush1.bf16.msra.mxu1 %v4559_v41 }
  0x25   :  { %549 = vmatprep.subr.bf16.mxu0 %v4566_v42  ;;  %590 = vmatprep.subr.bf16.mxu1 %v4571_v43 }
  0x27   :  { %3559 = vmatmul.mubr.msk.bf16.gmra.mrb[12].mxu0 %vm104_vm1, %v3887_v44  ;;  %3564 = vmatmul.mubr.msk.bf16.gmra.mrb[12].mxu1 %vm104_vm1, %v3887_v44  ;;  %v4800_v44 = vld [vmem:[%s6345_s4 + $0xec] ss:$16 sps:$4 sm:$0xff]  }
  0x28   :  { %550 = vmatpush1.bf16.msra.mxu0 %v4583_v45  ;;  %591 = vmatpush1.bf16.msra.mxu1 %v4588_v46  ;;  %6479 = vst [vmem:[#allocation28_spill] sm:$0xff] %v4800_v44 }
  0x29   :  { %551 = vmatprep.subr.bf16.mxu0 %v4595_v47  ;;  %592 = vmatprep.subr.bf16.mxu1 %v4600_v48 }
  0x2a   :  { %569 = vmatprep.mubr.bf16.mxu0 %v6352_v4  ;;  %610 = vmatprep.mubr.bf16.mxu1 %v6352_v4 }
  0x2c   :  { %552 = vmatpush1.bf16.msra.mxu0 %v4609_v49  ;;  %593 = vmatpush1.bf16.msra.mxu1 %v4614_v50 }
  0x2d   :  { %829 = vmatprep.subr.bf16.mxu0 %v4629_v51  ;;  %870 = vmatprep.subr.bf16.mxu1 %v4634_v52 }
  0x2f   :  { %570 = vmatmul.mubr.bf16.vlgmr.msra.gmra.mrb[16].mxu0 %v6352_v4  ;;  %611 = vmatmul.mubr.bf16.vlgmr.msra.gmra.mrb[16].mxu1 %v6352_v4 }
  0x30   :  { %861 = vmatprep.mubr.bf16.mxu0 %v6352_v4  ;;  %902 = vmatprep.mubr.bf16.mxu1 %v6352_v4  ;;  %v4807_v4 = vld [vmem:[%s6345_s4 + $0xe0] ss:$16 sps:$4 sm:$0xff]  }
  0x31   :  { %830 = vmatpush1.bf16.msra.mxu0 %v4640_v53  ;;  %871 = vmatpush1.bf16.msra.mxu1 %v4645_v54  ;;  %6480 = vst [vmem:[#allocation29_spill] sm:$0xff] %v4807_v4 }
  0x32   :  { %831 = vmatprep.subr.bf16.mxu0 %v4653_v55  ;;  %872 = vmatprep.subr.bf16.mxu1 %v4658_v56 }
  0x35   :  { %832 = vmatpush1.bf16.msra.mxu0 %v4663_v57  ;;  %873 = vmatpush1.bf16.msra.mxu1 %v4668_v58 }
  0x36   :  { %833 = vmatprep.subr.bf16.mxu0 %v4677_v59  ;;  %874 = vmatprep.subr.bf16.mxu1 %v4682_v60 }
  0x39   :  { %834 = vmatpush1.bf16.msra.mxu0 %v4687_v61  ;;  %875 = vmatpush1.bf16.msra.mxu1 %v4692_v62 }
  0x3a   :  { %835 = vmatprep.subr.bf16.mxu0 %v4701_v63  ;;  %876 = vmatprep.subr.bf16.mxu1 %v4706_v0 }
  0x3d   :  { %836 = vmatpush1.bf16.msra.mxu0 %v4711_v1  ;;  %877 = vmatpush1.bf16.msra.mxu1 %v4716_v2 }
  0x3e   :  { %837 = vmatprep.subr.bf16.mxu0 %v4725_v3  ;;  %878 = vmatprep.subr.bf16.mxu1 %v4730_v6 }
  0x41   :  { %838 = vmatpush1.bf16.msra.mxu0 %v4735_v7  ;;  %879 = vmatpush1.bf16.msra.mxu1 %v4740_v8 }
  0x42   :  { %839 = vmatprep.subr.bf16.mxu0 %v4747_v9  ;;  %880 = vmatprep.subr.bf16.mxu1 %v4752_v10 }
  0x45   :  { %840 = vmatpush1.bf16.msra.mxu0 %v4759_v12  ;;  %881 = vmatpush1.bf16.msra.mxu1 %v4764_v13 }
  0x46   :  { %841 = vmatprep.subr.bf16.mxu0 %v4771_v14  ;;  %882 = vmatprep.subr.bf16.mxu1 %v4776_v15  ;;  %v4812_v15 = vld [vmem:[%s6345_s4 + $0xe8] ss:$16 sps:$4 sm:$0xff]   ;;  %v6394_v14 = vsub.s32 0, %v4399_v5 }
  0x47   :  { %6481 = vst [vmem:[#allocation30_spill] sm:$0xff] %v4812_v15 }
  0x49   :  { %842 = vmatpush1.bf16.msra.mxu0 %v4783_v17  ;;  %883 = vmatpush1.bf16.msra.mxu1 %v4788_v26  ;;  %v6384_v26 = vsub.s32 2, %v4399_v5  ;;  %v6393_v17 = vsub.s32 3, %v4399_v5 }
  0x4a   :  { %843 = vmatprep.subr.bf16.mxu0 %v4795_v35  ;;  %884 = vmatprep.subr.bf16.mxu1 %v4800_v44  ;;  %v36_v35 = vld [vmem:[%s6346_s3] sm:$0xf]  ;;  %v6401_v44 = vsub.s32 1, %v4399_v5 }
  0x4b   :  { %v49_v13 = vrot.slane %v36_v35, %v6394_v14 }
  0x4c   :  { %v53_v9 = vrot.slane %v36_v35, %v6401_v44 }
  0x4d   :  { %844 = vmatpush1.bf16.msra.mxu0 %v4807_v4  ;;  %885 = vmatpush1.bf16.msra.mxu1 %v4812_v15  ;;  %v4829_v4 = vrot.slane %v36_v35, %v6384_v26 }
  0x4e   :  { %919 = vmatprep.subr.bf16.mxu0 %v4405_v11  ;;  %960 = vmatprep.subr.bf16.mxu1 %v4410_v16  ;;  %v4837_v16 = vrot.slane %v36_v35, %v6393_v17 }
  0xe2   :  { %v4831_v15 = vpop.f32.mrb[0].mxu0  ;;  %v4833_v11 = vpop.f32.mrb[0].mxu1 }
  0xe3   :  { %v166_v12 = vpop.f32.mrb[1].mxu0  ;;  %v239_v10 = vpop.f32.mrb[1].mxu1 }
  0xe4   :  { %v168_v8 = vpop.f32.mrb[2].mxu0  ;;  %v241_v7 = vpop.f32.mrb[2].mxu1 }
  0xe5   :  { %v4843_v26 = vadd.f32 %v168_v8, %v49_v13  ;;  %v170_v6 = vpop.f32.mrb[3].mxu0  ;;  %v4846_v3 = vadd.f32 %v241_v7, %v4829_v4  ;;  %v243_v2 = vpop.f32.mrb[3].mxu1 }
  0xe6   :  { %v4848_v1 = vadd.f32 %v170_v6, %v53_v9  ;;  %v4851_v17 = vadd.f32 %v243_v2, %v4837_v16 }
  0xe7   :  { %6482 = vst [vmem:[#allocation31_spill] sm:$0xff] %v4843_v26  ;;  %6483 = vst [vmem:[#allocation32_spill] sm:$0xff] %v4846_v3 }
  0xe8   :  { %6484 = vst [vmem:[#allocation33_spill] sm:$0xff] %v4848_v1  ;;  %6485 = vst [vmem:[#allocation34_spill] sm:$0xff] %v4851_v17 }
  0xea   :  { %v174_v14 = vpop.f32.mrb[4].mxu0  ;;  %v247_v0 = vpop.f32.mrb[4].mxu1 }
  0xeb   :  { %v4853_v63 = vadd.f32 %v174_v14, %v49_v13  ;;  %v176_v5 = vpop.f32.mrb[5].mxu0  ;;  %v4856_v35 = vadd.f32 %v247_v0, %v4829_v4  ;;  %v249_v8 = vpop.f32.mrb[5].mxu1 }
  0xec   :  { %v4858_v44 = vadd.f32 %v176_v5, %v53_v9  ;;  %v178_v26 = vpop.f32.mrb[6].mxu0  ;;  %v4861_v7 = vadd.f32 %v249_v8, %v4837_v16  ;;  %v251_v6 = vpop.f32.mrb[6].mxu1 }
  0xed   :  { %6486 = vst [vmem:[#allocation35_spill] sm:$0xff] %v4853_v63  ;;  %6487 = vst [vmem:[#allocation36_spill] sm:$0xff] %v4856_v35  ;;  %v4863_v1 = vadd.f32 %v178_v26, %v49_v13  ;;  %v180_v2 = vpop.f32.mrb[7].mxu0  ;;  %v4866_v17 = vadd.f32 %v251_v6, %v4829_v4  ;;  %v253_v14 = vpop.f32.mrb[7].mxu1 }
  0xee   :  { %6488 = vst [vmem:[#allocation37_spill] sm:$0xff] %v4858_v44  ;;  %6489 = vst [vmem:[#allocation38_spill] sm:$0xff] %v4861_v7  ;;  %v4868_v63 = vadd.f32 %v180_v2, %v53_v9  ;;  %v4871_v0 = vadd.f32 %v253_v14, %v4837_v16 }
  0xef   :  { %6490 = vst [vmem:[#allocation39_spill] sm:$0xff] %v4863_v1  ;;  %6491 = vst [vmem:[#allocation40_spill] sm:$0xff] %v4866_v17 }
  0xf0   :  { %6492 = vst [vmem:[#allocation41_spill] sm:$0xff] %v4868_v63  ;;  %6493 = vst [vmem:[#allocation42_spill] sm:$0xff] %v4871_v0 }
  0xf2   :  { %v184_v35 = vpop.f32.mrb[8].mxu0  ;;  %v257_v5 = vpop.f32.mrb[8].mxu1 }
  0xf3   :  { %v4873_v44 = vadd.f32 %v184_v35, %v49_v13  ;;  %v186_v3 = vpop.f32.mrb[9].mxu0  ;;  %v4876_v8 = vadd.f32 %v257_v5, %v4829_v4  ;;  %v259_v26 = vpop.f32.mrb[9].mxu1 }
  0xf4   :  { %v4878_v1 = vadd.f32 %v186_v3, %v53_v9  ;;  %v188_v7 = vpop.f32.mrb[10].mxu0  ;;  %v4881_v6 = vadd.f32 %v259_v26, %v4837_v16  ;;  %v261_v2 = vpop.f32.mrb[10].mxu1 }
  0xf5   :  { %6494 = vst [vmem:[#allocation43_spill] sm:$0xff] %v4873_v44  ;;  %6495 = vst [vmem:[#allocation44_spill] sm:$0xff] %v4876_v8  ;;  %v4883_v63 = vadd.f32 %v188_v7, %v49_v13  ;;  %v190_v14 = vpop.f32.mrb[11].mxu0  ;;  %v4886_v0 = vadd.f32 %v261_v2, %v4829_v4  ;;  %v263_v35 = vpop.f32.mrb[11].mxu1 }
  0xf6   :  { %6496 = vst [vmem:[#allocation45_spill] sm:$0xff] %v4878_v1  ;;  %6497 = vst [vmem:[#allocation46_spill] sm:$0xff] %v4881_v6  ;;  %v4888_v44 = vadd.f32 %v190_v14, %v53_v9  ;;  %v4891_v5 = vadd.f32 %v263_v35, %v4837_v16 }
  0xf7   :  { %6498 = vst [vmem:[#allocation47_spill] sm:$0xff] %v4883_v63  ;;  %6499 = vst [vmem:[#allocation48_spill] sm:$0xff] %v4886_v0 }
  0xf8   :  { %6500 = vst [vmem:[#allocation49_spill] sm:$0xff] %v4888_v44  ;;  %6501 = vst [vmem:[#allocation50_spill] sm:$0xff] %v4891_v5 }
  0xfa   :  { %v194_v8 = vpop.f32.mrb[12].mxu0  ;;  %v267_v3 = vpop.f32.mrb[12].mxu1 }
  0xfb   :  { %v4893_v1 = vadd.f32 %v194_v8, %v49_v13  ;;  %v196_v17 = vpop.f32.mrb[13].mxu0  ;;  %v4896_v26 = vadd.f32 %v267_v3, %v4829_v4  ;;  %v269_v7 = vpop.f32.mrb[13].mxu1 }
  0xfc   :  { %v4898_v63 = vadd.f32 %v196_v17, %v53_v9  ;;  %v198_v6 = vpop.f32.mrb[14].mxu0  ;;  %v4901_v2 = vadd.f32 %v269_v7, %v4837_v16  ;;  %v271_v14 = vpop.f32.mrb[14].mxu1  ;;  %v165_v17 = vadd.f32 %v4831_v15, %v49_v13  ;;  %v167_v7 = vadd.f32 %v166_v12, %v53_v9 }
  0xfd   :  { %6502 = vst [vmem:[#allocation51_spill] sm:$0xff] %v4893_v1  ;;  %6503 = vst [vmem:[#allocation52_spill] sm:$0xff] %v4896_v26  ;;  %v4903_v44 = vadd.f32 %v198_v6, %v49_v13  ;;  %v200_v35 = vpop.f32.mrb[15].mxu0  ;;  %v4906_v5 = vadd.f32 %v271_v14, %v4829_v4  ;;  %v273_v8 = vpop.f32.mrb[15].mxu1 }
  0xfe   :  { %6504 = vst [vmem:[#allocation53_spill] sm:$0xff] %v4898_v63  ;;  %6505 = vst [vmem:[#allocation54_spill] sm:$0xff] %v4901_v2  ;;  %v4908_v1 = vadd.f32 %v200_v35, %v53_v9  ;;  %v4911_v3 = vadd.f32 %v273_v8, %v4837_v16  ;;  %v238_v63 = vadd.f32 %v4833_v11, %v4829_v4 }
  0xff   :  { %6506 = vst [vmem:[#allocation55_spill] sm:$0xff] %v4903_v44  ;;  %6507 = vst [vmem:[#allocation56_spill] sm:$0xff] %v4906_v5  ;;  %v240_v2 = vadd.f32 %v239_v10, %v4837_v16 }
 0x100   :  { %6508 = vst [vmem:[#allocation57_spill] sm:$0xff] %v4908_v1  ;;  %6509 = vst [vmem:[#allocation58_spill] sm:$0xff] %v4911_v3 }
 0x102   :  { %v571_v6 = vpop.f32.mrb[16].mxu0  ;;  %v612_v44 = vpop.f32.mrb[16].mxu1 }
 0x103   :  { %v619_v26 = vadd.f32 %v571_v6, %v165_v17  ;;  %v621_v0 = vadd.f32 %v612_v44, %v238_v63  ;;  %v573_v14 = vpop.f32.mrb[17].mxu0  ;;  %v614_v5 = vpop.f32.mrb[17].mxu1  ;;  %v6511_v17 = vld [vmem:[#allocation8_spill] sm:$0xff]  ;;  %v6513_v6 = vld [vmem:[#allocation10_spill] sm:$0xff] }
 0x104   :  { %v620_v62 = vadd.f32 %v573_v14, %v167_v7  ;;  %v622_v35 = vadd.f32 %v614_v5, %v240_v2  ;;  %v575_v1 = vpop.f32.mrb[18].mxu0  ;;  %v616_v61 = vpop.f32.mrb[18].mxu1  ;;  %v6512_v7 = vld [vmem:[#allocation9_spill] sm:$0xff]  ;;  %v6514_v14 = vld [vmem:[#allocation11_spill] sm:$0xff] }
 0x105   :  { %v3597_v8 = vmul.f32 -1.442695, %v619_v26  ;;  %v576_v3 = vpop.f32.mrb[19].mxu0  ;;  %v617_v60 = vpop.f32.mrb[19].mxu1 }
 0x106   :  { %v3598_v13 = vmul.f32 -1.442695, %v620_v62  ;;  %v3599_v4 = vmul.f32 -1.442695, %v622_v35  ;;  %v6515_v35 = vld [vmem:[#allocation12_spill] sm:$0xff] }
 0x107   :  { %4004 = vpow2.f32 %v3597_v8  ;;  %v6516_v8 = vld [vmem:[#allocation13_spill] sm:$0xff] }
 0x108   :  { %4006 = vpow2.f32 %v3598_v13  ;;  %v6517_v13 = vld [vmem:[#allocation14_spill] sm:$0xff] }
 0x109   :  { %4008 = vpow2.f32 %v3599_v4  ;;  %v6518_v4 = vld [vmem:[#allocation15_spill] sm:$0xff] }
 0x10a   :  { %4010 = vtanh.f32 %v621_v0  ;;  %v6510_v0 = vmov 0  }
 0x111   :  { %v4005_v11 = vpop.eup %4004 }
 0x112   :  { %v4007_v9 = vpop.eup %4006  ;;  %v626_v16 = vadd.f32 1.0, %v4005_v11  ;;  %v6519_v11 = vld [vmem:[#allocation16_spill] sm:$0xff] }
 0x113   :  { %v632_v10 = vadd.f32 1.0, %v4007_v9  ;;  %v4009_v63 = vpop.eup %4008  ;;  %v6520_v9 = vld [vmem:[#allocation17_spill] sm:$0xff] }
 0x114   :  { %4012 = vrcp.f32 %v626_v16  ;;  %v4011_v12 = vpop.eup %4010  ;;  %v639_v44 = vadd.f32 1.0, %v4009_v63  ;;  %v6521_v16 = vld [vmem:[#allocation18_spill] sm:$0xff]  ;;  %v6523_v63 = vld [vmem:[#allocation20_spill] sm:$0xff] }
 0x115   :  { %4014 = vrcp.f32 %v632_v10  ;;  %v6522_v10 = vld [vmem:[#allocation19_spill] sm:$0xff] }
 0x116   :  { %4016 = vrcp.f32 %v639_v44  ;;  %v6528_v44 = vld [vmem:[#allocation25_spill] sm:$0xff] }
 0x11e   :  { %v4013_v15 = vpop.eup %4012 }
 0x11f   :  { %v4015_v1 = vpop.eup %4014  ;;  %v643_v61 = vmul.f32 %v4013_v15, %v4011_v12  ;;  %v6524_v12 = vld [vmem:[#allocation21_spill] sm:$0xff]  ;;  %v6525_v15 = vld [vmem:[#allocation22_spill] sm:$0xff] }
 0x120   :  { %v642_v5 = vmul.f32 0.0, %v4015_v1  ;;  %v4017_v62 = vpop.eup %4016  ;;  %v6526_v1 = vld [vmem:[#allocation23_spill] sm:$0xff] }
 0x122   :  { %v4917_v60 = vadd.f32 %v643_v61, %v642_v5  ;;  %v6527_v61 = vld [vmem:[#allocation24_spill] sm:$0xff]  ;;  %v6529_v5 = vld [vmem:[#allocation26_spill] sm:$0xff] }
 0x124   :  { %4018 = vtanh.f32 %v4917_v60 }
 0x12e   :  { %v4019_v26 = vpop.eup %4018 }
 0x12f   :  { %v646_v2 = vmul.f32 %v4019_v26, %v4017_v62  ;;  %v6530_v62 = vld [vmem:[#allocation27_spill] sm:$0xff]  ;;  %v6531_v26 = vld [vmem:[#allocation28_spill] sm:$0xff] }
 0x131   :  { %v647_v3 = vpack.c.bf16 %v646_v2, %v646_v2  ;;  %v6532_v2 = vld [vmem:[#allocation29_spill] sm:$0xff] }
 0x133   :  { %862 = vmatmul.mubr.bf16.vlgmr.msra.gmra.mrb[20].mxu0 %v647_v3  ;;  %903 = vmatmul.mubr.bf16.vlgmr.msra.gmra.mrb[20].mxu1 %v647_v3 }
 0x134   :  { %920 = vmatpush1.bf16.msra.mxu0 %v4418_v18  ;;  %961 = vmatpush1.bf16.msra.mxu1 %v4423_v19 }
 0x135   :  { %921 = vmatprep.subr.bf16.mxu0 %v4430_v20  ;;  %962 = vmatprep.subr.bf16.mxu1 %v4435_v21 }
 0x136   :  { %951 = vmatprep.mubr.bf16.mxu0 %v6510_v0  ;;  %992 = vmatprep.mubr.bf16.mxu1 %v6510_v0 }
 0x138   :  { %922 = vmatpush1.bf16.msra.mxu0 %v4442_v22  ;;  %963 = vmatpush1.bf16.msra.mxu1 %v4449_v23 }
 0x139   :  { %923 = vmatprep.subr.bf16.mxu0 %v4456_v24  ;;  %964 = vmatprep.subr.bf16.mxu1 %v4461_v25 }
 0x13c   :  { %924 = vmatpush1.bf16.msra.mxu0 %v4471_v27  ;;  %965 = vmatpush1.bf16.msra.mxu1 %v4476_v28 }
 0x13d   :  { %925 = vmatprep.subr.bf16.mxu0 %v4483_v29  ;;  %966 = vmatprep.subr.bf16.mxu1 %v4490_v30 }
 0x140   :  { %926 = vmatpush1.bf16.msra.mxu0 %v4497_v31  ;;  %967 = vmatpush1.bf16.msra.mxu1 %v4502_v32 }
 0x141   :  { %927 = vmatprep.subr.bf16.mxu0 %v4509_v33  ;;  %968 = vmatprep.subr.bf16.mxu1 %v4516_v34 }
 0x144   :  { %928 = vmatpush1.bf16.msra.mxu0 %v4528_v36  ;;  %969 = vmatpush1.bf16.msra.mxu1 %v4533_v37 }
 0x145   :  { %929 = vmatprep.subr.bf16.mxu0 %v4540_v38  ;;  %970 = vmatprep.subr.bf16.mxu1 %v4545_v39 }
 0x148   :  { %930 = vmatpush1.bf16.msra.mxu0 %v4554_v40  ;;  %971 = vmatpush1.bf16.msra.mxu1 %v4559_v41 }
 0x149   :  { %931 = vmatprep.subr.bf16.mxu0 %v4566_v42  ;;  %972 = vmatprep.subr.bf16.mxu1 %v4571_v43 }
 0x14c   :  { %932 = vmatpush1.bf16.msra.mxu0 %v4583_v45  ;;  %973 = vmatpush1.bf16.msra.mxu1 %v4588_v46 }
 0x14d   :  { %933 = vmatprep.subr.bf16.mxu0 %v4595_v47  ;;  %974 = vmatprep.subr.bf16.mxu1 %v4600_v48 }
 0x150   :  { %934 = vmatpush1.bf16.msra.mxu0 %v4609_v49  ;;  %975 = vmatpush1.bf16.msra.mxu1 %v4614_v50 }
 0x151   :  { %1030 = vmatprep.subr.bf16.mxu0 %v4629_v51  ;;  %1071 = vmatprep.subr.bf16.mxu1 %v4634_v52 }
 0x153   :  { %952 = vmatmul.mubr.bf16.vlgmr.msra.gmra.mrb[24].mxu0 %v647_v3  ;;  %993 = vmatmul.mubr.bf16.vlgmr.msra.gmra.mrb[24].mxu1 %v647_v3  ;;  %v6533_v3 = vld [vmem:[#allocation30_spill] sm:$0xff] }
 0x154   :  { %1031 = vmatpush1.bf16.msra.mxu0 %v4640_v53  ;;  %1072 = vmatpush1.bf16.msra.mxu1 %v4645_v54 }
 0x155   :  { %1032 = vmatprep.subr.bf16.mxu0 %v4653_v55  ;;  %1073 = vmatprep.subr.bf16.mxu1 %v4658_v56 }
 0x156   :  { %1062 = vmatprep.mubr.bf16.mxu0 %v6510_v0  ;;  %1103 = vmatprep.mubr.bf16.mxu1 %v6510_v0 }
 0x158   :  { %1033 = vmatpush1.bf16.msra.mxu0 %v4663_v57  ;;  %1074 = vmatpush1.bf16.msra.mxu1 %v4668_v58 }
 0x159   :  { %1034 = vmatprep.subr.bf16.mxu0 %v4677_v59  ;;  %1075 = vmatprep.subr.bf16.mxu1 %v6511_v17 }
 0x15c   :  { %1035 = vmatpush1.bf16.msra.mxu0 %v6512_v7  ;;  %1076 = vmatpush1.bf16.msra.mxu1 %v6513_v6 }
 0x15d   :  { %1036 = vmatprep.subr.bf16.mxu0 %v6514_v14  ;;  %1077 = vmatprep.subr.bf16.mxu1 %v6515_v35 }
 0x160   :  { %1037 = vmatpush1.bf16.msra.mxu0 %v6516_v8  ;;  %1078 = vmatpush1.bf16.msra.mxu1 %v6517_v13 }
 0x161   :  { %1038 = vmatprep.subr.bf16.mxu0 %v6518_v4  ;;  %1079 = vmatprep.subr.bf16.mxu1 %v6519_v11  ;;  %v6538_v11 = vld [vmem:[#allocation33_spill] sm:$0xff]  ;;  %v6539_v4 = vld [vmem:[#allocation34_spill] sm:$0xff] }
 0x164   :  { %1039 = vmatpush1.bf16.msra.mxu0 %v6520_v9  ;;  %1080 = vmatpush1.bf16.msra.mxu1 %v6521_v16  ;;  %v6537_v16 = vld [vmem:[#allocation32_spill] sm:$0xff] }
 0x165   :  { %1040 = vmatprep.subr.bf16.mxu0 %v6522_v10  ;;  %1081 = vmatprep.subr.bf16.mxu1 %v6523_v63  ;;  %v6534_v63 = vld [vmem:[#allocation6_spill] sm:$0xff]  ;;  %v6536_v10 = vld [vmem:[#allocation31_spill] sm:$0xff] }
 0x168   :  { %1041 = vmatpush1.bf16.msra.mxu0 %v6524_v12  ;;  %1082 = vmatpush1.bf16.msra.mxu1 %v6525_v15  ;;  %v6535_v12 = vld [vmem:[#allocation7_spill] sm:$0xff] }
 0x169   :  { %1042 = vmatprep.subr.bf16.mxu0 %v6526_v1  ;;  %1083 = vmatprep.subr.bf16.mxu1 %v6527_v61 }
 0x16c   :  { %1043 = vmatpush1.bf16.msra.mxu0 %v6528_v44  ;;  %1084 = vmatpush1.bf16.msra.mxu1 %v6529_v5 }
 0x16d   :  { %1044 = vmatprep.subr.bf16.mxu0 %v6530_v62  ;;  %1085 = vmatprep.subr.bf16.mxu1 %v6531_v26 }
 0x170   :  { %1045 = vmatpush1.bf16.msra.mxu0 %v6532_v2  ;;  %1086 = vmatpush1.bf16.msra.mxu1 %v6533_v3 }
 0x171   :  { %1120 = vmatprep.subr.bf16.mxu0 %v6534_v63  ;;  %1161 = vmatprep.subr.bf16.mxu1 %v6535_v12 }
 0x226   :  { %v953_v15 = vpop.f32.mrb[24].mxu0  ;;  %v994_v1 = vpop.f32.mrb[24].mxu1 }
 0x227   :  { %v1001_v61 = vadd.f32 %v953_v15, %v6536_v10  ;;  %v1003_v44 = vadd.f32 %v994_v1, %v6537_v16  ;;  %v955_v9 = vpop.f32.mrb[25].mxu0  ;;  %v996_v5 = vpop.f32.mrb[25].mxu1 }
 0x228   :  { %v1002_v62 = vadd.f32 %v955_v9, %v6538_v11  ;;  %v1004_v26 = vadd.f32 %v996_v5, %v6539_v4  ;;  %v957_v13 = vpop.f32.mrb[26].mxu0  ;;  %v998_v2 = vpop.f32.mrb[26].mxu1 }
 0x229   :  { %v3632_v8 = vmul.f32 -1.442695, %v1001_v61  ;;  %v958_v3 = vpop.f32.mrb[27].mxu0  ;;  %v999_v35 = vpop.f32.mrb[27].mxu1  ;;  %v6556_v2 = vld [vmem:[#allocation26_spill] sm:$0xff] }
 0x22a   :  { %v3633_v63 = vmul.f32 -1.442695, %v1002_v62  ;;  %v3634_v12 = vmul.f32 -1.442695, %v1004_v26  ;;  %v6554_v62 = vld [vmem:[#allocation24_spill] sm:$0xff]  ;;  %v6555_v26 = vld [vmem:[#allocation25_spill] sm:$0xff] }
 0x22b   :  { %4020 = vpow2.f32 %v3632_v8  ;;  %v6557_v3 = vld [vmem:[#allocation27_spill] sm:$0xff] }
 0x22c   :  { %4022 = vpow2.f32 %v3633_v63  ;;  %v6558_v63 = vld [vmem:[#allocation28_spill] sm:$0xff] }
 0x22d   :  { %4024 = vpow2.f32 %v3634_v12  ;;  %v6559_v12 = vld [vmem:[#allocation29_spill] sm:$0xff] }
 0x22e   :  { %4026 = vtanh.f32 %v1003_v44 }
 0x235   :  { %v4021_v14 = vpop.eup %4020 }
 0x236   :  { %v4023_v6 = vpop.eup %4022  ;;  %v1008_v10 = vadd.f32 1.0, %v4021_v14 }
 0x237   :  { %v1014_v16 = vadd.f32 1.0, %v4023_v6  ;;  %v4025_v11 = vpop.eup %4024  ;;  %v6553_v6 = vld [vmem:[#allocation23_spill] sm:$0xff] }
 0x238   :  { %4028 = vrcp.f32 %v1008_v10  ;;  %v4027_v9 = vpop.eup %4026  ;;  %v1021_v1 = vadd.f32 1.0, %v4025_v11  ;;  %v6560_v10 = vld [vmem:[#allocation30_spill] sm:$0xff] }
 0x239   :  { %4030 = vrcp.f32 %v1014_v16  ;;  %v5065_v16 = vld [vmem:[%s6344_s2 + $0x4] ss:$16 sps:$4 sm:$0xff]   ;;  %v5071_v11 = vld [vmem:[%s6344_s2 + $0xc] ss:$16 sps:$4 sm:$0xff]  }
 0x23a   :  { %4032 = vrcp.f32 %v1021_v1  ;;  %6561 = vst [vmem:[#allocation8_spill] sm:$0xff] %v5065_v16  ;;  %6562 = vst [vmem:[#allocation9_spill] sm:$0xff] %v5071_v11  ;;  %v6564_v1 = vld [vmem:[#allocation36_spill] sm:$0xff] }
 0x242   :  { %v4029_v4 = vpop.eup %4028 }
 0x243   :  { %v4031_v13 = vpop.eup %4030  ;;  %v1025_v15 = vmul.f32 %v4029_v4, %v4027_v9 }
 0x244   :  { %v1024_v35 = vmul.f32 %v4031_v13, %v4917_v60  ;;  %v4033_v8 = vpop.eup %4032  ;;  %v6552_v60 = vld [vmem:[#allocation22_spill] sm:$0xff]  ;;  %v6563_v13 = vld [vmem:[#allocation35_spill] sm:$0xff] }
 0x246   :  { %v4993_v61 = vadd.f32 %v1025_v15, %v1024_v35 }
 0x248   :  { %4034 = vtanh.f32 %v4993_v61 }
 0x252   :  { %v4035_v14 = vpop.eup %4034 }
 0x253   :  { %v1028_v5 = vmul.f32 %v4035_v14, %v4033_v8 }
 0x255   :  { %v1029_v44 = vpack.c.bf16 %v1028_v5, %v1028_v5  ;;  %v6565_v5 = vld [vmem:[#allocation37_spill] sm:$0xff] }
 0x257   :  { %1063 = vmatmul.mubr.bf16.vlgmr.msra.gmra.mrb[28].mxu0 %v1029_v44  ;;  %1104 = vmatmul.mubr.bf16.vlgmr.msra.gmra.mrb[28].mxu1 %v1029_v44 }
 0x258   :  { %1121 = vmatpush1.bf16.msra.mxu0 %v4418_v18  ;;  %1162 = vmatpush1.bf16.msra.mxu1 %v4423_v19  ;;  %v6540_v18 = vld [vmem:[#allocation10_spill] sm:$0xff]  ;;  %v6541_v19 = vld [vmem:[#allocation11_spill] sm:$0xff] }
 0x259   :  { %1122 = vmatprep.subr.bf16.mxu0 %v4430_v20  ;;  %1163 = vmatprep.subr.bf16.mxu1 %v4435_v21  ;;  %v6542_v20 = vld [vmem:[#allocation12_spill] sm:$0xff]  ;;  %v6543_v21 = vld [vmem:[#allocation13_spill] sm:$0xff] }
 0x25a   :  { %1152 = vmatprep.mubr.bf16.mxu0 %v6510_v0  ;;  %1193 = vmatprep.mubr.bf16.mxu1 %v6510_v0 }
 0x25c   :  { %1123 = vmatpush1.bf16.msra.mxu0 %v4442_v22  ;;  %1164 = vmatpush1.bf16.msra.mxu1 %v4449_v23  ;;  %v6544_v22 = vld [vmem:[#allocation14_spill] sm:$0xff]  ;;  %v6545_v23 = vld [vmem:[#allocation15_spill] sm:$0xff] }
 0x25d   :  { %1124 = vmatprep.subr.bf16.mxu0 %v4456_v24  ;;  %1165 = vmatprep.subr.bf16.mxu1 %v4461_v25  ;;  %v6546_v24 = vld [vmem:[#allocation16_spill] sm:$0xff]  ;;  %v6547_v25 = vld [vmem:[#allocation17_spill] sm:$0xff] }
 0x260   :  { %1125 = vmatpush1.bf16.msra.mxu0 %v4471_v27  ;;  %1166 = vmatpush1.bf16.msra.mxu1 %v4476_v28  ;;  %v6548_v27 = vld [vmem:[#allocation18_spill] sm:$0xff]  ;;  %v6549_v28 = vld [vmem:[#allocation19_spill] sm:$0xff] }
 0x261   :  { %1126 = vmatprep.subr.bf16.mxu0 %v4483_v29  ;;  %1167 = vmatprep.subr.bf16.mxu1 %v4490_v30  ;;  %v6550_v29 = vld [vmem:[#allocation20_spill] sm:$0xff]  ;;  %v6551_v30 = vld [vmem:[#allocation21_spill] sm:$0xff] }
 0x264   :  { %1127 = vmatpush1.bf16.msra.mxu0 %v4497_v31  ;;  %1168 = vmatpush1.bf16.msra.mxu1 %v4502_v32 }
 0x265   :  { %1128 = vmatprep.subr.bf16.mxu0 %v4509_v33  ;;  %1169 = vmatprep.subr.bf16.mxu1 %v4516_v34 }
 0x268   :  { %1129 = vmatpush1.bf16.msra.mxu0 %v4528_v36  ;;  %1170 = vmatpush1.bf16.msra.mxu1 %v4533_v37 }
 0x269   :  { %1130 = vmatprep.subr.bf16.mxu0 %v4540_v38  ;;  %1171 = vmatprep.subr.bf16.mxu1 %v4545_v39 }
 0x26c   :  { %1131 = vmatpush1.bf16.msra.mxu0 %v4554_v40  ;;  %1172 = vmatpush1.bf16.msra.mxu1 %v4559_v41 }
 0x26d   :  { %1132 = vmatprep.subr.bf16.mxu0 %v4566_v42  ;;  %1173 = vmatprep.subr.bf16.mxu1 %v4571_v43 }
 0x270   :  { %1133 = vmatpush1.bf16.msra.mxu0 %v4583_v45  ;;  %1174 = vmatpush1.bf16.msra.mxu1 %v4588_v46 }
 0x271   :  { %1134 = vmatprep.subr.bf16.mxu0 %v4595_v47  ;;  %1175 = vmatprep.subr.bf16.mxu1 %v4600_v48 }
 0x274   :  { %1135 = vmatpush1.bf16.msra.mxu0 %v4609_v49  ;;  %1176 = vmatpush1.bf16.msra.mxu1 %v4614_v50 }
 0x275   :  { %1231 = vmatprep.subr.bf16.mxu0 %v4629_v51  ;;  %1272 = vmatprep.subr.bf16.mxu1 %v4634_v52 }
 0x277   :  { %1153 = vmatmul.mubr.bf16.vlgmr.msra.gmra.mrb[32].mxu0 %v1029_v44  ;;  %1194 = vmatmul.mubr.bf16.vlgmr.msra.gmra.mrb[32].mxu1 %v1029_v44 }
 0x278   :  { %1232 = vmatpush1.bf16.msra.mxu0 %v4640_v53  ;;  %1273 = vmatpush1.bf16.msra.mxu1 %v4645_v54 }
 0x279   :  { %1233 = vmatprep.subr.bf16.mxu0 %v4653_v55  ;;  %1274 = vmatprep.subr.bf16.mxu1 %v4658_v56 }
 0x27a   :  { %1263 = vmatprep.mubr.bf16.mxu0 %v6510_v0  ;;  %1304 = vmatprep.mubr.bf16.mxu1 %v6510_v0 }
 0x27c   :  { %1234 = vmatpush1.bf16.msra.mxu0 %v4663_v57  ;;  %1275 = vmatpush1.bf16.msra.mxu1 %v4668_v58 }
 0x27d   :  { %1235 = vmatprep.subr.bf16.mxu0 %v4677_v59  ;;  %1276 = vmatprep.subr.bf16.mxu1 %v6511_v17 }
 0x280   :  { %1236 = vmatpush1.bf16.msra.mxu0 %v6512_v7  ;;  %1277 = vmatpush1.bf16.msra.mxu1 %v6540_v18 }
 0x281   :  { %1237 = vmatprep.subr.bf16.mxu0 %v6541_v19  ;;  %1278 = vmatprep.subr.bf16.mxu1 %v6542_v20 }
 0x284   :  { %1238 = vmatpush1.bf16.msra.mxu0 %v6543_v21  ;;  %1279 = vmatpush1.bf16.msra.mxu1 %v6544_v22 }
 0x285   :  { %1239 = vmatprep.subr.bf16.mxu0 %v6545_v23  ;;  %1280 = vmatprep.subr.bf16.mxu1 %v6546_v24 }
 0x288   :  { %1240 = vmatpush1.bf16.msra.mxu0 %v6547_v25  ;;  %1281 = vmatpush1.bf16.msra.mxu1 %v6548_v27 }
 0x289   :  { %1241 = vmatprep.subr.bf16.mxu0 %v6549_v28  ;;  %1282 = vmatprep.subr.bf16.mxu1 %v6550_v29 }
 0x28c   :  { %1242 = vmatpush1.bf16.msra.mxu0 %v6551_v30  ;;  %1283 = vmatpush1.bf16.msra.mxu1 %v6552_v60 }
 0x28d   :  { %1243 = vmatprep.subr.bf16.mxu0 %v6553_v6  ;;  %1284 = vmatprep.subr.bf16.mxu1 %v6554_v62 }
 0x290   :  { %1244 = vmatpush1.bf16.msra.mxu0 %v6555_v26  ;;  %1285 = vmatpush1.bf16.msra.mxu1 %v6556_v2 }
 0x291   :  { %1245 = vmatprep.subr.bf16.mxu0 %v6557_v3  ;;  %1286 = vmatprep.subr.bf16.mxu1 %v6558_v63 }
 0x294   :  { %1246 = vmatpush1.bf16.msra.mxu0 %v6559_v12  ;;  %1287 = vmatpush1.bf16.msra.mxu1 %v6560_v10  ;;  %v6566_v10 = vld [vmem:[#allocation38_spill] sm:$0xff] }
 0x295   :  { %1321 = vmatprep.subr.bf16.mxu0 %v5065_v16  ;;  %1362 = vmatprep.subr.bf16.mxu1 %v5071_v11 }
 0x34a   :  { %v1154_v9 = vpop.f32.mrb[32].mxu0  ;;  %v1195_v4 = vpop.f32.mrb[32].mxu1 }
 0x34b   :  { %v1202_v15 = vadd.f32 %v1154_v9, %v6563_v13  ;;  %v1204_v35 = vadd.f32 %v1195_v4, %v6564_v1  ;;  %v1156_v8 = vpop.f32.mrb[33].mxu0  ;;  %v1197_v14 = vpop.f32.mrb[33].mxu1 }
 0x34c   :  { %v1203_v44 = vadd.f32 %v1156_v8, %v6565_v5  ;;  %v1205_v12 = vadd.f32 %v1197_v14, %v6566_v10  ;;  %v1158_v16 = vpop.f32.mrb[34].mxu0  ;;  %v1199_v63 = vpop.f32.mrb[34].mxu1  ;;  %v5111_v8 = vld [vmem:[%s6344_s2 + $0x20] ss:$16 sps:$4 sm:$0xff]   ;;  %v5117_v14 = vld [vmem:[%s6344_s2 + $0x28] ss:$16 sps:$4 sm:$0xff]  }
 0x34d   :  { %v3635_v3 = vmul.f32 -1.442695, %v1202_v15  ;;  %v1159_v2 = vpop.f32.mrb[35].mxu0  ;;  %v1200_v26 = vpop.f32.mrb[35].mxu1  ;;  %v5123_v5 = vld [vmem:[%s6344_s2 + $0x44] ss:$16 sps:$4 sm:$0xff]  }
 0x34e   :  { %v3636_v62 = vmul.f32 -1.442695, %v1203_v44  ;;  %v3637_v11 = vmul.f32 -1.442695, %v1205_v12  ;;  %v5129_v44 = vld [vmem:[%s6344_s2 + $0x4c] ss:$16 sps:$4 sm:$0xff]  }
 0x34f   :  { %4036 = vpow2.f32 %v3635_v3 }
 0x350   :  { %4038 = vpow2.f32 %v3636_v62 }
 0x351   :  { %4040 = vpow2.f32 %v3637_v11  ;;  %v5097_v11 = vld [vmem:[%s6344_s2 + $0x24] ss:$16 sps:$4 sm:$0xff]  }
 0x352   :  { %4042 = vtanh.f32 %v1204_v35  ;;  %v5103_v35 = vld [vmem:[%s6344_s2 + $0x2c] ss:$16 sps:$4 sm:$0xff]  }
 0x359   :  { %v4037_v6 = vpop.eup %4036 }
 0x35a   :  { %v4039_v60 = vpop.eup %4038  ;;  %v1209_v9 = vadd.f32 1.0, %v4037_v6 }
 0x35b   :  { %v1215_v4 = vadd.f32 1.0, %v4039_v60  ;;  %v4041_v13 = vpop.eup %4040  ;;  %v5085_v60 = vld [vmem:[%s6344_s2] ss:$16 sps:$4 sm:$0xff]  }
 0x35c   :  { %4044 = vrcp.f32 %v1209_v9  ;;  %v4043_v1 = vpop.eup %4042  ;;  %v1222_v15 = vadd.f32 1.0, %v4041_v13  ;;  %v5135_v9 = vld [vmem:[%s6344_s2 + $0x40] ss:$16 sps:$4 sm:$0xff]   ;;  %v5147_v13 = vld [vmem:[%s6344_s2 + $0x64] ss:$16 sps:$4 sm:$0xff]  }
 0x35d   :  { %4046 = vrcp.f32 %v1215_v4  ;;  %v5141_v4 = vld [vmem:[%s6344_s2 + $0x48] ss:$16 sps:$4 sm:$0xff]  }
 0x35e   :  { %4048 = vrcp.f32 %v1222_v15 }
 0x366   :  { %v4045_v10 = vpop.eup %4044 }
 0x367   :  { %v4047_v16 = vpop.eup %4046  ;;  %v1226_v63 = vmul.f32 %v4045_v10, %v4043_v1  ;;  %v5153_v1 = vld [vmem:[%s6344_s2 + $0x6c] ss:$16 sps:$4 sm:$0xff]  }
 0x368   :  { %v1225_v26 = vmul.f32 %v4047_v16, %v4993_v61  ;;  %v4049_v62 = vpop.eup %4048  ;;  %v5091_v61 = vld [vmem:[%s6344_s2 + $0x8] ss:$16 sps:$4 sm:$0xff]  }
 0x36a   :  { %v5079_v2 = vadd.f32 %v1226_v63, %v1225_v26 }
 0x36c   :  { %4050 = vtanh.f32 %v5079_v2 }
 0x376   :  { %v4051_v6 = vpop.eup %4050 }
 0x377   :  { %v1229_v3 = vmul.f32 %v4051_v6, %v4049_v62  ;;  %v5241_v62 = vld [vmem:[%s6344_s2 + $0x68] ss:$16 sps:$4 sm:$0xff]   ;;  %v5247_v6 = vld [vmem:[%s6344_s2 + $0x84] ss:$16 sps:$4 sm:$0xff]  }
 0x379   :  { %v1230_v12 = vpack.c.bf16 %v1229_v3, %v1229_v3  ;;  %v5253_v3 = vld [vmem:[%s6344_s2 + $0x8c] ss:$16 sps:$4 sm:$0xff]  }
 0x37b   :  { %1264 = vmatmul.mubr.bf16.vlgmr.msra.gmra.mrb[36].mxu0 %v1230_v12  ;;  %1305 = vmatmul.mubr.bf16.vlgmr.msra.gmra.mrb[36].mxu1 %v1230_v12 }
 0x37c   :  { %1322 = vmatpush1.bf16.msra.mxu0 %v5085_v60  ;;  %1363 = vmatpush1.bf16.msra.mxu1 %v5091_v61 }
 0x37d   :  { %1323 = vmatprep.subr.bf16.mxu0 %v5097_v11  ;;  %1364 = vmatprep.subr.bf16.mxu1 %v5103_v35 }
 0x37e   :  { %1353 = vmatprep.mubr.bf16.mxu0 %v6510_v0  ;;  %1394 = vmatprep.mubr.bf16.mxu1 %v6510_v0 }
 0x380   :  { %1324 = vmatpush1.bf16.msra.mxu0 %v5111_v8  ;;  %1365 = vmatpush1.bf16.msra.mxu1 %v5117_v14 }
 0x381   :  { %1325 = vmatprep.subr.bf16.mxu0 %v5123_v5  ;;  %1366 = vmatprep.subr.bf16.mxu1 %v5129_v44 }
 0x384   :  { %1326 = vmatpush1.bf16.msra.mxu0 %v5135_v9  ;;  %1367 = vmatpush1.bf16.msra.mxu1 %v5141_v4 }
 0x385   :  { %1327 = vmatprep.subr.bf16.mxu0 %v5147_v13  ;;  %1368 = vmatprep.subr.bf16.mxu1 %v5153_v1 }
 0x388   :  { %1328 = vmatpush1.bf16.msra.mxu0 %v4497_v31  ;;  %1369 = vmatpush1.bf16.msra.mxu1 %v4502_v32  ;;  %v6567_v31 = vld [vmem:[#allocation22_spill] sm:$0xff]  ;;  %v6568_v32 = vld [vmem:[#allocation23_spill] sm:$0xff] }
 0x389   :  { %1329 = vmatprep.subr.bf16.mxu0 %v4509_v33  ;;  %1370 = vmatprep.subr.bf16.mxu1 %v4516_v34  ;;  %v6569_v33 = vld [vmem:[#allocation24_spill] sm:$0xff]  ;;  %v6570_v34 = vld [vmem:[#allocation25_spill] sm:$0xff] }
 0x38c   :  { %1330 = vmatpush1.bf16.msra.mxu0 %v4528_v36  ;;  %1371 = vmatpush1.bf16.msra.mxu1 %v4533_v37  ;;  %v6571_v36 = vld [vmem:[#allocation26_spill] sm:$0xff]  ;;  %v6572_v37 = vld [vmem:[#allocation27_spill] sm:$0xff] }
 0x38d   :  { %1331 = vmatprep.subr.bf16.mxu0 %v4540_v38  ;;  %1372 = vmatprep.subr.bf16.mxu1 %v4545_v39  ;;  %v6573_v38 = vld [vmem:[#allocation28_spill] sm:$0xff]  ;;  %v6574_v39 = vld [vmem:[#allocation29_spill] sm:$0xff] }
 0x390   :  { %1332 = vmatpush1.bf16.msra.mxu0 %v4554_v40  ;;  %1373 = vmatpush1.bf16.msra.mxu1 %v4559_v41  ;;  %v6575_v40 = vld [vmem:[#allocation30_spill] sm:$0xff]  ;;  %v6576_v41 = vld [vmem:[#allocation8_spill] sm:$0xff] }
 0x391   :  { %1333 = vmatprep.subr.bf16.mxu0 %v4566_v42  ;;  %1374 = vmatprep.subr.bf16.mxu1 %v4571_v43  ;;  %v6577_v42 = vld [vmem:[#allocation9_spill] sm:$0xff] }
 0x394   :  { %1334 = vmatpush1.bf16.msra.mxu0 %v4583_v45  ;;  %1375 = vmatpush1.bf16.msra.mxu1 %v4588_v46  ;;  %v6578_v46 = vld [vmem:[#allocation39_spill] sm:$0xff] }
 0x395   :  { %1335 = vmatprep.subr.bf16.mxu0 %v4595_v47  ;;  %1376 = vmatprep.subr.bf16.mxu1 %v4600_v48  ;;  %v6579_v48 = vld [vmem:[#allocation40_spill] sm:$0xff] }
 0x398   :  { %1336 = vmatpush1.bf16.msra.mxu0 %v4609_v49  ;;  %1377 = vmatpush1.bf16.msra.mxu1 %v4614_v50 }
 0x399   :  { %1432 = vmatprep.subr.bf16.mxu0 %v4629_v51  ;;  %1473 = vmatprep.subr.bf16.mxu1 %v4634_v52  ;;  %v6580_v52 = vld [vmem:[#allocation41_spill] sm:$0xff] }
 0x39b   :  { %1354 = vmatmul.mubr.bf16.vlgmr.msra.gmra.mrb[40].mxu0 %v1230_v12  ;;  %1395 = vmatmul.mubr.bf16.vlgmr.msra.gmra.mrb[40].mxu1 %v1230_v12  ;;  %v5259_v12 = vld [vmem:[%s6344_s2 + $0x80] ss:$16 sps:$4 sm:$0xff]  }
 0x39c   :  { %1433 = vmatpush1.bf16.msra.mxu0 %v4640_v53  ;;  %1474 = vmatpush1.bf16.msra.mxu1 %v4645_v54  ;;  %v6581_v54 = vld [vmem:[#allocation42_spill] sm:$0xff] }
 0x39d   :  { %1434 = vmatprep.subr.bf16.mxu0 %v4653_v55  ;;  %1475 = vmatprep.subr.bf16.mxu1 %v4658_v56 }
 0x39e   :  { %1464 = vmatprep.mubr.bf16.mxu0 %v6510_v0  ;;  %1505 = vmatprep.mubr.bf16.mxu1 %v6510_v0 }
 0x3a0   :  { %1435 = vmatpush1.bf16.msra.mxu0 %v4663_v57  ;;  %1476 = vmatpush1.bf16.msra.mxu1 %v4668_v58 }
 0x3a1   :  { %1436 = vmatprep.subr.bf16.mxu0 %v4677_v59  ;;  %1477 = vmatprep.subr.bf16.mxu1 %v6511_v17 }
 0x3a4   :  { %1437 = vmatpush1.bf16.msra.mxu0 %v6512_v7  ;;  %1478 = vmatpush1.bf16.msra.mxu1 %v6540_v18 }
 0x3a5   :  { %1438 = vmatprep.subr.bf16.mxu0 %v6541_v19  ;;  %1479 = vmatprep.subr.bf16.mxu1 %v6542_v20 }
 0x3a8   :  { %1439 = vmatpush1.bf16.msra.mxu0 %v6543_v21  ;;  %1480 = vmatpush1.bf16.msra.mxu1 %v6544_v22 }
 0x3a9   :  { %1440 = vmatprep.subr.bf16.mxu0 %v6545_v23  ;;  %1481 = vmatprep.subr.bf16.mxu1 %v6546_v24 }
 0x3ac   :  { %1441 = vmatpush1.bf16.msra.mxu0 %v6547_v25  ;;  %1482 = vmatpush1.bf16.msra.mxu1 %v6548_v27 }
 0x3ad   :  { %1442 = vmatprep.subr.bf16.mxu0 %v6549_v28  ;;  %1483 = vmatprep.subr.bf16.mxu1 %v6550_v29 }
 0x3b0   :  { %1443 = vmatpush1.bf16.msra.mxu0 %v6551_v30  ;;  %1484 = vmatpush1.bf16.msra.mxu1 %v6567_v31  ;;  %v5265_v31 = vld [vmem:[%s6344_s2 + $0x88] ss:$16 sps:$4 sm:$0xff]  }
 0x3b1   :  { %1444 = vmatprep.subr.bf16.mxu0 %v6568_v32  ;;  %1485 = vmatprep.subr.bf16.mxu1 %v6569_v33  ;;  %v5271_v32 = vld [vmem:[%s6344_s2 + $0xa4] ss:$16 sps:$4 sm:$0xff]   ;;  %v5277_v33 = vld [vmem:[%s6344_s2 + $0xac] ss:$16 sps:$4 sm:$0xff]  }
 0x3b4   :  { %1445 = vmatpush1.bf16.msra.mxu0 %v6570_v34  ;;  %1486 = vmatpush1.bf16.msra.mxu1 %v6571_v36  ;;  %v5283_v34 = vld [vmem:[%s6344_s2 + $0xa0] ss:$16 sps:$4 sm:$0xff]   ;;  %v5289_v36 = vld [vmem:[%s6344_s2 + $0xa8] ss:$16 sps:$4 sm:$0xff]  }
 0x3b5   :  { %1446 = vmatprep.subr.bf16.mxu0 %v6572_v37  ;;  %1487 = vmatprep.subr.bf16.mxu1 %v6573_v38  ;;  %v5295_v37 = vld [vmem:[%s6344_s2 + $0xc4] ss:$16 sps:$4 sm:$0xff]   ;;  %v5301_v38 = vld [vmem:[%s6344_s2 + $0xcc] ss:$16 sps:$4 sm:$0xff]  }
 0x3b8   :  { %1447 = vmatpush1.bf16.msra.mxu0 %v6574_v39  ;;  %1488 = vmatpush1.bf16.msra.mxu1 %v6575_v40  ;;  %v5307_v39 = vld [vmem:[%s6344_s2 + $0xc0] ss:$16 sps:$4 sm:$0xff]   ;;  %v5313_v40 = vld [vmem:[%s6344_s2 + $0xc8] ss:$16 sps:$4 sm:$0xff]  }
 0x3b9   :  { %1522 = vmatprep.subr.bf16.mxu0 %v6576_v41  ;;  %1563 = vmatprep.subr.bf16.mxu1 %v6577_v42 }
 0x46e   :  { %v1355_v43 = vpop.f32.mrb[40].mxu0  ;;  %v1396_v45 = vpop.f32.mrb[40].mxu1 }
 0x46f   :  { %v1403_v47 = vadd.f32 %v1355_v43, %v6578_v46  ;;  %v1405_v49 = vadd.f32 %v1396_v45, %v6579_v48  ;;  %v1357_v50 = vpop.f32.mrb[41].mxu0  ;;  %v1398_v51 = vpop.f32.mrb[41].mxu1  ;;  %v5319_v43 = vld [vmem:[%s6344_s2 + $0xe4] ss:$16 sps:$4 sm:$0xff]   ;;  %v5325_v45 = vld [vmem:[%s6344_s2 + $0xec] ss:$16 sps:$4 sm:$0xff]  }
 0x470   :  { %v1404_v53 = vadd.f32 %v1357_v50, %v6580_v52  ;;  %v1406_v55 = vadd.f32 %v1398_v51, %v6581_v54  ;;  %v1359_v56 = vpop.f32.mrb[42].mxu0  ;;  %v1400_v57 = vpop.f32.mrb[42].mxu1  ;;  %v5331_v46 = vld [vmem:[%s6344_s2 + $0xe0] ss:$16 sps:$4 sm:$0xff]   ;;  %v5343_v48 = vld [vmem:[%s6345_s4 + $0x4] ss:$16 sps:$4 sm:$0xff]  }
 0x471   :  { %v3638_v58 = vmul.f32 -1.442695, %v1403_v47  ;;  %v1360_v59 = vpop.f32.mrb[43].mxu0  ;;  %v1401_v17 = vpop.f32.mrb[43].mxu1  ;;  %v5337_v47 = vld [vmem:[%s6344_s2 + $0xe8] ss:$16 sps:$4 sm:$0xff]  }
 0x472   :  { %v3639_v7 = vmul.f32 -1.442695, %v1404_v53  ;;  %v3640_v18 = vmul.f32 -1.442695, %v1406_v55  ;;  %v5355_v50 = vld [vmem:[%s6345_s4] ss:$16 sps:$4 sm:$0xff]  }
 0x473   :  { %4052 = vpow2.f32 %v3638_v58  ;;  %v5361_v51 = vld [vmem:[%s6345_s4 + $0x8] ss:$16 sps:$4 sm:$0xff]   ;;  %v5367_v52 = vld [vmem:[%s6345_s4 + $0x24] ss:$16 sps:$4 sm:$0xff]   ;;  %v5373_v53 = vld [vmem:[%s6345_s4 + $0x2c] ss:$16 sps:$4 sm:$0xff]  }
 0x474   :  { %4054 = vpow2.f32 %v3639_v7  ;;  %v5381_v54 = vld [vmem:[%s6345_s4 + $0x20] ss:$16 sps:$4 sm:$0xff]   ;;  %v5387_v55 = vld [vmem:[%s6345_s4 + $0x28] ss:$16 sps:$4 sm:$0xff]   ;;  %v5393_v56 = vld [vmem:[%s6345_s4 + $0x44] ss:$16 sps:$4 sm:$0xff]  }
 0x475   :  { %4056 = vpow2.f32 %v3640_v18  ;;  %v5399_v57 = vld [vmem:[%s6345_s4 + $0x4c] ss:$16 sps:$4 sm:$0xff]   ;;  %v5405_v58 = vld [vmem:[%s6345_s4 + $0x40] ss:$16 sps:$4 sm:$0xff]   ;;  %v5411_v59 = vld [vmem:[%s6345_s4 + $0x48] ss:$16 sps:$4 sm:$0xff]  }
 0x476   :  { %4058 = vtanh.f32 %v1405_v49  ;;  %v5349_v49 = vld [vmem:[%s6345_s4 + $0xc] ss:$16 sps:$4 sm:$0xff]   ;;  %6582 = vst [vmem:[#allocation6_spill] sm:$0xff] %v5411_v59  ;;  %v5417_v17 = vld [vmem:[%s6345_s4 + $0x64] ss:$16 sps:$4 sm:$0xff]  }
 0x477   :  { %6583 = vst [vmem:[#allocation7_spill] sm:$0xff] %v5417_v17  ;;  %v5423_v7 = vld [vmem:[%s6345_s4 + $0x6c] ss:$16 sps:$4 sm:$0xff]   ;;  %v5429_v18 = vld [vmem:[%s6345_s4 + $0x60] ss:$16 sps:$4 sm:$0xff]  }
 0x478   :  { %6584 = vst [vmem:[#allocation31_spill] sm:$0xff] %v5423_v7  ;;  %6585 = vst [vmem:[#allocation32_spill] sm:$0xff] %v5429_v18 }
 0x47d   :  { %v4053_v19 = vpop.eup %4052 }
 0x47e   :  { %v4055_v20 = vpop.eup %4054  ;;  %v1410_v21 = vadd.f32 1.0, %v4053_v19  ;;  %v5435_v19 = vld [vmem:[%s6345_s4 + $0x68] ss:$16 sps:$4 sm:$0xff]  }
 0x47f   :  { %v1416_v22 = vadd.f32 1.0, %v4055_v20  ;;  %v4057_v23 = vpop.eup %4056  ;;  %6586 = vst [vmem:[#allocation33_spill] sm:$0xff] %v5435_v19  ;;  %v5441_v20 = vld [vmem:[%s6345_s4 + $0x84] ss:$16 sps:$4 sm:$0xff]  }
 0x480   :  { %4060 = vrcp.f32 %v1410_v21  ;;  %v4059_v24 = vpop.eup %4058  ;;  %v1423_v29 = vadd.f32 1.0, %v4057_v23  ;;  %6587 = vst [vmem:[#allocation34_spill] sm:$0xff] %v5441_v20  ;;  %v5447_v21 = vld [vmem:[%s6345_s4 + $0x8c] ss:$16 sps:$4 sm:$0xff]   ;;  %v5459_v23 = vld [vmem:[%s6345_s4 + $0x88] ss:$16 sps:$4 sm:$0xff]  }
 0x481   :  { %4062 = vrcp.f32 %v1416_v22  ;;  %6588 = vst [vmem:[#allocation10_spill] sm:$0xff] %v5447_v21  ;;  %v5453_v22 = vld [vmem:[%s6345_s4 + $0x80] ss:$16 sps:$4 sm:$0xff]   ;;  %6590 = vst [vmem:[#allocation12_spill] sm:$0xff] %v5459_v23 }
 0x482   :  { %4064 = vrcp.f32 %v1423_v29  ;;  %6589 = vst [vmem:[#allocation11_spill] sm:$0xff] %v5453_v22  ;;  %v5489_v29 = vld [vmem:[%s6345_s4 + $0xc4] ss:$16 sps:$4 sm:$0xff]  }
 0x483   :  { %6595 = vst [vmem:[#allocation17_spill] sm:$0xff] %v5489_v29 }
 0x48a   :  { %v4061_v25 = vpop.eup %4060 }
 0x48b   :  { %v4063_v27 = vpop.eup %4062  ;;  %v1427_v28 = vmul.f32 %v4061_v25, %v4059_v24  ;;  %v5465_v24 = vld [vmem:[%s6345_s4 + $0xa4] ss:$16 sps:$4 sm:$0xff]   ;;  %v5471_v25 = vld [vmem:[%s6345_s4 + $0xac] ss:$16 sps:$4 sm:$0xff]  }
 0x48c   :  { %v1426_v30 = vmul.f32 %v4063_v27, %v5079_v2  ;;  %v4065_v16 = vpop.eup %4064  ;;  %v5235_v2 = vld [vmem:[%s6344_s2 + $0x60] ss:$16 sps:$4 sm:$0xff]   ;;  %6591 = vst [vmem:[#allocation13_spill] sm:$0xff] %v5465_v24  ;;  %6592 = vst [vmem:[#allocation14_spill] sm:$0xff] %v5471_v25 }
 0x48d   :  { %v5477_v27 = vld [vmem:[%s6345_s4 + $0xa0] ss:$16 sps:$4 sm:$0xff]  }
 0x48e   :  { %v5215_v10 = vadd.f32 %v1427_v28, %v1426_v30  ;;  %6593 = vst [vmem:[#allocation15_spill] sm:$0xff] %v5477_v27  ;;  %v5483_v28 = vld [vmem:[%s6345_s4 + $0xa8] ss:$16 sps:$4 sm:$0xff]   ;;  %v5495_v30 = vld [vmem:[%s6345_s4 + $0xcc] ss:$16 sps:$4 sm:$0xff]  }
 0x48f   :  { %6594 = vst [vmem:[#allocation16_spill] sm:$0xff] %v5483_v28  ;;  %6596 = vst [vmem:[#allocation18_spill] sm:$0xff] %v5495_v30 }
 0x490   :  { %4066 = vtanh.f32 %v5215_v10 }
 0x49a   :  { %v4067_v63 = vpop.eup %4066 }
 0x49b   :  { %v1430_v15 = vmul.f32 %v4067_v63, %v4065_v16  ;;  %v5501_v16 = vld [vmem:[%s6345_s4 + $0xc0] ss:$16 sps:$4 sm:$0xff]   ;;  %v5507_v63 = vld [vmem:[%s6345_s4 + $0xc8] ss:$16 sps:$4 sm:$0xff]  }
 0x49c   :  { %6597 = vst [vmem:[#allocation19_spill] sm:$0xff] %v5501_v16  ;;  %6598 = vst [vmem:[#allocation20_spill] sm:$0xff] %v5507_v63 }
 0x49d   :  { %v1431_v26 = vpack.c.bf16 %v1430_v15, %v1430_v15  ;;  %v5513_v15 = vld [vmem:[%s6345_s4 + $0xe4] ss:$16 sps:$4 sm:$0xff]  }
 0x49e   :  { %6599 = vst [vmem:[#allocation21_spill] sm:$0xff] %v5513_v15 }
 0x49f   :  { %1465 = vmatmul.mubr.bf16.vlgmr.msra.gmra.mrb[44].mxu0 %v1431_v26  ;;  %1506 = vmatmul.mubr.bf16.vlgmr.msra.gmra.mrb[44].mxu1 %v1431_v26 }
 0x4a0   :  { %1523 = vmatpush1.bf16.msra.mxu0 %v5085_v60  ;;  %1564 = vmatpush1.bf16.msra.mxu1 %v5091_v61 }
 0x4a1   :  { %1524 = vmatprep.subr.bf16.mxu0 %v5097_v11  ;;  %1565 = vmatprep.subr.bf16.mxu1 %v5103_v35 }
 0x4a2   :  { %1554 = vmatprep.mubr.bf16.mxu0 %v6510_v0  ;;  %1595 = vmatprep.mubr.bf16.mxu1 %v6510_v0 }
 0x4a4   :  { %1525 = vmatpush1.bf16.msra.mxu0 %v5111_v8  ;;  %1566 = vmatpush1.bf16.msra.mxu1 %v5117_v14 }
 0x4a5   :  { %1526 = vmatprep.subr.bf16.mxu0 %v5123_v5  ;;  %1567 = vmatprep.subr.bf16.mxu1 %v5129_v44 }
 0x4a8   :  { %1527 = vmatpush1.bf16.msra.mxu0 %v5135_v9  ;;  %1568 = vmatpush1.bf16.msra.mxu1 %v5141_v4 }
 0x4a9   :  { %1528 = vmatprep.subr.bf16.mxu0 %v5147_v13  ;;  %1569 = vmatprep.subr.bf16.mxu1 %v5153_v1 }
 0x4ac   :  { %1529 = vmatpush1.bf16.msra.mxu0 %v5235_v2  ;;  %1570 = vmatpush1.bf16.msra.mxu1 %v5241_v62 }
 0x4ad   :  { %1530 = vmatprep.subr.bf16.mxu0 %v5247_v6  ;;  %1571 = vmatprep.subr.bf16.mxu1 %v5253_v3 }
 0x4b0   :  { %1531 = vmatpush1.bf16.msra.mxu0 %v5259_v12  ;;  %1572 = vmatpush1.bf16.msra.mxu1 %v5265_v31 }
 0x4b1   :  { %1532 = vmatprep.subr.bf16.mxu0 %v5271_v32  ;;  %1573 = vmatprep.subr.bf16.mxu1 %v5277_v33 }
 0x4b4   :  { %1533 = vmatpush1.bf16.msra.mxu0 %v5283_v34  ;;  %1574 = vmatpush1.bf16.msra.mxu1 %v5289_v36 }
 0x4b5   :  { %1534 = vmatprep.subr.bf16.mxu0 %v5295_v37  ;;  %1575 = vmatprep.subr.bf16.mxu1 %v5301_v38 }
 0x4b8   :  { %1535 = vmatpush1.bf16.msra.mxu0 %v5307_v39  ;;  %1576 = vmatpush1.bf16.msra.mxu1 %v5313_v40 }
 0x4b9   :  { %1536 = vmatprep.subr.bf16.mxu0 %v5319_v43  ;;  %1577 = vmatprep.subr.bf16.mxu1 %v5325_v45 }
 0x4bc   :  { %1537 = vmatpush1.bf16.msra.mxu0 %v5331_v46  ;;  %1578 = vmatpush1.bf16.msra.mxu1 %v5337_v47 }
 0x4bd   :  { %1633 = vmatprep.subr.bf16.mxu0 %v5343_v48  ;;  %1674 = vmatprep.subr.bf16.mxu1 %v5349_v49 }
 0x4bf   :  { %1555 = vmatmul.mubr.bf16.vlgmr.msra.gmra.mrb[48].mxu0 %v1431_v26  ;;  %1596 = vmatmul.mubr.bf16.vlgmr.msra.gmra.mrb[48].mxu1 %v1431_v26  ;;  %v5519_v26 = vld [vmem:[%s6345_s4 + $0xec] ss:$16 sps:$4 sm:$0xff]  }
 0x4c0   :  { %1634 = vmatpush1.bf16.msra.mxu0 %v5355_v50  ;;  %1675 = vmatpush1.bf16.msra.mxu1 %v5361_v51  ;;  %6600 = vst [vmem:[#allocation35_spill] sm:$0xff] %v5519_v26 }
 0x4c1   :  { %1635 = vmatprep.subr.bf16.mxu0 %v5367_v52  ;;  %1676 = vmatprep.subr.bf16.mxu1 %v5373_v53 }
 0x4c2   :  { %1665 = vmatprep.mubr.bf16.mxu0 %v6510_v0  ;;  %1706 = vmatprep.mubr.bf16.mxu1 %v6510_v0 }
 0x4c4   :  { %1636 = vmatpush1.bf16.msra.mxu0 %v5381_v54  ;;  %1677 = vmatpush1.bf16.msra.mxu1 %v5387_v55 }
 0x4c5   :  { %1637 = vmatprep.subr.bf16.mxu0 %v5393_v56  ;;  %1678 = vmatprep.subr.bf16.mxu1 %v5399_v57 }
 0x4c8   :  { %1638 = vmatpush1.bf16.msra.mxu0 %v5405_v58  ;;  %1679 = vmatpush1.bf16.msra.mxu1 %v5411_v59 }
 0x4c9   :  { %1639 = vmatprep.subr.bf16.mxu0 %v5417_v17  ;;  %1680 = vmatprep.subr.bf16.mxu1 %v5423_v7 }
 0x4cc   :  { %1640 = vmatpush1.bf16.msra.mxu0 %v5429_v18  ;;  %1681 = vmatpush1.bf16.msra.mxu1 %v5435_v19 }
 0x4cd   :  { %1641 = vmatprep.subr.bf16.mxu0 %v5441_v20  ;;  %1682 = vmatprep.subr.bf16.mxu1 %v5447_v21 }
 0x4d0   :  { %1642 = vmatpush1.bf16.msra.mxu0 %v5453_v22  ;;  %1683 = vmatpush1.bf16.msra.mxu1 %v5459_v23  ;;  %v6606_v22 = vld [vmem:[#allocation46_spill] sm:$0xff] }
 0x4d1   :  { %1643 = vmatprep.subr.bf16.mxu0 %v5465_v24  ;;  %1684 = vmatprep.subr.bf16.mxu1 %v5471_v25 }
 0x4d4   :  { %1644 = vmatpush1.bf16.msra.mxu0 %v5477_v27  ;;  %1685 = vmatpush1.bf16.msra.mxu1 %v5483_v28  ;;  %v6604_v28 = vld [vmem:[#allocation44_spill] sm:$0xff] }
 0x4d5   :  { %1645 = vmatprep.subr.bf16.mxu0 %v5489_v29  ;;  %1686 = vmatprep.subr.bf16.mxu1 %v5495_v30  ;;  %v6603_v30 = vld [vmem:[#allocation43_spill] sm:$0xff] }
 0x4d8   :  { %1646 = vmatpush1.bf16.msra.mxu0 %v5501_v16  ;;  %1687 = vmatpush1.bf16.msra.mxu1 %v5507_v63  ;;  %v5525_v16 = vld [vmem:[%s6345_s4 + $0xe0] ss:$16 sps:$4 sm:$0xff]   ;;  %v5531_v63 = vld [vmem:[%s6345_s4 + $0xe8] ss:$16 sps:$4 sm:$0xff]  }
 0x4d9   :  { %1647 = vmatprep.subr.bf16.mxu0 %v5513_v15  ;;  %1688 = vmatprep.subr.bf16.mxu1 %v5519_v26  ;;  %6601 = vst [vmem:[#allocation36_spill] sm:$0xff] %v5525_v16  ;;  %6602 = vst [vmem:[#allocation37_spill] sm:$0xff] %v5531_v63 }
 0x4dc   :  { %1648 = vmatpush1.bf16.msra.mxu0 %v5525_v16  ;;  %1689 = vmatpush1.bf16.msra.mxu1 %v5531_v63  ;;  %v6605_v16 = vld [vmem:[#allocation45_spill] sm:$0xff] }
 0x4dd   :  { %1723 = vmatprep.subr.bf16.mxu0 %v6576_v41  ;;  %1764 = vmatprep.subr.bf16.mxu1 %v6577_v42 }
 0x592   :  { %v1556_v15 = vpop.f32.mrb[48].mxu0  ;;  %v1597_v26 = vpop.f32.mrb[48].mxu1 }
 0x593   :  { %v1604_v29 = vadd.f32 %v1556_v15, %v6603_v30  ;;  %v1606_v27 = vadd.f32 %v1597_v26, %v6604_v28  ;;  %v1558_v25 = vpop.f32.mrb[49].mxu0  ;;  %v1599_v24 = vpop.f32.mrb[49].mxu1  ;;  %v6613_v15 = vld [vmem:[#allocation10_spill] sm:$0xff]  ;;  %v6614_v26 = vld [vmem:[#allocation11_spill] sm:$0xff] }
 0x594   :  { %v1605_v23 = vadd.f32 %v1558_v25, %v6605_v16  ;;  %v1607_v21 = vadd.f32 %v1599_v24, %v6606_v22  ;;  %v1560_v20 = vpop.f32.mrb[50].mxu0  ;;  %v1601_v19 = vpop.f32.mrb[50].mxu1 }
 0x595   :  { %v3641_v18 = vmul.f32 -1.442695, %v1604_v29  ;;  %v1561_v63 = vpop.f32.mrb[51].mxu0  ;;  %v1602_v7 = vpop.f32.mrb[51].mxu1  ;;  %v6611_v29 = vld [vmem:[#allocation33_spill] sm:$0xff] }
 0x596   :  { %v3642_v41 = vmul.f32 -1.442695, %v1605_v23  ;;  %v3643_v42 = vmul.f32 -1.442695, %v1607_v21  ;;  %v6609_v21 = vld [vmem:[#allocation31_spill] sm:$0xff]  ;;  %v6612_v63 = vld [vmem:[#allocation34_spill] sm:$0xff] }
 0x597   :  { %4068 = vpow2.f32 %v3641_v18 }
 0x598   :  { %4070 = vpow2.f32 %v3642_v41 }
 0x599   :  { %4072 = vpow2.f32 %v3643_v42 }
 0x59a   :  { %4074 = vtanh.f32 %v1606_v27  ;;  %v6610_v27 = vld [vmem:[#allocation32_spill] sm:$0xff] }
 0x5a1   :  { %v4069_v17 = vpop.eup %4068 }
 0x5a2   :  { %v4071_v59 = vpop.eup %4070  ;;  %v1611_v30 = vadd.f32 1.0, %v4069_v17 }
 0x5a3   :  { %v1617_v28 = vadd.f32 1.0, %v4071_v59  ;;  %v4073_v25 = vpop.eup %4072  ;;  %v6608_v59 = vld [vmem:[#allocation7_spill] sm:$0xff] }
 0x5a4   :  { %4076 = vrcp.f32 %v1611_v30  ;;  %v4075_v16 = vpop.eup %4074  ;;  %v1624_v24 = vadd.f32 1.0, %v4073_v25  ;;  %v6615_v30 = vld [vmem:[#allocation12_spill] sm:$0xff]  ;;  %v6617_v25 = vld [vmem:[#allocation14_spill] sm:$0xff] }
 0x5a5   :  { %4078 = vrcp.f32 %v1617_v28  ;;  %v6616_v28 = vld [vmem:[#allocation13_spill] sm:$0xff] }
 0x5a6   :  { %4080 = vrcp.f32 %v1624_v24  ;;  %v6622_v24 = vld [vmem:[#allocation19_spill] sm:$0xff] }
 0x5ae   :  { %v4077_v22 = vpop.eup %4076 }
 0x5af   :  { %v4079_v20 = vpop.eup %4078  ;;  %v1628_v19 = vmul.f32 %v4077_v22, %v4075_v16  ;;  %v6618_v16 = vld [vmem:[#allocation15_spill] sm:$0xff]  ;;  %v6619_v22 = vld [vmem:[#allocation16_spill] sm:$0xff] }
 0x5b0   :  { %v1627_v7 = vmul.f32 %v4079_v20, %v5215_v10  ;;  %v4081_v41 = vpop.eup %4080  ;;  %v6607_v10 = vld [vmem:[#allocation6_spill] sm:$0xff]  ;;  %v6620_v20 = vld [vmem:[#allocation17_spill] sm:$0xff] }
 0x5b2   :  { %v5541_v23 = vadd.f32 %v1628_v19, %v1627_v7  ;;  %v6621_v19 = vld [vmem:[#allocation18_spill] sm:$0xff]  ;;  %v6623_v7 = vld [vmem:[#allocation20_spill] sm:$0xff] }
 0x5b4   :  { %4082 = vtanh.f32 %v5541_v23 }
 0x5be   :  { %v4083_v17 = vpop.eup %4082 }
 0x5bf   :  { %v1631_v42 = vmul.f32 %v4083_v17, %v4081_v41  ;;  %v6624_v41 = vld [vmem:[#allocation21_spill] sm:$0xff]  ;;  %v6625_v17 = vld [vmem:[#allocation35_spill] sm:$0xff] }
 0x5c1   :  { %v1632_v18 = vpack.c.bf16 %v1631_v42, %v1631_v42  ;;  %v6626_v42 = vld [vmem:[#allocation36_spill] sm:$0xff] }
 0x5c3   :  { %1666 = vmatmul.mubr.bf16.vlgmr.msra.gmra.mrb[52].mxu0 %v1632_v18  ;;  %1707 = vmatmul.mubr.bf16.vlgmr.msra.gmra.mrb[52].mxu1 %v1632_v18 }
 0x5c4   :  { %1724 = vmatpush1.bf16.msra.mxu0 %v5085_v60  ;;  %1765 = vmatpush1.bf16.msra.mxu1 %v5091_v61 }
 0x5c5   :  { %1725 = vmatprep.subr.bf16.mxu0 %v5097_v11  ;;  %1766 = vmatprep.subr.bf16.mxu1 %v5103_v35 }
 0x5c6   :  { %1755 = vmatprep.mubr.bf16.mxu0 %v6510_v0  ;;  %1796 = vmatprep.mubr.bf16.mxu1 %v6510_v0 }
 0x5c8   :  { %1726 = vmatpush1.bf16.msra.mxu0 %v5111_v8  ;;  %1767 = vmatpush1.bf16.msra.mxu1 %v5117_v14 }
 0x5c9   :  { %1727 = vmatprep.subr.bf16.mxu0 %v5123_v5  ;;  %1768 = vmatprep.subr.bf16.mxu1 %v5129_v44 }
 0x5cc   :  { %1728 = vmatpush1.bf16.msra.mxu0 %v5135_v9  ;;  %1769 = vmatpush1.bf16.msra.mxu1 %v5141_v4 }
 0x5cd   :  { %1729 = vmatprep.subr.bf16.mxu0 %v5147_v13  ;;  %1770 = vmatprep.subr.bf16.mxu1 %v5153_v1 }
 0x5d0   :  { %1730 = vmatpush1.bf16.msra.mxu0 %v5235_v2  ;;  %1771 = vmatpush1.bf16.msra.mxu1 %v5241_v62 }
 0x5d1   :  { %1731 = vmatprep.subr.bf16.mxu0 %v5247_v6  ;;  %1772 = vmatprep.subr.bf16.mxu1 %v5253_v3 }
 0x5d4   :  { %1732 = vmatpush1.bf16.msra.mxu0 %v5259_v12  ;;  %1773 = vmatpush1.bf16.msra.mxu1 %v5265_v31 }
 0x5d5   :  { %1733 = vmatprep.subr.bf16.mxu0 %v5271_v32  ;;  %1774 = vmatprep.subr.bf16.mxu1 %v5277_v33 }
 0x5d8   :  { %1734 = vmatpush1.bf16.msra.mxu0 %v5283_v34  ;;  %1775 = vmatpush1.bf16.msra.mxu1 %v5289_v36 }
 0x5d9   :  { %1735 = vmatprep.subr.bf16.mxu0 %v5295_v37  ;;  %1776 = vmatprep.subr.bf16.mxu1 %v5301_v38 }
 0x5dc   :  { %1736 = vmatpush1.bf16.msra.mxu0 %v5307_v39  ;;  %1777 = vmatpush1.bf16.msra.mxu1 %v5313_v40 }
 0x5dd   :  { %1737 = vmatprep.subr.bf16.mxu0 %v5319_v43  ;;  %1778 = vmatprep.subr.bf16.mxu1 %v5325_v45 }
 0x5e0   :  { %1738 = vmatpush1.bf16.msra.mxu0 %v5331_v46  ;;  %1779 = vmatpush1.bf16.msra.mxu1 %v5337_v47 }
 0x5e1   :  { %1834 = vmatprep.subr.bf16.mxu0 %v5343_v48  ;;  %1875 = vmatprep.subr.bf16.mxu1 %v5349_v49 }
 0x5e3   :  { %1756 = vmatmul.mubr.bf16.vlgmr.msra.gmra.mrb[56].mxu0 %v1632_v18  ;;  %1797 = vmatmul.mubr.bf16.vlgmr.msra.gmra.mrb[56].mxu1 %v1632_v18  ;;  %v6627_v18 = vld [vmem:[#allocation37_spill] sm:$0xff] }
 0x5e4   :  { %1835 = vmatpush1.bf16.msra.mxu0 %v5355_v50  ;;  %1876 = vmatpush1.bf16.msra.mxu1 %v5361_v51 }
 0x5e5   :  { %1836 = vmatprep.subr.bf16.mxu0 %v5367_v52  ;;  %1877 = vmatprep.subr.bf16.mxu1 %v5373_v53 }
 0x5e6   :  { %1866 = vmatprep.mubr.bf16.mxu0 %v6510_v0  ;;  %1907 = vmatprep.mubr.bf16.mxu1 %v6510_v0 }
 0x5e8   :  { %1837 = vmatpush1.bf16.msra.mxu0 %v5381_v54  ;;  %1878 = vmatpush1.bf16.msra.mxu1 %v5387_v55 }
 0x5e9   :  { %1838 = vmatprep.subr.bf16.mxu0 %v5393_v56  ;;  %1879 = vmatprep.subr.bf16.mxu1 %v5399_v57 }
 0x5ec   :  { %1839 = vmatpush1.bf16.msra.mxu0 %v5405_v58  ;;  %1880 = vmatpush1.bf16.msra.mxu1 %v6607_v10 }
 0x5ed   :  { %1840 = vmatprep.subr.bf16.mxu0 %v6608_v59  ;;  %1881 = vmatprep.subr.bf16.mxu1 %v6609_v21 }
 0x5f0   :  { %1841 = vmatpush1.bf16.msra.mxu0 %v6610_v27  ;;  %1882 = vmatpush1.bf16.msra.mxu1 %v6611_v29 }
 0x5f1   :  { %1842 = vmatprep.subr.bf16.mxu0 %v6612_v63  ;;  %1883 = vmatprep.subr.bf16.mxu1 %v6613_v15  ;;  %v6632_v15 = vld [vmem:[#allocation49_spill] sm:$0xff]  ;;  %v6633_v63 = vld [vmem:[#allocation50_spill] sm:$0xff] }
 0x5f4   :  { %1843 = vmatpush1.bf16.msra.mxu0 %v6614_v26  ;;  %1884 = vmatpush1.bf16.msra.mxu1 %v6615_v30  ;;  %v6631_v30 = vld [vmem:[#allocation48_spill] sm:$0xff] }
 0x5f5   :  { %1844 = vmatprep.subr.bf16.mxu0 %v6616_v28  ;;  %1885 = vmatprep.subr.bf16.mxu1 %v6617_v25  ;;  %v6628_v25 = vld [vmem:[#allocation8_spill] sm:$0xff]  ;;  %v6630_v28 = vld [vmem:[#allocation47_spill] sm:$0xff] }
 0x5f8   :  { %1845 = vmatpush1.bf16.msra.mxu0 %v6618_v16  ;;  %1886 = vmatpush1.bf16.msra.mxu1 %v6619_v22  ;;  %v6629_v16 = vld [vmem:[#allocation9_spill] sm:$0xff] }
 0x5f9   :  { %1846 = vmatprep.subr.bf16.mxu0 %v6620_v20  ;;  %1887 = vmatprep.subr.bf16.mxu1 %v6621_v19 }
 0x5fc   :  { %1847 = vmatpush1.bf16.msra.mxu0 %v6622_v24  ;;  %1888 = vmatpush1.bf16.msra.mxu1 %v6623_v7 }
 0x5fd   :  { %1848 = vmatprep.subr.bf16.mxu0 %v6624_v41  ;;  %1889 = vmatprep.subr.bf16.mxu1 %v6625_v17 }
 0x600   :  { %1849 = vmatpush1.bf16.msra.mxu0 %v6626_v42  ;;  %1890 = vmatpush1.bf16.msra.mxu1 %v6627_v18 }
 0x601   :  { %1924 = vmatprep.subr.bf16.mxu0 %v6628_v25  ;;  %1965 = vmatprep.subr.bf16.mxu1 %v6629_v16 }
 0x6b6   :  { %v1757_v22 = vpop.f32.mrb[56].mxu0  ;;  %v1798_v20 = vpop.f32.mrb[56].mxu1 }
 0x6b7   :  { %v1805_v19 = vadd.f32 %v1757_v22, %v6630_v28  ;;  %v1807_v24 = vadd.f32 %v1798_v20, %v6631_v30  ;;  %v1759_v26 = vpop.f32.mrb[57].mxu0  ;;  %v1800_v7 = vpop.f32.mrb[57].mxu1 }
 0x6b8   :  { %v1806_v41 = vadd.f32 %v1759_v26, %v6632_v15  ;;  %v1808_v17 = vadd.f32 %v1800_v7, %v6633_v63  ;;  %v1761_v29 = vpop.f32.mrb[58].mxu0  ;;  %v1802_v42 = vpop.f32.mrb[58].mxu1  ;;  %v6637_v7 = vld [vmem:[#allocation32_spill] sm:$0xff] }
 0x6b9   :  { %v3644_v27 = vmul.f32 -1.442695, %v1805_v19  ;;  %v1762_v18 = vpop.f32.mrb[59].mxu0  ;;  %v1803_v21 = vpop.f32.mrb[59].mxu1  ;;  %v6640_v42 = vld [vmem:[#allocation10_spill] sm:$0xff] }
 0x6ba   :  { %v3645_v25 = vmul.f32 -1.442695, %v1806_v41  ;;  %v3646_v16 = vmul.f32 -1.442695, %v1808_v17  ;;  %v6638_v41 = vld [vmem:[#allocation33_spill] sm:$0xff]  ;;  %v6639_v17 = vld [vmem:[#allocation34_spill] sm:$0xff] }
 0x6bb   :  { %4084 = vpow2.f32 %v3644_v27  ;;  %v6641_v18 = vld [vmem:[#allocation11_spill] sm:$0xff] }
 0x6bc   :  { %4086 = vpow2.f32 %v3645_v25 }
 0x6bd   :  { %4088 = vpow2.f32 %v3646_v16 }
 0x6be   :  { %4090 = vtanh.f32 %v1807_v24  ;;  %v6636_v24 = vld [vmem:[#allocation31_spill] sm:$0xff] }
 0x6c5   :  { %v4085_v59 = vpop.eup %4084 }
 0x6c6   :  { %v4087_v10 = vpop.eup %4086  ;;  %v1812_v28 = vadd.f32 1.0, %v4085_v59 }
 0x6c7   :  { %v1818_v30 = vadd.f32 1.0, %v4087_v10  ;;  %v4089_v15 = vpop.eup %4088  ;;  %v6635_v10 = vld [vmem:[#allocation7_spill] sm:$0xff] }
 0x6c8   :  { %4092 = vrcp.f32 %v1812_v28  ;;  %v4091_v26 = vpop.eup %4090  ;;  %v1825_v20 = vadd.f32 1.0, %v4089_v15  ;;  %v6642_v28 = vld [vmem:[#allocation12_spill] sm:$0xff]  ;;  %v6644_v15 = vld [vmem:[#allocation14_spill] sm:$0xff] }
 0x6c9   :  { %4094 = vrcp.f32 %v1818_v30  ;;  %v6643_v30 = vld [vmem:[#allocation13_spill] sm:$0xff] }
 0x6ca   :  { %4096 = vrcp.f32 %v1825_v20  ;;  %v6649_v20 = vld [vmem:[#allocation19_spill] sm:$0xff] }
 0x6d2   :  { %v4093_v63 = vpop.eup %4092 }
 0x6d3   :  { %v4095_v29 = vpop.eup %4094  ;;  %v1829_v22 = vmul.f32 %v4093_v63, %v4091_v26  ;;  %v6645_v26 = vld [vmem:[#allocation15_spill] sm:$0xff]  ;;  %v6646_v63 = vld [vmem:[#allocation16_spill] sm:$0xff] }
 0x6d4   :  { %v1828_v21 = vmul.f32 %v4095_v29, %v5541_v23  ;;  %v4097_v27 = vpop.eup %4096  ;;  %v6634_v23 = vld [vmem:[#allocation6_spill] sm:$0xff]  ;;  %v6647_v29 = vld [vmem:[#allocation17_spill] sm:$0xff] }
 0x6d6   :  { %v5617_v19 = vadd.f32 %v1829_v22, %v1828_v21  ;;  %v6648_v22 = vld [vmem:[#allocation18_spill] sm:$0xff]  ;;  %v6650_v21 = vld [vmem:[#allocation20_spill] sm:$0xff] }
 0x6d8   :  { %4098 = vtanh.f32 %v5617_v19 }
 0x6e2   :  { %v4099_v59 = vpop.eup %4098 }
 0x6e3   :  { %v1832_v25 = vmul.f32 %v4099_v59, %v4097_v27  ;;  %v6651_v27 = vld [vmem:[#allocation21_spill] sm:$0xff]  ;;  %v6652_v59 = vld [vmem:[#allocation35_spill] sm:$0xff] }
 0x6e5   :  { %v1833_v16 = vpack.c.bf16 %v1832_v25, %v1832_v25  ;;  %v6653_v25 = vld [vmem:[#allocation36_spill] sm:$0xff] }
 0x6e7   :  { %1867 = vmatmul.mubr.bf16.vlgmr.msra.gmra.mrb[60].mxu0 %v1833_v16  ;;  %1908 = vmatmul.mubr.bf16.vlgmr.msra.gmra.mrb[60].mxu1 %v1833_v16 }
 0x6e8   :  { %1925 = vmatpush1.bf16.msra.mxu0 %v5085_v60  ;;  %1966 = vmatpush1.bf16.msra.mxu1 %v5091_v61 }
 0x6e9   :  { %1926 = vmatprep.subr.bf16.mxu0 %v5097_v11  ;;  %1967 = vmatprep.subr.bf16.mxu1 %v5103_v35 }
 0x6ea   :  { %1956 = vmatprep.mubr.bf16.mxu0 %v6510_v0  ;;  %1997 = vmatprep.mubr.bf16.mxu1 %v6510_v0 }
 0x6ec   :  { %1927 = vmatpush1.bf16.msra.mxu0 %v5111_v8  ;;  %1968 = vmatpush1.bf16.msra.mxu1 %v5117_v14 }
 0x6ed   :  { %1928 = vmatprep.subr.bf16.mxu0 %v5123_v5  ;;  %1969 = vmatprep.subr.bf16.mxu1 %v5129_v44 }
 0x6f0   :  { %1929 = vmatpush1.bf16.msra.mxu0 %v5135_v9  ;;  %1970 = vmatpush1.bf16.msra.mxu1 %v5141_v4 }
 0x6f1   :  { %1930 = vmatprep.subr.bf16.mxu0 %v5147_v13  ;;  %1971 = vmatprep.subr.bf16.mxu1 %v5153_v1 }
 0x6f4   :  { %1931 = vmatpush1.bf16.msra.mxu0 %v5235_v2  ;;  %1972 = vmatpush1.bf16.msra.mxu1 %v5241_v62 }
 0x6f5   :  { %1932 = vmatprep.subr.bf16.mxu0 %v5247_v6  ;;  %1973 = vmatprep.subr.bf16.mxu1 %v5253_v3 }
 0x6f8   :  { %1933 = vmatpush1.bf16.msra.mxu0 %v5259_v12  ;;  %1974 = vmatpush1.bf16.msra.mxu1 %v5265_v31 }
 0x6f9   :  { %1934 = vmatprep.subr.bf16.mxu0 %v5271_v32  ;;  %1975 = vmatprep.subr.bf16.mxu1 %v5277_v33 }
 0x6fc   :  { %1935 = vmatpush1.bf16.msra.mxu0 %v5283_v34  ;;  %1976 = vmatpush1.bf16.msra.mxu1 %v5289_v36 }
 0x6fd   :  { %1936 = vmatprep.subr.bf16.mxu0 %v5295_v37  ;;  %1977 = vmatprep.subr.bf16.mxu1 %v5301_v38 }
 0x700   :  { %1937 = vmatpush1.bf16.msra.mxu0 %v5307_v39  ;;  %1978 = vmatpush1.bf16.msra.mxu1 %v5313_v40 }
 0x701   :  { %1938 = vmatprep.subr.bf16.mxu0 %v5319_v43  ;;  %1979 = vmatprep.subr.bf16.mxu1 %v5325_v45 }
 0x704   :  { %1939 = vmatpush1.bf16.msra.mxu0 %v5331_v46  ;;  %1980 = vmatpush1.bf16.msra.mxu1 %v5337_v47 }
 0x705   :  { %2035 = vmatprep.subr.bf16.mxu0 %v5343_v48  ;;  %2076 = vmatprep.subr.bf16.mxu1 %v5349_v49 }
 0x707   :  { %1957 = vmatmul.mubr.bf16.vlgmr.msra.gmra.mrb[64].mxu0 %v1833_v16  ;;  %1998 = vmatmul.mubr.bf16.vlgmr.msra.gmra.mrb[64].mxu1 %v1833_v16  ;;  %v6654_v16 = vld [vmem:[#allocation37_spill] sm:$0xff] }
 0x708   :  { %2036 = vmatpush1.bf16.msra.mxu0 %v5355_v50  ;;  %2077 = vmatpush1.bf16.msra.mxu1 %v5361_v51 }
 0x709   :  { %2037 = vmatprep.subr.bf16.mxu0 %v5367_v52  ;;  %2078 = vmatprep.subr.bf16.mxu1 %v5373_v53 }
 0x70a   :  { %2067 = vmatprep.mubr.bf16.mxu0 %v6510_v0  ;;  %2108 = vmatprep.mubr.bf16.mxu1 %v6510_v0 }
 0x70c   :  { %2038 = vmatpush1.bf16.msra.mxu0 %v5381_v54  ;;  %2079 = vmatpush1.bf16.msra.mxu1 %v5387_v55 }
 0x70d   :  { %2039 = vmatprep.subr.bf16.mxu0 %v5393_v56  ;;  %2080 = vmatprep.subr.bf16.mxu1 %v5399_v57 }
 0x710   :  { %2040 = vmatpush1.bf16.msra.mxu0 %v5405_v58  ;;  %2081 = vmatpush1.bf16.msra.mxu1 %v6634_v23 }
 0x711   :  { %2041 = vmatprep.subr.bf16.mxu0 %v6635_v10  ;;  %2082 = vmatprep.subr.bf16.mxu1 %v6636_v24 }
 0x714   :  { %2042 = vmatpush1.bf16.msra.mxu0 %v6637_v7  ;;  %2083 = vmatpush1.bf16.msra.mxu1 %v6638_v41 }
 0x715   :  { %2043 = vmatprep.subr.bf16.mxu0 %v6639_v17  ;;  %2084 = vmatprep.subr.bf16.mxu1 %v6640_v42  ;;  %v6659_v42 = vld [vmem:[#allocation53_spill] sm:$0xff]  ;;  %v6660_v17 = vld [vmem:[#allocation54_spill] sm:$0xff] }
 0x718   :  { %2044 = vmatpush1.bf16.msra.mxu0 %v6641_v18  ;;  %2085 = vmatpush1.bf16.msra.mxu1 %v6642_v28  ;;  %v6658_v28 = vld [vmem:[#allocation52_spill] sm:$0xff] }
 0x719   :  { %2045 = vmatprep.subr.bf16.mxu0 %v6643_v30  ;;  %2086 = vmatprep.subr.bf16.mxu1 %v6644_v15  ;;  %v6655_v15 = vld [vmem:[#allocation8_spill] sm:$0xff]  ;;  %v6657_v30 = vld [vmem:[#allocation51_spill] sm:$0xff] }
 0x71c   :  { %2046 = vmatpush1.bf16.msra.mxu0 %v6645_v26  ;;  %2087 = vmatpush1.bf16.msra.mxu1 %v6646_v63  ;;  %v6656_v26 = vld [vmem:[#allocation9_spill] sm:$0xff] }
 0x71d   :  { %2047 = vmatprep.subr.bf16.mxu0 %v6647_v29  ;;  %2088 = vmatprep.subr.bf16.mxu1 %v6648_v22 }
 0x720   :  { %2048 = vmatpush1.bf16.msra.mxu0 %v6649_v20  ;;  %2089 = vmatpush1.bf16.msra.mxu1 %v6650_v21 }
 0x721   :  { %2049 = vmatprep.subr.bf16.mxu0 %v6651_v27  ;;  %2090 = vmatprep.subr.bf16.mxu1 %v6652_v59 }
 0x724   :  { %2050 = vmatpush1.bf16.msra.mxu0 %v6653_v25  ;;  %2091 = vmatpush1.bf16.msra.mxu1 %v6654_v16 }
 0x725   :  { %2125 = vmatprep.subr.bf16.mxu0 %v6655_v15  ;;  %2166 = vmatprep.subr.bf16.mxu1 %v6656_v26 }
 0x7da   :  { %v1958_v63 = vpop.f32.mrb[64].mxu0  ;;  %v1999_v29 = vpop.f32.mrb[64].mxu1 }
 0x7db   :  { %v2006_v22 = vadd.f32 %v1958_v63, %v6657_v30  ;;  %v2008_v20 = vadd.f32 %v1999_v29, %v6658_v28  ;;  %v1960_v18 = vpop.f32.mrb[65].mxu0  ;;  %v2001_v21 = vpop.f32.mrb[65].mxu1 }
 0x7dc   :  { %v2007_v27 = vadd.f32 %v1960_v18, %v6659_v42  ;;  %v2009_v59 = vadd.f32 %v2001_v21, %v6660_v17  ;;  %v1962_v41 = vpop.f32.mrb[66].mxu0  ;;  %v2003_v25 = vpop.f32.mrb[66].mxu1 }
 0x7dd   :  { %v3647_v7 = vmul.f32 -1.442695, %v2006_v22  ;;  %v1963_v16 = vpop.f32.mrb[67].mxu0  ;;  %v2004_v24 = vpop.f32.mrb[67].mxu1 }
 0x7de   :  { %v3648_v15 = vmul.f32 -1.442695, %v2007_v27  ;;  %v3649_v26 = vmul.f32 -1.442695, %v2009_v59 }
 0x7df   :  { %4100 = vpow2.f32 %v3647_v7 }
 0x7e0   :  { %4102 = vpow2.f32 %v3648_v15 }
 0x7e1   :  { %4104 = vpow2.f32 %v3649_v26 }
 0x7e2   :  { %4106 = vtanh.f32 %v2008_v20 }
 0x7e9   :  { %v4101_v10 = vpop.eup %4100 }
 0x7ea   :  { %v4103_v23 = vpop.eup %4102  ;;  %v2013_v30 = vadd.f32 1.0, %v4101_v10 }
 0x7eb   :  { %v2019_v28 = vadd.f32 1.0, %v4103_v23  ;;  %v4105_v42 = vpop.eup %4104 }
 0x7ec   :  { %4108 = vrcp.f32 %v2013_v30  ;;  %v4107_v18 = vpop.eup %4106  ;;  %v2026_v29 = vadd.f32 1.0, %v4105_v42 }
 0x7ed   :  { %4110 = vrcp.f32 %v2019_v28 }
 0x7ee   :  { %4112 = vrcp.f32 %v2026_v29 }
 0x7f6   :  { %v4109_v17 = vpop.eup %4108 }
 0x7f7   :  { %v4111_v41 = vpop.eup %4110  ;;  %v2030_v63 = vmul.f32 %v4109_v17, %v4107_v18 }
 0x7f8   :  { %v2029_v24 = vmul.f32 %v4111_v41, %v5617_v19  ;;  %v4113_v7 = vpop.eup %4112 }
 0x7fa   :  { %v5693_v22 = vadd.f32 %v2030_v63, %v2029_v24  ;;  %v5782_v24 = vld [vmem:[%s6347_s5] ss:$16 sps:$4 sm:$0xff]  }
 0x7fc   :  { %4114 = vtanh.f32 %v5693_v22 }
 0x806   :  { %v4115_v10 = vpop.eup %4114 }
 0x807   :  { %v2033_v21 = vmul.f32 %v4115_v10, %v4113_v7  ;;  %v5787_v7 = vld [vmem:[%s6347_s5 + $0x8] ss:$16 sps:$4 sm:$0xff]  }
 0x809   :  { %v2034_v20 = vpack.c.bf16 %v2033_v21, %v2033_v21  ;;  %v5797_v21 = vld [vmem:[%s6347_s5 + $0x2c] ss:$16 sps:$4 sm:$0xff]  }
 0x80b   :  { %2068 = vmatmul.mubr.bf16.vlgmr.msra.gmra.mrb[68].mxu0 %v2034_v20  ;;  %2109 = vmatmul.mubr.bf16.vlgmr.msra.gmra.mrb[68].mxu1 %v2034_v20 }
 0x80c   :  { %2126 = vmatpush1.bf16.msra.mxu0 %v5085_v60  ;;  %2167 = vmatpush1.bf16.msra.mxu1 %v5091_v61  ;;  %v6661_v60 = vld [vmem:[#allocation6_spill] sm:$0xff]  ;;  %v6662_v61 = vld [vmem:[#allocation7_spill] sm:$0xff] }
 0x80d   :  { %2127 = vmatprep.subr.bf16.mxu0 %v5097_v11  ;;  %2168 = vmatprep.subr.bf16.mxu1 %v5103_v35  ;;  %v6663_v11 = vld [vmem:[#allocation31_spill] sm:$0xff]  ;;  %v6664_v35 = vld [vmem:[#allocation32_spill] sm:$0xff] }
 0x80e   :  { %2157 = vmatprep.mubr.bf16.mxu0 %v6510_v0  ;;  %2198 = vmatprep.mubr.bf16.mxu1 %v6510_v0 }
 0x810   :  { %2128 = vmatpush1.bf16.msra.mxu0 %v5111_v8  ;;  %2169 = vmatpush1.bf16.msra.mxu1 %v5117_v14  ;;  %v6665_v8 = vld [vmem:[#allocation33_spill] sm:$0xff]  ;;  %v6666_v14 = vld [vmem:[#allocation34_spill] sm:$0xff] }
 0x811   :  { %2129 = vmatprep.subr.bf16.mxu0 %v5123_v5  ;;  %2170 = vmatprep.subr.bf16.mxu1 %v5129_v44  ;;  %v6667_v5 = vld [vmem:[#allocation10_spill] sm:$0xff]  ;;  %v6668_v44 = vld [vmem:[#allocation11_spill] sm:$0xff] }
 0x814   :  { %2130 = vmatpush1.bf16.msra.mxu0 %v5135_v9  ;;  %2171 = vmatpush1.bf16.msra.mxu1 %v5141_v4  ;;  %v6669_v9 = vld [vmem:[#allocation12_spill] sm:$0xff]  ;;  %v6670_v4 = vld [vmem:[#allocation13_spill] sm:$0xff] }
 0x815   :  { %2131 = vmatprep.subr.bf16.mxu0 %v5147_v13  ;;  %2172 = vmatprep.subr.bf16.mxu1 %v5153_v1  ;;  %v6671_v13 = vld [vmem:[#allocation14_spill] sm:$0xff]  ;;  %v6672_v1 = vld [vmem:[#allocation15_spill] sm:$0xff] }
 0x818   :  { %2132 = vmatpush1.bf16.msra.mxu0 %v5235_v2  ;;  %2173 = vmatpush1.bf16.msra.mxu1 %v5241_v62  ;;  %v6673_v2 = vld [vmem:[#allocation16_spill] sm:$0xff]  ;;  %v6674_v62 = vld [vmem:[#allocation17_spill] sm:$0xff] }
 0x819   :  { %2133 = vmatprep.subr.bf16.mxu0 %v5247_v6  ;;  %2174 = vmatprep.subr.bf16.mxu1 %v5253_v3  ;;  %v6675_v6 = vld [vmem:[#allocation18_spill] sm:$0xff]  ;;  %v6676_v3 = vld [vmem:[#allocation19_spill] sm:$0xff] }
 0x81c   :  { %2134 = vmatpush1.bf16.msra.mxu0 %v5259_v12  ;;  %2175 = vmatpush1.bf16.msra.mxu1 %v5265_v31  ;;  %v6677_v12 = vld [vmem:[#allocation20_spill] sm:$0xff]  ;;  %v6678_v31 = vld [vmem:[#allocation21_spill] sm:$0xff] }
 0x81d   :  { %2135 = vmatprep.subr.bf16.mxu0 %v5271_v32  ;;  %2176 = vmatprep.subr.bf16.mxu1 %v5277_v33  ;;  %v6679_v32 = vld [vmem:[#allocation35_spill] sm:$0xff]  ;;  %v6680_v33 = vld [vmem:[#allocation36_spill] sm:$0xff] }
 0x820   :  { %2136 = vmatpush1.bf16.msra.mxu0 %v5283_v34  ;;  %2177 = vmatpush1.bf16.msra.mxu1 %v5289_v36  ;;  %v6681_v34 = vld [vmem:[#allocation37_spill] sm:$0xff] }
 0x821   :  { %2137 = vmatprep.subr.bf16.mxu0 %v5295_v37  ;;  %2178 = vmatprep.subr.bf16.mxu1 %v5301_v38  ;;  %v5765_v36 = vld [vmem:[%s6347_s5 + $0x4] ss:$16 sps:$4 sm:$0xff]   ;;  %v5770_v37 = vld [vmem:[%s6347_s5 + $0xc] ss:$16 sps:$4 sm:$0xff]  }
 0x824   :  { %2138 = vmatpush1.bf16.msra.mxu0 %v5307_v39  ;;  %2179 = vmatpush1.bf16.msra.mxu1 %v5313_v40  ;;  %v6682_v40 = vld [vmem:[#allocation55_spill] sm:$0xff] }
 0x825   :  { %2139 = vmatprep.subr.bf16.mxu0 %v5319_v43  ;;  %2180 = vmatprep.subr.bf16.mxu1 %v5325_v45  ;;  %v6683_v45 = vld [vmem:[#allocation56_spill] sm:$0xff] }
 0x828   :  { %2140 = vmatpush1.bf16.msra.mxu0 %v5331_v46  ;;  %2181 = vmatpush1.bf16.msra.mxu1 %v5337_v47 }
 0x829   :  { %2236 = vmatprep.subr.bf16.mxu0 %v5343_v48  ;;  %2277 = vmatprep.subr.bf16.mxu1 %v5349_v49  ;;  %v6684_v49 = vld [vmem:[#allocation57_spill] sm:$0xff] }
 0x82b   :  { %2158 = vmatmul.mubr.bf16.vlgmr.msra.gmra.mrb[72].mxu0 %v2034_v20  ;;  %2199 = vmatmul.mubr.bf16.vlgmr.msra.gmra.mrb[72].mxu1 %v2034_v20  ;;  %v5804_v20 = vld [vmem:[%s6347_s5 + $0x20] ss:$16 sps:$4 sm:$0xff]  }
 0x82c   :  { %2237 = vmatpush1.bf16.msra.mxu0 %v5355_v50  ;;  %2278 = vmatpush1.bf16.msra.mxu1 %v5361_v51  ;;  %v6685_v51 = vld [vmem:[#allocation58_spill] sm:$0xff] }
 0x82d   :  { %2238 = vmatprep.subr.bf16.mxu0 %v5367_v52  ;;  %2279 = vmatprep.subr.bf16.mxu1 %v5373_v53 }
 0x82e   :  { %2268 = vmatprep.mubr.bf16.mxu0 %v6510_v0  ;;  %2309 = vmatprep.mubr.bf16.mxu1 %v6510_v0 }
 0x830   :  { %2239 = vmatpush1.bf16.msra.mxu0 %v5381_v54  ;;  %2280 = vmatpush1.bf16.msra.mxu1 %v5387_v55 }
 0x831   :  { %2240 = vmatprep.subr.bf16.mxu0 %v5393_v56  ;;  %2281 = vmatprep.subr.bf16.mxu1 %v5399_v57 }
 0x834   :  { %2241 = vmatpush1.bf16.msra.mxu0 %v5405_v58  ;;  %2282 = vmatpush1.bf16.msra.mxu1 %v6661_v60  ;;  %v5809_v60 = vld [vmem:[%s6347_s5 + $0x28] ss:$16 sps:$4 sm:$0xff]  }
 0x835   :  { %2242 = vmatprep.subr.bf16.mxu0 %v6662_v61  ;;  %2283 = vmatprep.subr.bf16.mxu1 %v6663_v11  ;;  %v5816_v61 = vld [vmem:[%s6347_s5 + $0x44] ss:$16 sps:$4 sm:$0xff]   ;;  %v5821_v11 = vld [vmem:[%s6347_s5 + $0x4c] ss:$16 sps:$4 sm:$0xff]  }
 0x838   :  { %2243 = vmatpush1.bf16.msra.mxu0 %v6664_v35  ;;  %2284 = vmatpush1.bf16.msra.mxu1 %v6665_v8  ;;  %v5830_v35 = vld [vmem:[%s6347_s5 + $0x40] ss:$16 sps:$4 sm:$0xff]   ;;  %v5835_v8 = vld [vmem:[%s6347_s5 + $0x48] ss:$16 sps:$4 sm:$0xff]  }
 0x839   :  { %2244 = vmatprep.subr.bf16.mxu0 %v6666_v14  ;;  %2285 = vmatprep.subr.bf16.mxu1 %v6667_v5  ;;  %v5842_v14 = vld [vmem:[%s6347_s5 + $0x64] ss:$16 sps:$4 sm:$0xff]   ;;  %v5847_v5 = vld [vmem:[%s6347_s5 + $0x6c] ss:$16 sps:$4 sm:$0xff]  }
 0x83c   :  { %2245 = vmatpush1.bf16.msra.mxu0 %v6668_v44  ;;  %2286 = vmatpush1.bf16.msra.mxu1 %v6669_v9  ;;  %v5854_v44 = vld [vmem:[%s6347_s5 + $0x60] ss:$16 sps:$4 sm:$0xff]   ;;  %v5859_v9 = vld [vmem:[%s6347_s5 + $0x68] ss:$16 sps:$4 sm:$0xff]  }
 0x83d   :  { %2246 = vmatprep.subr.bf16.mxu0 %v6670_v4  ;;  %2287 = vmatprep.subr.bf16.mxu1 %v6671_v13  ;;  %v5866_v4 = vld [vmem:[%s6347_s5 + $0x84] ss:$16 sps:$4 sm:$0xff]   ;;  %v5871_v13 = vld [vmem:[%s6347_s5 + $0x8c] ss:$16 sps:$4 sm:$0xff]  }
 0x840   :  { %2247 = vmatpush1.bf16.msra.mxu0 %v6672_v1  ;;  %2288 = vmatpush1.bf16.msra.mxu1 %v6673_v2  ;;  %v5878_v1 = vld [vmem:[%s6347_s5 + $0x80] ss:$16 sps:$4 sm:$0xff]   ;;  %v5883_v2 = vld [vmem:[%s6347_s5 + $0x88] ss:$16 sps:$4 sm:$0xff]  }
 0x841   :  { %2248 = vmatprep.subr.bf16.mxu0 %v6674_v62  ;;  %2289 = vmatprep.subr.bf16.mxu1 %v6675_v6  ;;  %v5890_v62 = vld [vmem:[%s6347_s5 + $0xa4] ss:$16 sps:$4 sm:$0xff]   ;;  %v5895_v6 = vld [vmem:[%s6347_s5 + $0xac] ss:$16 sps:$4 sm:$0xff]  }
 0x844   :  { %2249 = vmatpush1.bf16.msra.mxu0 %v6676_v3  ;;  %2290 = vmatpush1.bf16.msra.mxu1 %v6677_v12  ;;  %v5902_v3 = vld [vmem:[%s6347_s5 + $0xa0] ss:$16 sps:$4 sm:$0xff]   ;;  %v5907_v12 = vld [vmem:[%s6347_s5 + $0xa8] ss:$16 sps:$4 sm:$0xff]  }
 0x845   :  { %2250 = vmatprep.subr.bf16.mxu0 %v6678_v31  ;;  %2291 = vmatprep.subr.bf16.mxu1 %v6679_v32  ;;  %v5914_v31 = vld [vmem:[%s6347_s5 + $0xc4] ss:$16 sps:$4 sm:$0xff]   ;;  %v5919_v32 = vld [vmem:[%s6347_s5 + $0xcc] ss:$16 sps:$4 sm:$0xff]  }
 0x848   :  { %2251 = vmatpush1.bf16.msra.mxu0 %v6680_v33  ;;  %2292 = vmatpush1.bf16.msra.mxu1 %v6681_v34  ;;  %v5926_v33 = vld [vmem:[%s6347_s5 + $0xc0] ss:$16 sps:$4 sm:$0xff]   ;;  %v5931_v34 = vld [vmem:[%s6347_s5 + $0xc8] ss:$16 sps:$4 sm:$0xff]  }
 0x849   :  { %2518 = vmatprep.subr.bf16.mxu0 %v5765_v36  ;;  %2559 = vmatprep.subr.bf16.mxu1 %v5770_v37 }
 0x8fe   :  { %v2159_v38 = vpop.f32.mrb[72].mxu0  ;;  %v2200_v39 = vpop.f32.mrb[72].mxu1 }
 0x8ff   :  { %v2207_v43 = vadd.f32 %v2159_v38, %v6682_v40  ;;  %v2209_v46 = vadd.f32 %v2200_v39, %v6683_v45  ;;  %v2161_v47 = vpop.f32.mrb[73].mxu0  ;;  %v2202_v48 = vpop.f32.mrb[73].mxu1  ;;  %v5938_v38 = vld [vmem:[%s6347_s5 + $0xe4] ss:$16 sps:$4 sm:$0xff]   ;;  %v5943_v39 = vld [vmem:[%s6347_s5 + $0xec] ss:$16 sps:$4 sm:$0xff]  }
 0x900   :  { %v2208_v50 = vadd.f32 %v2161_v47, %v6684_v49  ;;  %v2210_v52 = vadd.f32 %v2202_v48, %v6685_v51  ;;  %v2163_v53 = vpop.f32.mrb[74].mxu0  ;;  %v2204_v54 = vpop.f32.mrb[74].mxu1  ;;  %v5950_v40 = vld [vmem:[%s6347_s5 + $0xe0] ss:$16 sps:$4 sm:$0xff]  }
 0x901   :  { %v3650_v55 = vmul.f32 -1.442695, %v2207_v43  ;;  %v2164_v56 = vpop.f32.mrb[75].mxu0  ;;  %v2205_v57 = vpop.f32.mrb[75].mxu1  ;;  %v5955_v43 = vld [vmem:[%s6347_s5 + $0xe8] ss:$16 sps:$4 sm:$0xff]  }
 0x902   :  { %v3651_v58 = vmul.f32 -1.442695, %v2208_v50  ;;  %v3652_v19 = vmul.f32 -1.442695, %v2210_v52  ;;  %v372_v45 = vld [vmem:[%s6348_s6] sm:$0xf] }
 0x903   :  { %4116 = vpow2.f32 %v3650_v55 }
 0x904   :  { %4118 = vpow2.f32 %v3651_v58 }
 0x905   :  { %4120 = vpow2.f32 %v3652_v19 }
 0x906   :  { %4122 = vtanh.f32 %v2209_v46  ;;  %v6686_v46 = vld [vmem:[#allocation5_spill] sm:$0xff] }
 0x907   :  { %v6687_v47 = vsub.s32 0, %v6686_v46  ;;  %v6688_v49 = vsub.s32 1, %v6686_v46 }
 0x909   :  { %v6004_v48 = vrot.slane %v372_v45, %v6687_v47  ;;  %v6008_v50 = vrot.slane %v372_v45, %v6688_v49 }
 0x90d   :  { %v4117_v23 = vpop.eup %4116 }
 0x90e   :  { %v4119_v27 = vpop.eup %4118  ;;  %v2214_v59 = vadd.f32 1.0, %v4117_v23 }
 0x90f   :  { %v2220_v25 = vadd.f32 1.0, %v4119_v27  ;;  %v4121_v16 = vpop.eup %4120 }
 0x910   :  { %4124 = vrcp.f32 %v2214_v59  ;;  %v4123_v15 = vpop.eup %4122  ;;  %v2227_v42 = vadd.f32 1.0, %v4121_v16 }
 0x911   :  { %4126 = vrcp.f32 %v2220_v25  ;;  %v6689_v25 = vsub.s32 3, %v6686_v46 }
 0x912   :  { %4128 = vrcp.f32 %v2227_v42 }
 0x913   :  { %v6014_v16 = vrot.slane %v372_v45, %v6689_v25 }
 0x91a   :  { %v4125_v26 = vpop.eup %4124 }
 0x91b   :  { %v4127_v30 = vpop.eup %4126  ;;  %v2231_v28 = vmul.f32 %v4125_v26, %v4123_v15  ;;  %v6690_v26 = vsub.s32 2, %v6686_v46 }
 0x91c   :  { %v2230_v18 = vmul.f32 %v4127_v30, %v5693_v22  ;;  %v4129_v41 = vpop.eup %4128  ;;  %v5792_v22 = vld [vmem:[%s6347_s5 + $0x24] ss:$16 sps:$4 sm:$0xff]  }
 0x91d   :  { %v6019_v30 = vrot.slane %v372_v45, %v6690_v26 }
 0x91e   :  { %v2232_v17 = vadd.f32 %v2231_v28, %v2230_v18 }
 0x920   :  { %4130 = vtanh.f32 %v2232_v17 }
 0x92a   :  { %v4131_v63 = vpop.eup %4130 }
 0x92b   :  { %v2234_v29 = vmul.f32 %v4131_v63, %v4129_v41 }
 0x92d   :  { %v2235_v10 = vpack.c.bf16 %v2234_v29, %v2234_v29 }
 0x92f   :  { %2269 = vmatmul.mubr.bf16.vlgmr.msra.gmra.mrb[76].mxu0 %v2235_v10  ;;  %2310 = vmatmul.mubr.bf16.vlgmr.msra.gmra.mrb[76].mxu1 %v2235_v10 }
 0x930   :  { %2519 = vmatpush1.bf16.msra.mxu0 %v5782_v24  ;;  %2560 = vmatpush1.bf16.msra.mxu1 %v5787_v7 }
 0x931   :  { %2520 = vmatprep.subr.bf16.mxu0 %v5792_v22  ;;  %2561 = vmatprep.subr.bf16.mxu1 %v5797_v21 }
 0x932   :  { %2550 = vmatprep.mubr.bf16.mxu0 %v6510_v0  ;;  %2591 = vmatprep.mubr.bf16.mxu1 %v6510_v0 }
 0x934   :  { %2521 = vmatpush1.bf16.msra.mxu0 %v5804_v20  ;;  %2562 = vmatpush1.bf16.msra.mxu1 %v5809_v60 }
 0x935   :  { %2522 = vmatprep.subr.bf16.mxu0 %v5816_v61  ;;  %2563 = vmatprep.subr.bf16.mxu1 %v5821_v11 }
 0x938   :  { %2523 = vmatpush1.bf16.msra.mxu0 %v5830_v35  ;;  %2564 = vmatpush1.bf16.msra.mxu1 %v5835_v8 }
 0x939   :  { %2524 = vmatprep.subr.bf16.mxu0 %v5842_v14  ;;  %2565 = vmatprep.subr.bf16.mxu1 %v5847_v5 }
 0x93c   :  { %2525 = vmatpush1.bf16.msra.mxu0 %v5854_v44  ;;  %2566 = vmatpush1.bf16.msra.mxu1 %v5859_v9 }
 0x93d   :  { %2526 = vmatprep.subr.bf16.mxu0 %v5866_v4  ;;  %2567 = vmatprep.subr.bf16.mxu1 %v5871_v13 }
 0x940   :  { %2527 = vmatpush1.bf16.msra.mxu0 %v5878_v1  ;;  %2568 = vmatpush1.bf16.msra.mxu1 %v5883_v2 }
 0x941   :  { %2528 = vmatprep.subr.bf16.mxu0 %v5890_v62  ;;  %2569 = vmatprep.subr.bf16.mxu1 %v5895_v6 }
 0x944   :  { %2529 = vmatpush1.bf16.msra.mxu0 %v5902_v3  ;;  %2570 = vmatpush1.bf16.msra.mxu1 %v5907_v12 }
 0x945   :  { %2530 = vmatprep.subr.bf16.mxu0 %v5914_v31  ;;  %2571 = vmatprep.subr.bf16.mxu1 %v5919_v32 }
 0x948   :  { %2531 = vmatpush1.bf16.msra.mxu0 %v5926_v33  ;;  %2572 = vmatpush1.bf16.msra.mxu1 %v5931_v34 }
 0x949   :  { %2532 = vmatprep.subr.bf16.mxu0 %v5938_v38  ;;  %2573 = vmatprep.subr.bf16.mxu1 %v5943_v39 }
 0x94c   :  { %2533 = vmatpush1.bf16.msra.mxu0 %v5950_v40  ;;  %2574 = vmatpush1.bf16.msra.mxu1 %v5955_v43 }
 0x94d   :  { %2633 = vmatprep.subr.bf16.mxu0 %v5765_v36  ;;  %2674 = vmatprep.subr.bf16.mxu1 %v5770_v37 }
 0x94f   :  { %2551 = vmatmul.mubr.bf16.vlgmr.msra.gmra.mrb[20].mxu0 %v6510_v0  ;;  %2592 = vmatmul.mubr.bf16.vlgmr.msra.gmra.mrb[20].mxu1 %v6510_v0 }
 0x950   :  { %2634 = vmatpush1.bf16.msra.mxu0 %v5782_v24  ;;  %2675 = vmatpush1.bf16.msra.mxu1 %v5787_v7 }
 0x951   :  { %2635 = vmatprep.subr.bf16.mxu0 %v5792_v22  ;;  %2676 = vmatprep.subr.bf16.mxu1 %v5797_v21 }
 0x952   :  { %2665 = vmatprep.mubr.bf16.mxu0 %v6510_v0  ;;  %2706 = vmatprep.mubr.bf16.mxu1 %v6510_v0 }
 0x954   :  { %2636 = vmatpush1.bf16.msra.mxu0 %v5804_v20  ;;  %2677 = vmatpush1.bf16.msra.mxu1 %v5809_v60 }
 0x955   :  { %2637 = vmatprep.subr.bf16.mxu0 %v5816_v61  ;;  %2678 = vmatprep.subr.bf16.mxu1 %v5821_v11 }
 0x958   :  { %2638 = vmatpush1.bf16.msra.mxu0 %v5830_v35  ;;  %2679 = vmatpush1.bf16.msra.mxu1 %v5835_v8 }
 0x959   :  { %2639 = vmatprep.subr.bf16.mxu0 %v5842_v14  ;;  %2680 = vmatprep.subr.bf16.mxu1 %v5847_v5 }
 0x95c   :  { %2640 = vmatpush1.bf16.msra.mxu0 %v5854_v44  ;;  %2681 = vmatpush1.bf16.msra.mxu1 %v5859_v9 }
 0x95d   :  { %2641 = vmatprep.subr.bf16.mxu0 %v5866_v4  ;;  %2682 = vmatprep.subr.bf16.mxu1 %v5871_v13 }
 0x960   :  { %2642 = vmatpush1.bf16.msra.mxu0 %v5878_v1  ;;  %2683 = vmatpush1.bf16.msra.mxu1 %v5883_v2 }
 0x961   :  { %2643 = vmatprep.subr.bf16.mxu0 %v5890_v62  ;;  %2684 = vmatprep.subr.bf16.mxu1 %v5895_v6 }
 0x964   :  { %2644 = vmatpush1.bf16.msra.mxu0 %v5902_v3  ;;  %2685 = vmatpush1.bf16.msra.mxu1 %v5907_v12 }
 0x965   :  { %2645 = vmatprep.subr.bf16.mxu0 %v5914_v31  ;;  %2686 = vmatprep.subr.bf16.mxu1 %v5919_v32 }
 0x968   :  { %2646 = vmatpush1.bf16.msra.mxu0 %v5926_v33  ;;  %2687 = vmatpush1.bf16.msra.mxu1 %v5931_v34 }
 0x969   :  { %2647 = vmatprep.subr.bf16.mxu0 %v5938_v38  ;;  %2688 = vmatprep.subr.bf16.mxu1 %v5943_v39 }
 0x96c   :  { %2648 = vmatpush1.bf16.msra.mxu0 %v5950_v40  ;;  %2689 = vmatpush1.bf16.msra.mxu1 %v5955_v43 }
 0x96d   :  { %2748 = vmatprep.subr.bf16.mxu0 %v5765_v36  ;;  %2789 = vmatprep.subr.bf16.mxu1 %v5770_v37 }
 0xa22   :  { %v2552_v51 = vpop.f32.mrb[20].mxu0  ;;  %v2593_v52 = vpop.f32.mrb[20].mxu1 }
 0xa23   :  { %v3747_v53 = vadd.f32 %v2552_v51, %v6004_v48  ;;  %v2554_v54 = vpop.f32.mrb[21].mxu0  ;;  %v2595_v55 = vpop.f32.mrb[21].mxu1  ;;  %v3749_v42 = vadd.f32 %v2593_v52, %v6019_v30 }
 0xa24   :  { %v3748_v56 = vadd.f32 %v2554_v54, %v6008_v50  ;;  %v2556_v57 = vpop.f32.mrb[22].mxu0  ;;  %v2597_v58 = vpop.f32.mrb[22].mxu1  ;;  %v3750_v15 = vadd.f32 %v2595_v55, %v6014_v16 }
 0xa25   :  { %v3685_v19 = vmul.f32 -1.442695, %v3747_v53  ;;  %v2557_v23 = vpop.f32.mrb[23].mxu0  ;;  %v2598_v27 = vpop.f32.mrb[23].mxu1 }
 0xa26   :  { %v3686_v59 = vmul.f32 -1.442695, %v3748_v56  ;;  %v3687_v28 = vmul.f32 -1.442695, %v3750_v15 }
 0xa27   :  { %4132 = vpow2.f32 %v3685_v19 }
 0xa28   :  { %4134 = vpow2.f32 %v3686_v59 }
 0xa29   :  { %4136 = vpow2.f32 %v3687_v28 }
 0xa2a   :  { %4138 = vtanh.f32 %v3749_v42 }
 0xa31   :  { %v4133_v18 = vpop.eup %4132 }
 0xa32   :  { %v4135_v17 = vpop.eup %4134  ;;  %v2607_v41 = vadd.f32 1.0, %v4133_v18 }
 0xa33   :  { %v2613_v63 = vadd.f32 1.0, %v4135_v17  ;;  %v4137_v29 = vpop.eup %4136 }
 0xa34   :  { %4140 = vrcp.f32 %v2607_v41  ;;  %v4139_v10 = vpop.eup %4138  ;;  %v2620_v53 = vadd.f32 1.0, %v4137_v29 }
 0xa35   :  { %4142 = vrcp.f32 %v2613_v63 }
 0xa36   :  { %4144 = vrcp.f32 %v2620_v53 }
 0xa3e   :  { %v4141_v47 = vpop.eup %4140 }
 0xa3f   :  { %v4143_v49 = vpop.eup %4142  ;;  %v2624_v51 = vmul.f32 %v4141_v47, %v4139_v10 }
 0xa40   :  { %v2623_v46 = vmul.f32 0.0, %v4143_v49  ;;  %v4145_v52 = vpop.eup %4144 }
 0xa42   :  { %v6022_v45 = vadd.f32 %v2624_v51, %v2623_v46 }
 0xa44   :  { %4146 = vtanh.f32 %v6022_v45 }
 0xa4e   :  { %v4147_v54 = vpop.eup %4146 }
 0xa4f   :  { %v2627_v55 = vmul.f32 %v4147_v54, %v4145_v52 }
 0xa51   :  { %v2632_v56 = vpack.c.bf16 %v2627_v55, %v2627_v55 }
 0xa53   :  { %2666 = vmatmul.mubr.bf16.vlgmr.msra.gmra.mrb[28].mxu0 %v2632_v56  ;;  %2707 = vmatmul.mubr.bf16.vlgmr.msra.gmra.mrb[28].mxu1 %v2632_v56 }
 0xa54   :  { %2749 = vmatpush1.bf16.msra.mxu0 %v5782_v24  ;;  %2790 = vmatpush1.bf16.msra.mxu1 %v5787_v7 }
 0xa55   :  { %2750 = vmatprep.subr.bf16.mxu0 %v5792_v22  ;;  %2791 = vmatprep.subr.bf16.mxu1 %v5797_v21 }
 0xa56   :  { %2780 = vmatprep.mubr.bf16.mxu0 %v6510_v0  ;;  %2821 = vmatprep.mubr.bf16.mxu1 %v6510_v0 }
 0xa58   :  { %2751 = vmatpush1.bf16.msra.mxu0 %v5804_v20  ;;  %2792 = vmatpush1.bf16.msra.mxu1 %v5809_v60 }
 0xa59   :  { %2752 = vmatprep.subr.bf16.mxu0 %v5816_v61  ;;  %2793 = vmatprep.subr.bf16.mxu1 %v5821_v11 }
 0xa5c   :  { %2753 = vmatpush1.bf16.msra.mxu0 %v5830_v35  ;;  %2794 = vmatpush1.bf16.msra.mxu1 %v5835_v8 }
 0xa5d   :  { %2754 = vmatprep.subr.bf16.mxu0 %v5842_v14  ;;  %2795 = vmatprep.subr.bf16.mxu1 %v5847_v5 }
 0xa60   :  { %2755 = vmatpush1.bf16.msra.mxu0 %v5854_v44  ;;  %2796 = vmatpush1.bf16.msra.mxu1 %v5859_v9 }
 0xa61   :  { %2756 = vmatprep.subr.bf16.mxu0 %v5866_v4  ;;  %2797 = vmatprep.subr.bf16.mxu1 %v5871_v13 }
 0xa64   :  { %2757 = vmatpush1.bf16.msra.mxu0 %v5878_v1  ;;  %2798 = vmatpush1.bf16.msra.mxu1 %v5883_v2 }
 0xa65   :  { %2758 = vmatprep.subr.bf16.mxu0 %v5890_v62  ;;  %2799 = vmatprep.subr.bf16.mxu1 %v5895_v6 }
 0xa68   :  { %2759 = vmatpush1.bf16.msra.mxu0 %v5902_v3  ;;  %2800 = vmatpush1.bf16.msra.mxu1 %v5907_v12 }
 0xa69   :  { %2760 = vmatprep.subr.bf16.mxu0 %v5914_v31  ;;  %2801 = vmatprep.subr.bf16.mxu1 %v5919_v32 }
 0xa6c   :  { %2761 = vmatpush1.bf16.msra.mxu0 %v5926_v33  ;;  %2802 = vmatpush1.bf16.msra.mxu1 %v5931_v34 }
 0xa6d   :  { %2762 = vmatprep.subr.bf16.mxu0 %v5938_v38  ;;  %2803 = vmatprep.subr.bf16.mxu1 %v5943_v39 }
 0xa70   :  { %2763 = vmatpush1.bf16.msra.mxu0 %v5950_v40  ;;  %2804 = vmatpush1.bf16.msra.mxu1 %v5955_v43 }
 0xa71   :  { %2863 = vmatprep.subr.bf16.mxu0 %v5765_v36  ;;  %2904 = vmatprep.subr.bf16.mxu1 %v5770_v37 }
 0xb26   :  { %v2667_v57 = vpop.f32.mrb[28].mxu0  ;;  %v2708_v58 = vpop.f32.mrb[28].mxu1 }
 0xb27   :  { %v3751_v19 = vadd.f32 %v2667_v57, %v6004_v48  ;;  %v2669_v23 = vpop.f32.mrb[29].mxu0  ;;  %v2710_v27 = vpop.f32.mrb[29].mxu1  ;;  %v3753_v63 = vadd.f32 %v2708_v58, %v6019_v30 }
 0xb28   :  { %v3752_v59 = vadd.f32 %v2669_v23, %v6008_v50  ;;  %v2671_v25 = vpop.f32.mrb[30].mxu0  ;;  %v2712_v15 = vpop.f32.mrb[30].mxu1  ;;  %v3754_v17 = vadd.f32 %v2710_v27, %v6014_v16 }
 0xb29   :  { %v3688_v26 = vmul.f32 -1.442695, %v3751_v19  ;;  %v2672_v28 = vpop.f32.mrb[31].mxu0  ;;  %v2713_v42 = vpop.f32.mrb[31].mxu1 }
 0xb2a   :  { %v3689_v18 = vmul.f32 -1.442695, %v3752_v59  ;;  %v3690_v41 = vmul.f32 -1.442695, %v3754_v17 }
 0xb2b   :  { %4148 = vpow2.f32 %v3688_v26 }
 0xb2c   :  { %4150 = vpow2.f32 %v3689_v18 }
 0xb2d   :  { %4152 = vpow2.f32 %v3690_v41 }
 0xb2e   :  { %4154 = vtanh.f32 %v3753_v63 }
 0xb35   :  { %v4149_v29 = vpop.eup %4148 }
 0xb36   :  { %v4151_v10 = vpop.eup %4150  ;;  %v2722_v47 = vadd.f32 1.0, %v4149_v29 }
 0xb37   :  { %v2728_v49 = vadd.f32 1.0, %v4151_v10  ;;  %v4153_v51 = vpop.eup %4152 }
 0xb38   :  { %4156 = vrcp.f32 %v2722_v47  ;;  %v4155_v53 = vpop.eup %4154  ;;  %v2735_v55 = vadd.f32 1.0, %v4153_v51 }
 0xb39   :  { %4158 = vrcp.f32 %v2728_v49 }
 0xb3a   :  { %4160 = vrcp.f32 %v2735_v55 }
 0xb42   :  { %v4157_v46 = vpop.eup %4156 }
 0xb43   :  { %v4159_v52 = vpop.eup %4158  ;;  %v2739_v54 = vmul.f32 %v4157_v46, %v4155_v53 }
 0xb44   :  { %v2738_v56 = vmul.f32 %v4159_v52, %v6022_v45  ;;  %v4161_v58 = vpop.eup %4160 }
 0xb46   :  { %v6064_v57 = vadd.f32 %v2739_v54, %v2738_v56 }
 0xb48   :  { %4162 = vtanh.f32 %v6064_v57 }
 0xb52   :  { %v4163_v19 = vpop.eup %4162 }
 0xb53   :  { %v2742_v23 = vmul.f32 %v4163_v19, %v4161_v58 }
 0xb55   :  { %v2747_v27 = vpack.c.bf16 %v2742_v23, %v2742_v23 }
 0xb57   :  { %2781 = vmatmul.mubr.bf16.vlgmr.msra.gmra.mrb[36].mxu0 %v2747_v27  ;;  %2822 = vmatmul.mubr.bf16.vlgmr.msra.gmra.mrb[36].mxu1 %v2747_v27 }
 0xb58   :  { %2864 = vmatpush1.bf16.msra.mxu0 %v5782_v24  ;;  %2905 = vmatpush1.bf16.msra.mxu1 %v5787_v7 }
 0xb59   :  { %2865 = vmatprep.subr.bf16.mxu0 %v5792_v22  ;;  %2906 = vmatprep.subr.bf16.mxu1 %v5797_v21 }
 0xb5a   :  { %2895 = vmatprep.mubr.bf16.mxu0 %v6510_v0  ;;  %2936 = vmatprep.mubr.bf16.mxu1 %v6510_v0 }
 0xb5c   :  { %2866 = vmatpush1.bf16.msra.mxu0 %v5804_v20  ;;  %2907 = vmatpush1.bf16.msra.mxu1 %v5809_v60 }
 0xb5d   :  { %2867 = vmatprep.subr.bf16.mxu0 %v5816_v61  ;;  %2908 = vmatprep.subr.bf16.mxu1 %v5821_v11 }
 0xb60   :  { %2868 = vmatpush1.bf16.msra.mxu0 %v5830_v35  ;;  %2909 = vmatpush1.bf16.msra.mxu1 %v5835_v8 }
 0xb61   :  { %2869 = vmatprep.subr.bf16.mxu0 %v5842_v14  ;;  %2910 = vmatprep.subr.bf16.mxu1 %v5847_v5 }
 0xb64   :  { %2870 = vmatpush1.bf16.msra.mxu0 %v5854_v44  ;;  %2911 = vmatpush1.bf16.msra.mxu1 %v5859_v9 }
 0xb65   :  { %2871 = vmatprep.subr.bf16.mxu0 %v5866_v4  ;;  %2912 = vmatprep.subr.bf16.mxu1 %v5871_v13 }
 0xb68   :  { %2872 = vmatpush1.bf16.msra.mxu0 %v5878_v1  ;;  %2913 = vmatpush1.bf16.msra.mxu1 %v5883_v2 }
 0xb69   :  { %2873 = vmatprep.subr.bf16.mxu0 %v5890_v62  ;;  %2914 = vmatprep.subr.bf16.mxu1 %v5895_v6 }
 0xb6c   :  { %2874 = vmatpush1.bf16.msra.mxu0 %v5902_v3  ;;  %2915 = vmatpush1.bf16.msra.mxu1 %v5907_v12 }
 0xb6d   :  { %2875 = vmatprep.subr.bf16.mxu0 %v5914_v31  ;;  %2916 = vmatprep.subr.bf16.mxu1 %v5919_v32 }
 0xb70   :  { %2876 = vmatpush1.bf16.msra.mxu0 %v5926_v33  ;;  %2917 = vmatpush1.bf16.msra.mxu1 %v5931_v34 }
 0xb71   :  { %2877 = vmatprep.subr.bf16.mxu0 %v5938_v38  ;;  %2918 = vmatprep.subr.bf16.mxu1 %v5943_v39 }
 0xb74   :  { %2878 = vmatpush1.bf16.msra.mxu0 %v5950_v40  ;;  %2919 = vmatpush1.bf16.msra.mxu1 %v5955_v43 }
 0xb75   :  { %2978 = vmatprep.subr.bf16.mxu0 %v5765_v36  ;;  %3019 = vmatprep.subr.bf16.mxu1 %v5770_v37 }
 0xc2a   :  { %v2782_v45 = vpop.f32.mrb[36].mxu0  ;;  %v2823_v59 = vpop.f32.mrb[36].mxu1 }
 0xc2b   :  { %v3755_v25 = vadd.f32 %v2782_v45, %v6004_v48  ;;  %v2784_v15 = vpop.f32.mrb[37].mxu0  ;;  %v2825_v26 = vpop.f32.mrb[37].mxu1  ;;  %v3757_v49 = vadd.f32 %v2823_v59, %v6019_v30 }
 0xc2c   :  { %v3756_v28 = vadd.f32 %v2784_v15, %v6008_v50  ;;  %v2786_v42 = vpop.f32.mrb[38].mxu0  ;;  %v2827_v18 = vpop.f32.mrb[38].mxu1  ;;  %v3758_v10 = vadd.f32 %v2825_v26, %v6014_v16 }
 0xc2d   :  { %v3691_v17 = vmul.f32 -1.442695, %v3755_v25  ;;  %v2787_v41 = vpop.f32.mrb[39].mxu0  ;;  %v2828_v63 = vpop.f32.mrb[39].mxu1 }
 0xc2e   :  { %v3692_v29 = vmul.f32 -1.442695, %v3756_v28  ;;  %v3693_v47 = vmul.f32 -1.442695, %v3758_v10 }
 0xc2f   :  { %4164 = vpow2.f32 %v3691_v17 }
 0xc30   :  { %4166 = vpow2.f32 %v3692_v29 }
 0xc31   :  { %4168 = vpow2.f32 %v3693_v47 }
 0xc32   :  { %4170 = vtanh.f32 %v3757_v49 }
 0xc39   :  { %v4165_v51 = vpop.eup %4164 }
 0xc3a   :  { %v4167_v53 = vpop.eup %4166  ;;  %v2837_v46 = vadd.f32 1.0, %v4165_v51 }
 0xc3b   :  { %v2843_v52 = vadd.f32 1.0, %v4167_v53  ;;  %v4169_v54 = vpop.eup %4168 }
 0xc3c   :  { %4172 = vrcp.f32 %v2837_v46  ;;  %v4171_v55 = vpop.eup %4170  ;;  %v2850_v23 = vadd.f32 1.0, %v4169_v54 }
 0xc3d   :  { %4174 = vrcp.f32 %v2843_v52 }
 0xc3e   :  { %4176 = vrcp.f32 %v2850_v23 }
 0xc46   :  { %v4173_v56 = vpop.eup %4172 }
 0xc47   :  { %v4175_v58 = vpop.eup %4174  ;;  %v2854_v19 = vmul.f32 %v4173_v56, %v4171_v55 }
 0xc48   :  { %v2853_v27 = vmul.f32 %v4175_v58, %v6064_v57  ;;  %v4177_v59 = vpop.eup %4176 }
 0xc4a   :  { %v6106_v45 = vadd.f32 %v2854_v19, %v2853_v27 }
 0xc4c   :  { %4178 = vtanh.f32 %v6106_v45 }
 0xc56   :  { %v4179_v25 = vpop.eup %4178 }
 0xc57   :  { %v2857_v15 = vmul.f32 %v4179_v25, %v4177_v59 }
 0xc59   :  { %v2862_v26 = vpack.c.bf16 %v2857_v15, %v2857_v15 }
 0xc5b   :  { %2896 = vmatmul.mubr.bf16.vlgmr.msra.gmra.mrb[44].mxu0 %v2862_v26  ;;  %2937 = vmatmul.mubr.bf16.vlgmr.msra.gmra.mrb[44].mxu1 %v2862_v26 }
 0xc5c   :  { %2979 = vmatpush1.bf16.msra.mxu0 %v5782_v24  ;;  %3020 = vmatpush1.bf16.msra.mxu1 %v5787_v7 }
 0xc5d   :  { %2980 = vmatprep.subr.bf16.mxu0 %v5792_v22  ;;  %3021 = vmatprep.subr.bf16.mxu1 %v5797_v21 }
 0xc5e   :  { %3010 = vmatprep.mubr.bf16.mxu0 %v6510_v0  ;;  %3051 = vmatprep.mubr.bf16.mxu1 %v6510_v0 }
 0xc60   :  { %2981 = vmatpush1.bf16.msra.mxu0 %v5804_v20  ;;  %3022 = vmatpush1.bf16.msra.mxu1 %v5809_v60 }
 0xc61   :  { %2982 = vmatprep.subr.bf16.mxu0 %v5816_v61  ;;  %3023 = vmatprep.subr.bf16.mxu1 %v5821_v11 }
 0xc64   :  { %2983 = vmatpush1.bf16.msra.mxu0 %v5830_v35  ;;  %3024 = vmatpush1.bf16.msra.mxu1 %v5835_v8 }
 0xc65   :  { %2984 = vmatprep.subr.bf16.mxu0 %v5842_v14  ;;  %3025 = vmatprep.subr.bf16.mxu1 %v5847_v5 }
 0xc68   :  { %2985 = vmatpush1.bf16.msra.mxu0 %v5854_v44  ;;  %3026 = vmatpush1.bf16.msra.mxu1 %v5859_v9 }
 0xc69   :  { %2986 = vmatprep.subr.bf16.mxu0 %v5866_v4  ;;  %3027 = vmatprep.subr.bf16.mxu1 %v5871_v13 }
 0xc6c   :  { %2987 = vmatpush1.bf16.msra.mxu0 %v5878_v1  ;;  %3028 = vmatpush1.bf16.msra.mxu1 %v5883_v2 }
 0xc6d   :  { %2988 = vmatprep.subr.bf16.mxu0 %v5890_v62  ;;  %3029 = vmatprep.subr.bf16.mxu1 %v5895_v6 }
 0xc70   :  { %2989 = vmatpush1.bf16.msra.mxu0 %v5902_v3  ;;  %3030 = vmatpush1.bf16.msra.mxu1 %v5907_v12 }
 0xc71   :  { %2990 = vmatprep.subr.bf16.mxu0 %v5914_v31  ;;  %3031 = vmatprep.subr.bf16.mxu1 %v5919_v32 }
 0xc74   :  { %2991 = vmatpush1.bf16.msra.mxu0 %v5926_v33  ;;  %3032 = vmatpush1.bf16.msra.mxu1 %v5931_v34 }
 0xc75   :  { %2992 = vmatprep.subr.bf16.mxu0 %v5938_v38  ;;  %3033 = vmatprep.subr.bf16.mxu1 %v5943_v39 }
 0xc78   :  { %2993 = vmatpush1.bf16.msra.mxu0 %v5950_v40  ;;  %3034 = vmatpush1.bf16.msra.mxu1 %v5955_v43 }
 0xc79   :  { %3093 = vmatprep.subr.bf16.mxu0 %v5765_v36  ;;  %3134 = vmatprep.subr.bf16.mxu1 %v5770_v37 }
 0xd2e   :  { %v2897_v57 = vpop.f32.mrb[44].mxu0  ;;  %v2938_v28 = vpop.f32.mrb[44].mxu1 }
 0xd2f   :  { %v3759_v42 = vadd.f32 %v2897_v57, %v6004_v48  ;;  %v2899_v18 = vpop.f32.mrb[45].mxu0  ;;  %v2940_v17 = vpop.f32.mrb[45].mxu1  ;;  %v3761_v52 = vadd.f32 %v2938_v28, %v6019_v30 }
 0xd30   :  { %v3760_v41 = vadd.f32 %v2899_v18, %v6008_v50  ;;  %v2901_v63 = vpop.f32.mrb[46].mxu0  ;;  %v2942_v29 = vpop.f32.mrb[46].mxu1  ;;  %v3762_v53 = vadd.f32 %v2940_v17, %v6014_v16 }
 0xd31   :  { %v3694_v10 = vmul.f32 -1.442695, %v3759_v42  ;;  %v2902_v47 = vpop.f32.mrb[47].mxu0  ;;  %v2943_v49 = vpop.f32.mrb[47].mxu1 }
 0xd32   :  { %v3695_v51 = vmul.f32 -1.442695, %v3760_v41  ;;  %v3696_v46 = vmul.f32 -1.442695, %v3762_v53 }
 0xd33   :  { %4180 = vpow2.f32 %v3694_v10 }
 0xd34   :  { %4182 = vpow2.f32 %v3695_v51 }
 0xd35   :  { %4184 = vpow2.f32 %v3696_v46 }
 0xd36   :  { %4186 = vtanh.f32 %v3761_v52 }
 0xd3d   :  { %v4181_v54 = vpop.eup %4180 }
 0xd3e   :  { %v4183_v55 = vpop.eup %4182  ;;  %v2952_v56 = vadd.f32 1.0, %v4181_v54 }
 0xd3f   :  { %v2958_v58 = vadd.f32 1.0, %v4183_v55  ;;  %v4185_v19 = vpop.eup %4184 }
 0xd40   :  { %4188 = vrcp.f32 %v2952_v56  ;;  %v4187_v23 = vpop.eup %4186  ;;  %v2965_v15 = vadd.f32 1.0, %v4185_v19 }
 0xd41   :  { %4190 = vrcp.f32 %v2958_v58 }
 0xd42   :  { %4192 = vrcp.f32 %v2965_v15 }
 0xd4a   :  { %v4189_v27 = vpop.eup %4188 }
 0xd4b   :  { %v4191_v59 = vpop.eup %4190  ;;  %v2969_v25 = vmul.f32 %v4189_v27, %v4187_v23 }
 0xd4c   :  { %v2968_v26 = vmul.f32 %v4191_v59, %v6106_v45  ;;  %v4193_v28 = vpop.eup %4192 }
 0xd4e   :  { %v6148_v57 = vadd.f32 %v2969_v25, %v2968_v26 }
 0xd50   :  { %4194 = vtanh.f32 %v6148_v57 }
 0xd5a   :  { %v4195_v42 = vpop.eup %4194 }
 0xd5b   :  { %v2972_v18 = vmul.f32 %v4195_v42, %v4193_v28 }
 0xd5d   :  { %v2977_v17 = vpack.c.bf16 %v2972_v18, %v2972_v18 }
 0xd5f   :  { %3011 = vmatmul.mubr.bf16.vlgmr.msra.gmra.mrb[52].mxu0 %v2977_v17  ;;  %3052 = vmatmul.mubr.bf16.vlgmr.msra.gmra.mrb[52].mxu1 %v2977_v17 }
 0xd60   :  { %3094 = vmatpush1.bf16.msra.mxu0 %v5782_v24  ;;  %3135 = vmatpush1.bf16.msra.mxu1 %v5787_v7 }
 0xd61   :  { %3095 = vmatprep.subr.bf16.mxu0 %v5792_v22  ;;  %3136 = vmatprep.subr.bf16.mxu1 %v5797_v21 }
 0xd62   :  { %3125 = vmatprep.mubr.bf16.mxu0 %v6510_v0  ;;  %3166 = vmatprep.mubr.bf16.mxu1 %v6510_v0 }
 0xd64   :  { %3096 = vmatpush1.bf16.msra.mxu0 %v5804_v20  ;;  %3137 = vmatpush1.bf16.msra.mxu1 %v5809_v60 }
 0xd65   :  { %3097 = vmatprep.subr.bf16.mxu0 %v5816_v61  ;;  %3138 = vmatprep.subr.bf16.mxu1 %v5821_v11 }
 0xd68   :  { %3098 = vmatpush1.bf16.msra.mxu0 %v5830_v35  ;;  %3139 = vmatpush1.bf16.msra.mxu1 %v5835_v8 }
 0xd69   :  { %3099 = vmatprep.subr.bf16.mxu0 %v5842_v14  ;;  %3140 = vmatprep.subr.bf16.mxu1 %v5847_v5 }
 0xd6c   :  { %3100 = vmatpush1.bf16.msra.mxu0 %v5854_v44  ;;  %3141 = vmatpush1.bf16.msra.mxu1 %v5859_v9 }
 0xd6d   :  { %3101 = vmatprep.subr.bf16.mxu0 %v5866_v4  ;;  %3142 = vmatprep.subr.bf16.mxu1 %v5871_v13 }
 0xd70   :  { %3102 = vmatpush1.bf16.msra.mxu0 %v5878_v1  ;;  %3143 = vmatpush1.bf16.msra.mxu1 %v5883_v2 }
 0xd71   :  { %3103 = vmatprep.subr.bf16.mxu0 %v5890_v62  ;;  %3144 = vmatprep.subr.bf16.mxu1 %v5895_v6 }
 0xd74   :  { %3104 = vmatpush1.bf16.msra.mxu0 %v5902_v3  ;;  %3145 = vmatpush1.bf16.msra.mxu1 %v5907_v12 }
 0xd75   :  { %3105 = vmatprep.subr.bf16.mxu0 %v5914_v31  ;;  %3146 = vmatprep.subr.bf16.mxu1 %v5919_v32 }
 0xd78   :  { %3106 = vmatpush1.bf16.msra.mxu0 %v5926_v33  ;;  %3147 = vmatpush1.bf16.msra.mxu1 %v5931_v34 }
 0xd79   :  { %3107 = vmatprep.subr.bf16.mxu0 %v5938_v38  ;;  %3148 = vmatprep.subr.bf16.mxu1 %v5943_v39 }
 0xd7c   :  { %3108 = vmatpush1.bf16.msra.mxu0 %v5950_v40  ;;  %3149 = vmatpush1.bf16.msra.mxu1 %v5955_v43 }
 0xd7d   :  { %3208 = vmatprep.subr.bf16.mxu0 %v5765_v36  ;;  %3249 = vmatprep.subr.bf16.mxu1 %v5770_v37 }
 0xe32   :  { %v3012_v45 = vpop.f32.mrb[52].mxu0  ;;  %v3053_v41 = vpop.f32.mrb[52].mxu1 }
 0xe33   :  { %v3763_v63 = vadd.f32 %v3012_v45, %v6004_v48  ;;  %v3014_v29 = vpop.f32.mrb[53].mxu0  ;;  %v3055_v10 = vpop.f32.mrb[53].mxu1  ;;  %v3765_v37 = vadd.f32 %v3053_v41, %v6019_v30 }
 0xe34   :  { %v3764_v47 = vadd.f32 %v3014_v29, %v6008_v50  ;;  %v3016_v49 = vpop.f32.mrb[54].mxu0  ;;  %v3057_v51 = vpop.f32.mrb[54].mxu1  ;;  %v3766_v36 = vadd.f32 %v3055_v10, %v6014_v16 }
 0xe35   :  { %v3697_v53 = vmul.f32 -1.442695, %v3763_v63  ;;  %v3017_v46 = vpop.f32.mrb[55].mxu0  ;;  %v3058_v52 = vpop.f32.mrb[55].mxu1 }
 0xe36   :  { %v3698_v54 = vmul.f32 -1.442695, %v3764_v47  ;;  %v3699_v55 = vmul.f32 -1.442695, %v3766_v36 }
 0xe37   :  { %4196 = vpow2.f32 %v3697_v53 }
 0xe38   :  { %4198 = vpow2.f32 %v3698_v54 }
 0xe39   :  { %4200 = vpow2.f32 %v3699_v55 }
 0xe3a   :  { %4202 = vtanh.f32 %v3765_v37 }
 0xe41   :  { %v4197_v56 = vpop.eup %4196 }
 0xe42   :  { %v4199_v58 = vpop.eup %4198  ;;  %v3067_v19 = vadd.f32 1.0, %v4197_v56 }
 0xe43   :  { %v3073_v23 = vadd.f32 1.0, %v4199_v58  ;;  %v4201_v27 = vpop.eup %4200 }
 0xe44   :  { %4204 = vrcp.f32 %v3067_v19  ;;  %v4203_v59 = vpop.eup %4202  ;;  %v3080_v28 = vadd.f32 1.0, %v4201_v27 }
 0xe45   :  { %4206 = vrcp.f32 %v3073_v23 }
 0xe46   :  { %4208 = vrcp.f32 %v3080_v28  ;;  %v4329_v28 = vld [vmem:[%s6347_s5 + $0x2c] ss:$16 sps:$4 sm:$0xff]  }
 0xe4e   :  { %v4205_v25 = vpop.eup %4204 }
 0xe4f   :  { %v4207_v15 = vpop.eup %4206  ;;  %v3084_v26 = vmul.f32 %v4205_v25, %v4203_v59  ;;  %v4326_v25 = vld [vmem:[%s6347_s5] ss:$16 sps:$4 sm:$0xff]  }
 0xe50   :  { %v3083_v42 = vmul.f32 %v4207_v15, %v6148_v57  ;;  %v4209_v17 = vpop.eup %4208  ;;  %v4327_v15 = vld [vmem:[%s6347_s5 + $0x8] ss:$16 sps:$4 sm:$0xff]  }
 0xe52   :  { %v6190_v18 = vadd.f32 %v3084_v26, %v3083_v42  ;;  %v4328_v26 = vld [vmem:[%s6347_s5 + $0x24] ss:$16 sps:$4 sm:$0xff]   ;;  %v4330_v42 = vld [vmem:[%s6347_s5 + $0x20] ss:$16 sps:$4 sm:$0xff]  }
 0xe54   :  { %4210 = vtanh.f32 %v6190_v18 }
 0xe5e   :  { %v4211_v45 = vpop.eup %4210 }
 0xe5f   :  { %v3087_v41 = vmul.f32 %v4211_v45, %v4209_v17  ;;  %v4332_v17 = vld [vmem:[%s6347_s5 + $0x44] ss:$16 sps:$4 sm:$0xff]   ;;  %v4333_v45 = vld [vmem:[%s6347_s5 + $0x4c] ss:$16 sps:$4 sm:$0xff]  }
 0xe61   :  { %v3092_v63 = vpack.c.bf16 %v3087_v41, %v3087_v41  ;;  %v4335_v41 = vld [vmem:[%s6347_s5 + $0x48] ss:$16 sps:$4 sm:$0xff]  }
 0xe63   :  { %3126 = vmatmul.mubr.bf16.vlgmr.msra.gmra.mrb[60].mxu0 %v3092_v63  ;;  %3167 = vmatmul.mubr.bf16.vlgmr.msra.gmra.mrb[60].mxu1 %v3092_v63  ;;  %v4336_v63 = vld [vmem:[%s6347_s5 + $0x64] ss:$16 sps:$4 sm:$0xff]  }
 0xe64   :  { %3209 = vmatpush1.bf16.msra.mxu0 %v5782_v24  ;;  %3250 = vmatpush1.bf16.msra.mxu1 %v5787_v7  ;;  %v4324_v24 = vld [vmem:[%s6347_s5 + $0x4] ss:$16 sps:$4 sm:$0xff]   ;;  %v4325_v7 = vld [vmem:[%s6347_s5 + $0xc] ss:$16 sps:$4 sm:$0xff]  }
 0xe65   :  { %3210 = vmatprep.subr.bf16.mxu0 %v5792_v22  ;;  %3251 = vmatprep.subr.bf16.mxu1 %v5797_v21 }
 0xe66   :  { %3240 = vmatprep.mubr.bf16.mxu0 %v6510_v0  ;;  %3281 = vmatprep.mubr.bf16.mxu1 %v6510_v0 }
 0xe68   :  { %3211 = vmatpush1.bf16.msra.mxu0 %v5804_v20  ;;  %3252 = vmatpush1.bf16.msra.mxu1 %v5809_v60 }
 0xe69   :  { %3212 = vmatprep.subr.bf16.mxu0 %v5816_v61  ;;  %3253 = vmatprep.subr.bf16.mxu1 %v5821_v11 }
 0xe6c   :  { %3213 = vmatpush1.bf16.msra.mxu0 %v5830_v35  ;;  %3254 = vmatpush1.bf16.msra.mxu1 %v5835_v8 }
 0xe6d   :  { %3214 = vmatprep.subr.bf16.mxu0 %v5842_v14  ;;  %3255 = vmatprep.subr.bf16.mxu1 %v5847_v5 }
 0xe70   :  { %3215 = vmatpush1.bf16.msra.mxu0 %v5854_v44  ;;  %3256 = vmatpush1.bf16.msra.mxu1 %v5859_v9 }
 0xe71   :  { %3216 = vmatprep.subr.bf16.mxu0 %v5866_v4  ;;  %3257 = vmatprep.subr.bf16.mxu1 %v5871_v13 }
 0xe74   :  { %3217 = vmatpush1.bf16.msra.mxu0 %v5878_v1  ;;  %3258 = vmatpush1.bf16.msra.mxu1 %v5883_v2 }
 0xe75   :  { %3218 = vmatprep.subr.bf16.mxu0 %v5890_v62  ;;  %3259 = vmatprep.subr.bf16.mxu1 %v5895_v6 }
 0xe78   :  { %3219 = vmatpush1.bf16.msra.mxu0 %v5902_v3  ;;  %3260 = vmatpush1.bf16.msra.mxu1 %v5907_v12 }
 0xe79   :  { %3220 = vmatprep.subr.bf16.mxu0 %v5914_v31  ;;  %3261 = vmatprep.subr.bf16.mxu1 %v5919_v32 }
 0xe7c   :  { %3221 = vmatpush1.bf16.msra.mxu0 %v5926_v33  ;;  %3262 = vmatpush1.bf16.msra.mxu1 %v5931_v34 }
 0xe7d   :  { %3222 = vmatprep.subr.bf16.mxu0 %v5938_v38  ;;  %3263 = vmatprep.subr.bf16.mxu1 %v5943_v39 }
 0xe80   :  { %3223 = vmatpush1.bf16.msra.mxu0 %v5950_v40  ;;  %3264 = vmatpush1.bf16.msra.mxu1 %v5955_v43 }
 0xe81   :  { %3323 = vmatprep.subr.bf16.mxu0 %v4324_v24  ;;  %3364 = vmatprep.subr.bf16.mxu1 %v4325_v7  ;;  %v4337_v24 = vld [vmem:[%s6347_s5 + $0x6c] ss:$16 sps:$4 sm:$0xff]   ;;  %v4338_v7 = vld [vmem:[%s6347_s5 + $0x60] ss:$16 sps:$4 sm:$0xff]  }
 0xf36   :  { %v3127_v22 = vpop.f32.mrb[60].mxu0  ;;  %v3168_v21 = vpop.f32.mrb[60].mxu1 }
 0xf37   :  { %v3767_v20 = vadd.f32 %v3127_v22, %v6004_v48  ;;  %v3129_v60 = vpop.f32.mrb[61].mxu0  ;;  %v3170_v61 = vpop.f32.mrb[61].mxu1  ;;  %v3769_v10 = vadd.f32 %v3168_v21, %v6019_v30  ;;  %v4339_v22 = vld [vmem:[%s6347_s5 + $0x68] ss:$16 sps:$4 sm:$0xff]  }
 0xf38   :  { %v3768_v11 = vadd.f32 %v3129_v60, %v6008_v50  ;;  %v3131_v35 = vpop.f32.mrb[62].mxu0  ;;  %v3172_v8 = vpop.f32.mrb[62].mxu1  ;;  %v3770_v57 = vadd.f32 %v3170_v61, %v6014_v16 }
 0xf39   :  { %v3700_v14 = vmul.f32 -1.442695, %v3767_v20  ;;  %v3132_v5 = vpop.f32.mrb[63].mxu0  ;;  %v3173_v44 = vpop.f32.mrb[63].mxu1 }
 0xf3a   :  { %v3701_v9 = vmul.f32 -1.442695, %v3768_v11  ;;  %v3702_v29 = vmul.f32 -1.442695, %v3770_v57 }
 0xf3b   :  { %4212 = vpow2.f32 %v3700_v14 }
 0xf3c   :  { %4214 = vpow2.f32 %v3701_v9 }
 0xf3d   :  { %4216 = vpow2.f32 %v3702_v29 }
 0xf3e   :  { %4218 = vtanh.f32 %v3769_v10 }
 0xf45   :  { %v4213_v47 = vpop.eup %4212 }
 0xf46   :  { %v4215_v49 = vpop.eup %4214  ;;  %v3182_v51 = vadd.f32 1.0, %v4213_v47 }
 0xf47   :  { %v3188_v53 = vadd.f32 1.0, %v4215_v49  ;;  %v4217_v46 = vpop.eup %4216  ;;  %v3996_v49 = vld [vmem:[%s6349_s7] sm:$0xff]  }
 0xf48   :  { %4220 = vrcp.f32 %v3182_v51  ;;  %v4219_v52 = vpop.eup %4218  ;;  %v3195_v37 = vadd.f32 1.0, %v4217_v46  ;;  %v4342_v51 = vmov 0.0   ;;  %v3998_v46 = vld [vmem:[%s6349_s7 + $0x10] sm:$0xff]  }
 0xf49   :  { %4222 = vrcp.f32 %v3188_v53  ;;  %v3997_v53 = vld [vmem:[%s6349_s7 + $0x8] sm:$0xff]  }
 0xf4a   :  { %4224 = vrcp.f32 %v3195_v37  ;;  %v4003_v37 = vld [vmem:[%s6349_s7 + $0x38] sm:$0xff]  }
 0xf52   :  { %v4221_v54 = vpop.eup %4220 }
 0xf53   :  { %v4223_v36 = vpop.eup %4222  ;;  %v3199_v55 = vmul.f32 %v4221_v54, %v4219_v52  ;;  %v3999_v52 = vld [vmem:[%s6349_s7 + $0x18] sm:$0xff]   ;;  %v4000_v54 = vld [vmem:[%s6349_s7 + $0x20] sm:$0xff]  }
 0xf54   :  { %v3198_v56 = vmul.f32 %v4223_v36, %v6190_v18  ;;  %v4225_v19 = vpop.eup %4224  ;;  %v4331_v18 = vld [vmem:[%s6347_s5 + $0x28] ss:$16 sps:$4 sm:$0xff]  }
 0xf55   :  { %v4001_v36 = vld [vmem:[%s6349_s7 + $0x28] sm:$0xff]  }
 0xf56   :  { %v6236_v58 = vadd.f32 %v3199_v55, %v3198_v56  ;;  %v4002_v55 = vld [vmem:[%s6349_s7 + $0x30] sm:$0xff]   ;;  %v14_v56 = vstv %s6350_s8 }
 0xf57   :  { %15 = vst [vmem:[#allocation4] sm:$0x1] %v14_v56 }
 0xf58   :  { %4226 = vtanh.f32 %v6236_v58 }
 0xf62   :  { %v4227_v23 = vpop.eup %4226 }
 0xf63   :  { %v3202_v27 = vmul.f32 %v4227_v23, %v4225_v19 }
 0xf65   :  { %v3207_v59 = vpack.c.bf16 %v3202_v27, %v3202_v27 }
 0xf67   :  { %3241 = vmatmul.mubr.bf16.vlgmr.msra.gmra.mrb[68].mxu0 %v3207_v59  ;;  %3282 = vmatmul.mubr.bf16.vlgmr.msra.gmra.mrb[68].mxu1 %v3207_v59 }
 0xf68   :  { %3324 = vmatpush1.bf16.msra.mxu0 %v4326_v25  ;;  %3365 = vmatpush1.bf16.msra.mxu1 %v4327_v15 }
 0xf69   :  { %3325 = vmatprep.subr.bf16.mxu0 %v4328_v26  ;;  %3366 = vmatprep.subr.bf16.mxu1 %v4329_v28 }
 0xf6a   :  { %3355 = vmatprep.mubr.bf16.mxu0 %v6510_v0  ;;  %3396 = vmatprep.mubr.bf16.mxu1 %v6510_v0  ;;  %v4334_v0 = vld [vmem:[%s6347_s5 + $0x40] ss:$16 sps:$4 sm:$0xff]  }
 0xf6c   :  { %3326 = vmatpush1.bf16.msra.mxu0 %v4330_v42  ;;  %3367 = vmatpush1.bf16.msra.mxu1 %v4331_v18 }
 0xf6d   :  { %3327 = vmatprep.subr.bf16.mxu0 %v4332_v17  ;;  %3368 = vmatprep.subr.bf16.mxu1 %v4333_v45 }
 0xf70   :  { %3328 = vmatpush1.bf16.msra.mxu0 %v4334_v0  ;;  %3369 = vmatpush1.bf16.msra.mxu1 %v4335_v41 }
 0xf71   :  { %3329 = vmatprep.subr.bf16.mxu0 %v4336_v63  ;;  %3370 = vmatprep.subr.bf16.mxu1 %v4337_v24 }
 0xf74   :  { %3330 = vmatpush1.bf16.msra.mxu0 %v4338_v7  ;;  %3371 = vmatpush1.bf16.msra.mxu1 %v4339_v22 }
 0xf75   :  { %3331 = vmatprep.subr.bf16.mxu0 %v5866_v4  ;;  %3372 = vmatprep.subr.bf16.mxu1 %v5871_v13 }
 0xf78   :  { %3332 = vmatpush1.bf16.msra.mxu0 %v5878_v1  ;;  %3373 = vmatpush1.bf16.msra.mxu1 %v5883_v2 }
 0xf79   :  { %3333 = vmatprep.subr.bf16.mxu0 %v5890_v62  ;;  %3374 = vmatprep.subr.bf16.mxu1 %v5895_v6 }
 0xf7c   :  { %3334 = vmatpush1.bf16.msra.mxu0 %v5902_v3  ;;  %3375 = vmatpush1.bf16.msra.mxu1 %v5907_v12 }
 0xf7d   :  { %3335 = vmatprep.subr.bf16.mxu0 %v5914_v31  ;;  %3376 = vmatprep.subr.bf16.mxu1 %v5919_v32 }
 0xf80   :  { %3336 = vmatpush1.bf16.msra.mxu0 %v5926_v33  ;;  %3377 = vmatpush1.bf16.msra.mxu1 %v5931_v34 }
 0xf81   :  { %3337 = vmatprep.subr.bf16.mxu0 %v5938_v38  ;;  %3378 = vmatprep.subr.bf16.mxu1 %v5943_v39 }
 0xf84   :  { %3338 = vmatpush1.bf16.msra.mxu0 %v5950_v40  ;;  %3379 = vmatpush1.bf16.msra.mxu1 %v5955_v43 }
 0xf85   :  { %3727 = vmatprep.subr.bf16.mxu0 %v4342_v51 }
0x103a   :  { %v3242_v4 = vpop.f32.mrb[68].mxu0  ;;  %v3283_v13 = vpop.f32.mrb[68].mxu1 }
0x103b   :  { %v3771_v1 = vadd.f32 %v3242_v4, %v6004_v48  ;;  %v3244_v2 = vpop.f32.mrb[69].mxu0  ;;  %v3285_v62 = vpop.f32.mrb[69].mxu1  ;;  %v3773_v40 = vadd.f32 %v3283_v13, %v6019_v30 }
0x103c   :  { %v3772_v6 = vadd.f32 %v3244_v2, %v6008_v50  ;;  %v3246_v3 = vpop.f32.mrb[70].mxu0  ;;  %v3287_v12 = vpop.f32.mrb[70].mxu1  ;;  %v3774_v38 = vadd.f32 %v3285_v62, %v6014_v16 }
0x103d   :  { %v3703_v31 = vmul.f32 -1.442695, %v3771_v1  ;;  %v3247_v32 = vpop.f32.mrb[71].mxu0  ;;  %v3288_v33 = vpop.f32.mrb[71].mxu1 }
0x103e   :  { %v3704_v34 = vmul.f32 -1.442695, %v3772_v6  ;;  %v3705_v39 = vmul.f32 -1.442695, %v3774_v38 }
0x103f   :  { %4228 = vpow2.f32 %v3703_v31  ;;  %v3709_v31 = vld [vmem:[#allocation4] ss:$0 sm:$0xff] }
0x1040   :  { %4230 = vpow2.f32 %v3704_v34 }
0x1041   :  { %4232 = vpow2.f32 %v3705_v39 }
0x1042   :  { %4234 = vtanh.f32 %v3773_v40 }
0x1049   :  { %v4229_v43 = vpop.eup %4228 }
0x104a   :  { %v4231_v21 = vpop.eup %4230  ;;  %v3297_v20 = vadd.f32 1.0, %v4229_v43 }
0x104b   :  { %v3303_v60 = vadd.f32 1.0, %v4231_v21  ;;  %v4233_v61 = vpop.eup %4232 }
0x104c   :  { %4236 = vrcp.f32 %v3297_v20  ;;  %v4235_v11 = vpop.eup %4234  ;;  %v3310_v5 = vadd.f32 1.0, %v4233_v61 }
0x104d   :  { %4238 = vrcp.f32 %v3303_v60 }
0x104e   :  { %4240 = vrcp.f32 %v3310_v5 }
0x1056   :  { %v4237_v35 = vpop.eup %4236 }
0x1057   :  { %v4239_v8 = vpop.eup %4238  ;;  %v3314_v14 = vmul.f32 %v4237_v35, %v4235_v11 }
0x1058   :  { %v3313_v44 = vmul.f32 %v4239_v8, %v6236_v58  ;;  %v4241_v57 = vpop.eup %4240 }
0x105a   :  { %v6304_v9 = vadd.f32 %v3314_v14, %v3313_v44 }
0x105c   :  { %4242 = vtanh.f32 %v6304_v9 }
0x1066   :  { %v4243_v29 = vpop.eup %4242 }
0x1067   :  { %v3317_v10 = vmul.f32 %v4243_v29, %v4241_v57 }
0x1069   :  { %v3322_v47 = vpack.c.bf16 %v3317_v10, %v3317_v10 }
0x106b   :  { %3356 = vmatmul.mubr.bf16.vlgmr.msra.gmra.mrb[76].mxu0 %v3322_v47  ;;  %3397 = vmatmul.mubr.bf16.vlgmr.msra.gmra.mrb[76].mxu1 %v3322_v47 }
0x106c   :  { %3728 = vmatpush3.bf16.msra.mxu0 %v3996_v49  ;;  %3743 = vmatprep.mubr.msk.bf16.mxu0 %vm4343_vm2, %v4342_v51 }
0x106d   :  { %3729 = vmatprep.subr.bf16.mxu0 %v4342_v51 }
0x1070   :  { %3730 = vmatpush3.bf16.msra.mxu0 %v3997_v53 }
0x1071   :  { %3731 = vmatprep.subr.bf16.mxu0 %v4342_v51 }
0x1074   :  { %3732 = vmatpush3.bf16.msra.mxu0 %v3998_v46 }
0x1075   :  { %3733 = vmatprep.subr.bf16.mxu0 %v4342_v51 }
0x1078   :  { %3734 = vmatpush3.bf16.msra.mxu0 %v3999_v52 }
0x1079   :  { %3735 = vmatprep.subr.bf16.mxu0 %v4342_v51 }
0x107c   :  { %3736 = vmatpush3.bf16.msra.mxu0 %v4000_v54 }
0x107d   :  { %3737 = vmatprep.subr.bf16.mxu0 %v4342_v51 }
0x1080   :  { %3738 = vmatpush3.bf16.msra.mxu0 %v4001_v36 }
0x1081   :  { %3739 = vmatprep.subr.bf16.mxu0 %v4342_v51 }
0x1084   :  { %3740 = vmatpush3.bf16.msra.mxu0 %v4002_v55 }
0x1085   :  { %3741 = vmatprep.subr.bf16.mxu0 %v4342_v51 }
0x1088   :  { %3742 = vmatpush3.bf16.msra.mxu0 %v4003_v37 }
0x113e   :  { %v3357_v58 = vpop.f32.mrb[76].mxu0  ;;  %v3398_v19 = vpop.f32.mrb[76].mxu1 }
0x113f   :  { %v3775_v23 = vadd.f32 %v3357_v58, %v6004_v48  ;;  %v3359_v27 = vpop.f32.mrb[77].mxu0  ;;  %v3400_v59 = vpop.f32.mrb[77].mxu1  ;;  %v3777_v41 = vadd.f32 %v3398_v19, %v6019_v30 }
0x1140   :  { %v3776_v25 = vadd.f32 %v3359_v27, %v6008_v50  ;;  %v3361_v15 = vpop.f32.mrb[78].mxu0  ;;  %v3402_v26 = vpop.f32.mrb[78].mxu1  ;;  %v3778_v45 = vadd.f32 %v3400_v59, %v6014_v16 }
0x1141   :  { %v3706_v28 = vmul.f32 -1.442695, %v3775_v23  ;;  %v3362_v42 = vpop.f32.mrb[79].mxu0  ;;  %v3403_v18 = vpop.f32.mrb[79].mxu1 }
0x1142   :  { %v3707_v17 = vmul.f32 -1.442695, %v3776_v25  ;;  %v3708_v0 = vmul.f32 -1.442695, %v3778_v45 }
0x1143   :  { %4244 = vpow2.f32 %v3706_v28 }
0x1144   :  { %4246 = vpow2.f32 %v3707_v17 }
0x1145   :  { %4248 = vpow2.f32 %v3708_v0 }
0x1146   :  { %4250 = vtanh.f32 %v3777_v41 }
0x114d   :  { %v4245_v63 = vpop.eup %4244 }
0x114e   :  { %v4247_v24 = vpop.eup %4246  ;;  %v3412_v48 = vadd.f32 1.0, %v4245_v63 }
0x114f   :  { %v3418_v7 = vadd.f32 1.0, %v4247_v24  ;;  %v4249_v50 = vpop.eup %4248 }
0x1150   :  { %4252 = vrcp.f32 %v3412_v48  ;;  %v4251_v22 = vpop.eup %4250  ;;  %v3425_v2 = vadd.f32 1.0, %v4249_v50 }
0x1151   :  { %4254 = vrcp.f32 %v3418_v7 }
0x1152   :  { %4256 = vrcp.f32 %v3425_v2 }
0x115a   :  { %v4253_v4 = vpop.eup %4252 }
0x115b   :  { %v4255_v13 = vpop.eup %4254  ;;  %v3429_v1 = vmul.f32 %v4253_v4, %v4251_v22 }
0x115c   :  { %v3428_v62 = vmul.f32 %v4255_v13, %v6304_v9  ;;  %v4257_v30 = vpop.eup %4256 }
0x115e   :  { %v3430_v16 = vadd.f32 %v3429_v1, %v3428_v62 }
0x1160   :  { %4258 = vtanh.f32 %v3430_v16 }
0x116a   :  { %v4259_v6 = vpop.eup %4258 }
0x116b   :  { %v3432_v3 = vmul.f32 %v4259_v6, %v4257_v30 }
0x116d   :  { %v3433_v12 = vpack.c.bf16 %v3432_v3, %v3432_v3 }
0x116f   :  { %3744 = vmatmul.mubr.bf16.vlgmr.msra.gmra.mrb[80].mxu0 %v3433_v12 }
0x1242   :  { %v3539_v32 = vpop.f32.mrb[80].mxu0 }
0x1243   :  { %v3540_v33 = vadd.f32 %v3709_v31, %v3539_v32  ;;  %v3745_v34 = vpop.f32.mrb[81].mxu0 }
0x1244   :  { %v3542_v38 = vpop.f32.mrb[82].mxu0 }
0x1245   :  { %3546 = vst.msk [vmem:[%s6351_s9] sm:$0xff] %vm3545_vm3, %v3540_v33  ;;  %v3746_v39 = vpop.f32.mrb[83].mxu0 }

</bundles_post_ra>
